<compile_context>
chip_gen: v5e
topology: v5e:2x2
jax: 0.10.0
libtpu: 0.0.40
codegen_flags: <defaults>
</compile_context>

<pallas_src>
import math

import jax
import jax.numpy as jnp
from jax.experimental import pallas as pl
from jax.experimental.pallas import tpu as pltpu

# ----------------------------------------------------------------------------
# Small synthetic config (mirrors cfg.MODEL.* of TokenPose-B, scaled down)
# ----------------------------------------------------------------------------
B = 2
IMG_H, IMG_W = 96, 96            # cfg.MODEL.IMAGE_SIZE = [W, H]
IN_CH = 3
BASE_CHANNEL = 8                 # cfg.MODEL.BASE_CHANNEL
PATCH = (4, 4)                   # cfg.MODEL.PATCH_SIZE
NUM_JOINTS = 4                   # cfg.MODEL.NUM_JOINTS
DIM = 32                         # cfg.MODEL.DIM
DEPTH = 2                        # cfg.MODEL.TRANSFORMER_DEPTH
HEADS = 4                        # cfg.MODEL.TRANSFORMER_HEADS
MLP_RATIO = 3                    # cfg.MODEL.TRANSFORMER_MLP_RATIO
MLP_DIM = DIM * MLP_RATIO        # 96
HEAT_H, HEAT_W = IMG_H // 4, IMG_W // 4          # cfg.MODEL.HEATMAP_SIZE
HEATMAP_DIM = HEAT_H * HEAT_W                    # 576
HEATMAP_PAD = ((HEATMAP_DIM + 127) // 128) * 128  # 640 -> lane-dense head store
HIDDEN_HEATMAP_DIM = HEATMAP_DIM // 8            # 72
FEAT_H, FEAT_W = IMG_H // 4, IMG_W // 4          # HRNet outputs 1/4 resolution
N_PATCH_H, N_PATCH_W = FEAT_H // PATCH[0], FEAT_W // PATCH[1]
N_PATCH = N_PATCH_H * N_PATCH_W                  # 36
SEQ = NUM_JOINTS + N_PATCH                       # 40 tokens per image
HEAD_DIM = DIM // HEADS                          # 8
ATT_SCALE = HEAD_DIM ** -0.5                     # scale_with_head=True
STEM_K = 4                                       # stand-in stem: 4x4 conv, stride 4
SUPER = PATCH[0] * STEM_K                        # 16x16/s16 composed im2col
SUPER_FEAT = SUPER * SUPER * IN_CH               # 768
STEM_OUT = PATCH[0] * PATCH[1] * BASE_CHANNEL    # 128 (lane-dense intermediate)
N_SUB = PATCH[0] * PATCH[1]                      # 16 stem outputs per patch
HEAD_TWO_LAYER = DIM <= HIDDEN_HEATMAP_DIM * 0.5  # same condition as TokenPose_TB

# Packing assumptions of this synthetic config.
assert MLP_DIM == 3 * DIM                       # w_qkv & w_ff1 share one pack
assert MLP_DIM <= 128 and HIDDEN_HEATMAP_DIM <= 128 and DIM <= 128
assert SEQ % 8 == 0
assert HEAD_TWO_LAYER                           # two-layer mlp_head path only


# ----------------------------------------------------------------------------
# In-kernel helper
# ----------------------------------------------------------------------------
def _ln(x, gamma, beta, eps=1e-5):
    """LayerNorm over the last dim (torch nn.LayerNorm semantics, eps=1e-5)."""
    mu = jnp.mean(x, axis=-1, keepdims=True)
    xc = x - mu
    var = jnp.mean(xc * xc, axis=-1, keepdims=True)
    return xc * jax.lax.rsqrt(var + eps) * gamma + beta


# ----------------------------------------------------------------------------
# The single fused kernel: stem+patch-embed -> DEPTH transformer layers ->
# mlp_head.  One grid step per image (grid=(B,), "parallel").
# ----------------------------------------------------------------------------
def _tokenpose_kernel(xp_ref, sw_ref, pw_ref, ec_ref, wa_ref, wb_ref, ts_ref,
                      hw1_ref, hs_ref, hw2_ref, o_ref):
    ec = ec_ref[...]                                    # (SEQ+8, 128) consts

    # ---- stem (stand-in HRNet 4x4/s4 conv + ReLU) + 4x4 patch embedding ----
    # xp rows 0..NUM_JOINTS-1 are all-zero (keypoint-token slots).  The
    # constant those rows pick up from the bias path below is pre-subtracted
    # from the keypoint tokens stored in ec[:SEQ], so after the adds the token
    # state holds exactly [keypoint tokens ; patch_embed + bias + sine pos].
    h = jnp.dot(xp_ref[...], sw_ref[...], preferred_element_type=jnp.float32)
    h = jnp.maximum(h + ec[SEQ:SEQ + 1, :], 0.0)        # (SEQ, 128)
    x = jnp.dot(h, pw_ref[...], preferred_element_type=jnp.float32)
    x = x + ec[0:SEQ, 0:DIM]                            # (SEQ, DIM) tokens

    # Per-head lane masks, built once and reused for every layer / head.
    col = jax.lax.broadcasted_iota(jnp.int32, (1, DIM), 1)
    head_masks = [
        ((col >= hh * HEAD_DIM) & (col < (hh + 1) * HEAD_DIM)).astype(jnp.float32)
        for hh in range(HEADS)]

    # ---- transformer: DEPTH layers, weights fully VMEM-resident ----
    for d in range(DEPTH):                              # static unroll (2)
        ts = ts_ref[d]                                  # (8, 128) packed smalls
        ln1_g, ln1_b = ts[0:1, 0:DIM], ts[1:2, 0:DIM]
        ln2_g, ln2_b = ts[2:3, 0:DIM], ts[3:4, 0:DIM]
        b_out, b_ff2 = ts[4:5, 0:DIM], ts[5:6, 0:DIM]
        b_ff1 = ts[6:7, 0:MLP_DIM]
        wb = wb_ref[d]                                  # (DIM+MLP_DIM, DIM)

        # Residual(PreNorm(Attention)): one fused QKV matmul, per-head scores
        # via lane masks (zeros outside the head contribute exactly 0 to the
        # contraction), one fused output projection.
        y = _ln(x, ln1_g, ln1_b)
        qkv = jnp.dot(y, wa_ref[d, 0], preferred_element_type=jnp.float32)
        q = qkv[:, 0:DIM] * ATT_SCALE
        k = qkv[:, DIM:2 * DIM]
        v = qkv[:, 2 * DIM:3 * DIM]
        ov = jnp.zeros((SEQ, DIM), jnp.float32)
        for m in head_masks:                            # static unroll (4)
            s = jax.lax.dot_general(q * m, k, (((1,), (1,)), ((), ())),
                                    preferred_element_type=jnp.float32)
            s = s - jnp.max(s, axis=-1, keepdims=True)
            p = jnp.exp(s)
            p = p / jnp.sum(p, axis=-1, keepdims=True)  # exact softmax
            ov = ov + jnp.dot(p, v, preferred_element_type=jnp.float32) * m
        x = x + jnp.dot(ov, wb[0:DIM, :],
                        preferred_element_type=jnp.float32) + b_out

        # Residual(PreNorm(FeedForward))
        y = _ln(x, ln2_g, ln2_b)
        hid = jnp.dot(y, wa_ref[d, 1], preferred_element_type=jnp.float32) + b_ff1
        # tanh-GELU (EUP slot); ~1e-3 rel. deviation from torch's exact erf GELU.
        hid = jax.nn.gelu(hid, approximate=True)
        x = x + jnp.dot(hid, wb[DIM:DIM + MLP_DIM, :],
                        preferred_element_type=jnp.float32) + b_ff2

    # ---- mlp_head: LN -> Linear -> LN -> Linear (two-layer variant) ----
    # TODO(synk): attention mask handling (forward(mask=...)) not implemented;
    # the synthetic config never passes one.
    hs = hs_ref[...]                                    # (8, 128) packed smalls
    kp = x[0:NUM_JOINTS, :]                             # keypoint tokens
    y = _ln(kp, hs[0:1, 0:DIM], hs[1:2, 0:DIM])
    y = jnp.dot(y, hw1_ref[...], preferred_element_type=jnp.float32) \
        + hs[2:3, 0:HIDDEN_HEATMAP_DIM]
    y = _ln(y, hs[3:4, 0:HIDDEN_HEATMAP_DIM], hs[4:5, 0:HIDDEN_HEATMAP_DIM])
    out = jnp.dot(y, hw2_ref[0:HIDDEN_HEATMAP_DIM, :],
                  preferred_element_type=jnp.float32) \
        + hw2_ref[HIDDEN_HEATMAP_DIM:HIDDEN_HEATMAP_DIM + 1, :]
    o_ref[...] = out.astype(o_ref.dtype)                # (NUM_JOINTS, 640)


def _tokenpose_pallas(params, xp):
    bn = xp.shape[0] // SEQ
    return pl.pallas_call(
        _tokenpose_kernel,
        out_shape=jax.ShapeDtypeStruct((bn, NUM_JOINTS, HEATMAP_PAD), jnp.float32),
        grid=(bn,),
        in_specs=[
            pl.BlockSpec((SEQ, SUPER_FEAT), lambda b: (b, 0)),          # im2col
            pl.BlockSpec((SUPER_FEAT, STEM_OUT), lambda b: (0, 0)),     # stem W
            pl.BlockSpec((STEM_OUT, DIM), lambda b: (0, 0)),            # patch W
            pl.BlockSpec((SEQ + 8, 128), lambda b: (0, 0)),             # consts
            pl.BlockSpec((DEPTH, 2, DIM, 3 * DIM),
                         lambda b: (0, 0, 0, 0)),                       # qkv|ff1
            pl.BlockSpec((DEPTH, DIM + MLP_DIM, DIM),
                         lambda b: (0, 0, 0)),                          # out|ff2
            pl.BlockSpec((DEPTH, 8, 128), lambda b: (0, 0, 0)),         # ln/bias
            pl.BlockSpec((DIM, HIDDEN_HEATMAP_DIM), lambda b: (0, 0)),  # head W1
            pl.BlockSpec((8, 128), lambda b: (0, 0)),                   # head small
            pl.BlockSpec((HIDDEN_HEATMAP_DIM + 8, HEATMAP_PAD),
                         lambda b: (0, 0)),                             # head W2|b2
        ],
        out_specs=pl.BlockSpec((None, NUM_JOINTS, HEATMAP_PAD),
                               lambda b: (b, 0, 0)),
        compiler_params=pltpu.CompilerParams(dimension_semantics=("parallel",)),
    )(xp, params["stem_w"], params["patch_w"], params["embed_const"],
      params["wA"], params["wB"], params["tsmall"],
      params["head_w1"], params["head_small"], params["head_w2"])


# ----------------------------------------------------------------------------
# Plain-JAX glue
# ----------------------------------------------------------------------------
def _img_to_token_features(img):
    """NCHW image -> (B*SEQ, 768) im2col over 16x16/s16 super-patches, with
    NUM_JOINTS leading all-zero rows per image (keypoint-token slots).
    Per-row feature order is (p1, p2, ih, iw, c), matching kron(eye(16), stem_w)
    and the reference 'b c (h p1) (w p2) -> b (h w) (p1 p2 c)' rearrange."""
    bn, c, hh, ww = img.shape
    nh, nw = hh // SUPER, ww // SUPER
    x = img.reshape(bn, c, nh, PATCH[0], STEM_K, nw, PATCH[1], STEM_K)
    x = x.transpose(0, 2, 5, 3, 6, 4, 7, 1)     # b, nh, nw, p1, p2, ih, iw, c
    x = x.reshape(bn, nh * nw, SUPER_FEAT)
    x = jnp.pad(x, ((0, 0), (NUM_JOINTS, 0), (0, 0)))
    return x.reshape(bn * SEQ, SUPER_FEAT)


def _upsample2_nearest(x):
    # nn.Upsample(scale_factor=2, mode='nearest') on NCHW
    x = jnp.repeat(x, 2, axis=2)
    return jnp.repeat(x, 2, axis=3)


def _make_sine_pos_embedding(h, w, d_model, temperature=10000.0):
    scale = 2.0 * math.pi
    area = jnp.ones((1, h, w), jnp.float32)
    y_embed = jnp.cumsum(area, axis=1)
    x_embed = jnp.cumsum(area, axis=2)
    one_dir = d_model // 2
    eps = 1e-6
    y_embed = y_embed / (y_embed[:, -1:, :] + eps) * scale
    x_embed = x_embed / (x_embed[:, :, -1:] + eps) * scale
    dim_t = jnp.arange(one_dir, dtype=jnp.float32)
    dim_t = temperature ** (2.0 * jnp.floor(dim_t / 2.0) / one_dir)
    pos_x = x_embed[:, :, :, None] / dim_t
    pos_y = y_embed[:, :, :, None] / dim_t
    pos_x = jnp.stack((jnp.sin(pos_x[:, :, :, 0::2]),
                       jnp.cos(pos_x[:, :, :, 1::2])), axis=4).reshape(1, h, w, -1)
    pos_y = jnp.stack((jnp.sin(pos_y[:, :, :, 0::2]),
                       jnp.cos(pos_y[:, :, :, 1::2])), axis=4).reshape(1, h, w, -1)
    pos = jnp.concatenate((pos_y, pos_x), axis=3)      # (1, h, w, d_model)
    return pos.reshape(1, h * w, d_model)


# ----------------------------------------------------------------------------
# Parameter init (deterministic, synthetic)
# ----------------------------------------------------------------------------
def init_params(key):
    keys = iter(jax.random.split(key, 32))

    def nrm(shape, scale=0.02):
        return jax.random.normal(next(keys), shape, jnp.float32) * scale

    # TODO(synk): the multi-stage HRNET_base backbone is not reproduced; it is
    # replaced by a single 4x4/stride-4 conv stem (+ReLU) producing BASE_CHANNEL
    # features at 1/4 resolution, composed with the 4x4 patch embedding into a
    # single 16x16/s16 super-patch matmul (block-diagonal stem weight; ReLU is
    # elementwise so the composition is exact).
    stem_w = nrm((STEM_K * STEM_K * IN_CH, BASE_CHANNEL))        # (48, 8)
    stem_b = nrm((BASE_CHANNEL,))
    stem_big_w = jnp.kron(jnp.eye(N_SUB, dtype=jnp.float32), stem_w)  # (768,128)
    stem_b_tiled = jnp.tile(stem_b, N_SUB)                       # (128,)

    patch_w = nrm((STEM_OUT, DIM))                               # (128, 32)
    patch_b = nrm((DIM,))
    keypoint_token = nrm((NUM_JOINTS, DIM))
    pos = _make_sine_pos_embedding(N_PATCH_H, N_PATCH_W, DIM)[0]  # (36, 32)

    # The all-zero keypoint rows pick up relu(stem_b)@patch_w from the bias
    # path inside the kernel; pre-subtract it so those rows come out as the
    # keypoint tokens exactly (one matmul yields the whole (SEQ, DIM) state).
    corr = jnp.maximum(stem_b_tiled, 0.0) @ patch_w              # (32,)
    tok_add = jnp.concatenate(
        [keypoint_token - corr[None, :], pos + patch_b[None, :]], axis=0)
    embed_const = jnp.zeros((SEQ + 8, 128), jnp.float32)
    embed_const = embed_const.at[:SEQ, :DIM].set(tok_add)
    embed_const = embed_const.at[SEQ, :].set(stem_b_tiled)

    # Packed transformer weights (stacked over depth, lane-dense):
    #   wA[d,0]=W_qkv (DIM,3*DIM)  wA[d,1]=W_ff1 (DIM,MLP_DIM)
    #   wB[d,:DIM]=W_out           wB[d,DIM:]=W_ff2
    #   tsmall[d]: r0/1 ln1 g/b, r2/3 ln2 g/b, r4 b_out, r5 b_ff2, r6 b_ff1
    wa, wb, tsm = [], [], []
    for _ in range(DEPTH):
        w_qkv = nrm((DIM, 3 * DIM))         # no QKV bias (reference: bias=False)
        w_out = nrm((DIM, DIM))
        b_out = nrm((DIM,))
        w_ff1 = nrm((DIM, MLP_DIM))
        b_ff1 = nrm((MLP_DIM,))
        w_ff2 = nrm((MLP_DIM, DIM))
        b_ff2 = nrm((DIM,))
        wa.append(jnp.stack([w_qkv, w_ff1]))
        wb.append(jnp.concatenate([w_out, w_ff2], axis=0))
        sm = jnp.zeros((8, 128), jnp.float32)
        sm = sm.at[0, :DIM].set(1.0)        # ln1 gamma (torch default init)
        sm = sm.at[2, :DIM].set(1.0)        # ln2 gamma
        sm = sm.at[4, :DIM].set(b_out)
        sm = sm.at[5, :DIM].set(b_ff2)
        sm = sm.at[6, :MLP_DIM].set(b_ff1)
        tsm.append(sm)

    # mlp_head (two-layer variant): LN -> Linear(DIM->72) -> LN -> Linear(72->576)
    w1 = nrm((DIM, HIDDEN_HEATMAP_DIM))
    b1 = nrm((HIDDEN_HEATMAP_DIM,))
    w2 = nrm((HIDDEN_HEATMAP_DIM, HEATMAP_DIM))
    b2 = nrm((HEATMAP_DIM,))
    hw2 = jnp.zeros((HIDDEN_HEATMAP_DIM + 8, HEATMAP_PAD), jnp.float32)
    hw2 = hw2.at[:HIDDEN_HEATMAP_DIM, :HEATMAP_DIM].set(w2)      # lane-dense 640
    hw2 = hw2.at[HIDDEN_HEATMAP_DIM, :HEATMAP_DIM].set(b2)
    hsm = jnp.zeros((8, 128), jnp.float32)
    hsm = hsm.at[0, :DIM].set(1.0)                               # head ln1 gamma
    hsm = hsm.at[2, :HIDDEN_HEATMAP_DIM].set(b1)
    hsm = hsm.at[3, :HIDDEN_HEATMAP_DIM].set(1.0)                # head ln2 gamma

    return {
        "stem_w": stem_big_w,
        "patch_w": patch_w,
        "embed_const": embed_const,
        "wA": jnp.stack(wa),
        "wB": jnp.stack(wb),
        "tsmall": jnp.stack(tsm),
        "head_w1": w1,
        "head_small": hsm,
        "head_w2": hw2,
    }


# ----------------------------------------------------------------------------
# Forward pass (mirrors TokenPose_B.forward)
# ----------------------------------------------------------------------------
@jax.jit
def _forward_core(params, img):
    bn = img.shape[0]
    xp = _img_to_token_features(img)                     # (B*SEQ, 768)
    hm_pad = _tokenpose_pallas(params, xp)               # (B, J, 640)
    hm = hm_pad[:, :, :HEATMAP_DIM].reshape(bn, NUM_JOINTS, HEAT_H, HEAT_W)
    heatmap = _upsample2_nearest(_upsample2_nearest(hm))
    return hm, heatmap


def tokenpose_b_forward(params, data):
    x, heatmap = _forward_core(params, data["img"])
    pred_heat = [None, None, None, x, heatmap]
    pred_mask = [None, None, None, None, data["mask"][-1]]
    return dict(mask=data["mask"][-1], heatmap=data["gt_heat"][-1],
                premask=pred_mask, preheat=pred_heat)


# ----------------------------------------------------------------------------
if __name__ == "__main__":
    key = jax.random.PRNGKey(0)
    k_param, k_img, k_gt = jax.random.split(key, 3)

    params = init_params(k_param)
    img = jax.random.normal(k_img, (B, IN_CH, IMG_H, IMG_W), jnp.float32)
    mask = [None, None, None, None,
            jnp.ones((B, 1, IMG_H, IMG_W), jnp.float32)]
    gt_heat = [None, None, None, None,
               jax.random.normal(k_gt, (B, NUM_JOINTS, HEAT_H, HEAT_W),
                                 jnp.float32)]
    data = {"img": img, "mask": mask, "gt_heat": gt_heat}

    out = tokenpose_b_forward(params, data)
    jax.block_until_ready(out["preheat"][3])
    jax.block_until_ready(out["preheat"][4])

    assert out["preheat"][3].shape == (B, NUM_JOINTS, HEAT_H, HEAT_W)
    assert out["preheat"][4].shape == (B, NUM_JOINTS, 4 * HEAT_H, 4 * HEAT_W)
    assert bool(jnp.all(jnp.isfinite(out["preheat"][4])))
    print("KERNEL_OK")
</pallas_src>

<mosaic_0001>
module attributes {stable_mosaic.version = 11 : i64} {
  func.func @_tokenpose_kernel(%arg0: i32, %arg1: memref<40x768xf32, #tpu.memory_space<vmem>>, %arg2: memref<768x128xf32, #tpu.memory_space<vmem>>, %arg3: memref<128x32xf32, #tpu.memory_space<vmem>>, %arg4: memref<48x128xf32, #tpu.memory_space<vmem>>, %arg5: memref<2x2x32x96xf32, #tpu.memory_space<vmem>>, %arg6: memref<2x128x32xf32, #tpu.memory_space<vmem>>, %arg7: memref<2x8x128xf32, #tpu.memory_space<vmem>>, %arg8: memref<32x72xf32, #tpu.memory_space<vmem>>, %arg9: memref<8x128xf32, #tpu.memory_space<vmem>>, %arg10: memref<80x640xf32, #tpu.memory_space<vmem>>, %arg11: memref<1x4x640xf32, #tpu.memory_space<vmem>>) attributes {dimension_semantics = [#tpu.dimension_semantics<parallel>], iteration_bounds = array<i64: 2>, scalar_prefetch = 0 : i64, scratch_operands = 0 : i64, tpu.core_type = #tpu.core_type<tc>, window_params = [{transform_indices = @transform_0, window_bounds = array<i64: 40, 768>}, {pipeline_mode = #tpu.pipeline_mode<synchronous>, transform_indices = @transform_1, window_bounds = array<i64: 768, 128>}, {pipeline_mode = #tpu.pipeline_mode<synchronous>, transform_indices = @transform_2, window_bounds = array<i64: 128, 32>}, {pipeline_mode = #tpu.pipeline_mode<synchronous>, transform_indices = @transform_3, window_bounds = array<i64: 48, 128>}, {pipeline_mode = #tpu.pipeline_mode<synchronous>, transform_indices = @transform_4, window_bounds = array<i64: 2, 2, 32, 96>}, {pipeline_mode = #tpu.pipeline_mode<synchronous>, transform_indices = @transform_5, window_bounds = array<i64: 2, 128, 32>}, {pipeline_mode = #tpu.pipeline_mode<synchronous>, transform_indices = @transform_6, window_bounds = array<i64: 2, 8, 128>}, {pipeline_mode = #tpu.pipeline_mode<synchronous>, transform_indices = @transform_7, window_bounds = array<i64: 32, 72>}, {pipeline_mode = #tpu.pipeline_mode<synchronous>, transform_indices = @transform_8, window_bounds = array<i64: 8, 128>}, {pipeline_mode = #tpu.pipeline_mode<synchronous>, transform_indices = @transform_9, window_bounds = array<i64: 80, 640>}, {transform_indices = @transform_10, window_bounds = array<i64: 1, 4, 640>}]} {
    %c0 = arith.constant 0 : index
    %c0_0 = arith.constant 0 : index
    %0 = vector.load %arg4[%c0, %c0_0] : memref<48x128xf32, #tpu.memory_space<vmem>>, vector<48x128xf32>
    %c0_1 = arith.constant 0 : index
    %c0_2 = arith.constant 0 : index
    %1 = vector.load %arg1[%c0_1, %c0_2] : memref<40x768xf32, #tpu.memory_space<vmem>>, vector<40x768xf32>
    %c0_3 = arith.constant 0 : index
    %c0_4 = arith.constant 0 : index
    %2 = vector.load %arg2[%c0_3, %c0_4] : memref<768x128xf32, #tpu.memory_space<vmem>>, vector<768x128xf32>
    %cst = arith.constant dense<0.000000e+00> : vector<40x128xf32>
    %3 = tpu.matmul %1, %2, %cst {dimension_numbers = #tpu.dot_dimension_numbers<[1], [0], [0], [1], [0, 0, 1, 1], [], []>} : vector<40x768xf32>, vector<768x128xf32>, vector<40x128xf32> -> vector<40x128xf32>
    %4 = vector.extract_strided_slice %0 {offsets = [40, 0], sizes = [1, 128], strides = [1, 1]} : vector<48x128xf32> to vector<1x128xf32>
    %5 = vector.broadcast %4 : vector<1x128xf32> to vector<40x128xf32>
    %6 = arith.addf %3, %5 : vector<40x128xf32>
    %cst_5 = arith.constant 0.000000e+00 : f32
    %7 = vector.broadcast %cst_5 : f32 to vector<40x128xf32>
    %8 = arith.maximumf %6, %7 : vector<40x128xf32>
    %c0_6 = arith.constant 0 : index
    %c0_7 = arith.constant 0 : index
    %9 = vector.load %arg3[%c0_6, %c0_7] : memref<128x32xf32, #tpu.memory_space<vmem>>, vector<128x32xf32>
    %cst_8 = arith.constant dense<0.000000e+00> : vector<40x32xf32>
    %10 = tpu.matmul %8, %9, %cst_8 {dimension_numbers = #tpu.dot_dimension_numbers<[1], [0], [0], [1], [0, 0, 1, 1], [], []>} : vector<40x128xf32>, vector<128x32xf32>, vector<40x32xf32> -> vector<40x32xf32>
    %11 = vector.extract_strided_slice %0 {offsets = [0, 0], sizes = [40, 32], strides = [1, 1]} : vector<48x128xf32> to vector<40x32xf32>
    %12 = arith.addf %10, %11 : vector<40x32xf32>
    %13 = tpu.iota {dimensions = array<i32: 1>} : vector<1x32xi32>
    %c0_i32 = arith.constant 0 : i32
    %14 = vector.broadcast %c0_i32 : i32 to vector<1x32xi32>
    %15 = arith.cmpi sge, %13, %14 : vector<1x32xi32>
    %c8_i32 = arith.constant 8 : i32
    %16 = vector.broadcast %c8_i32 : i32 to vector<1x32xi32>
    %17 = arith.cmpi slt, %13, %16 : vector<1x32xi32>
    %18 = arith.andi %15, %17 : vector<1x32xi1>
    %19 = arith.extui %18 : vector<1x32xi1> to vector<1x32xi32>
    %20 = arith.sitofp %19 : vector<1x32xi32> to vector<1x32xf32>
    %c8_i32_9 = arith.constant 8 : i32
    %21 = vector.broadcast %c8_i32_9 : i32 to vector<1x32xi32>
    %22 = arith.cmpi sge, %13, %21 : vector<1x32xi32>
    %c16_i32 = arith.constant 16 : i32
    %23 = vector.broadcast %c16_i32 : i32 to vector<1x32xi32>
    %24 = arith.cmpi slt, %13, %23 : vector<1x32xi32>
    %25 = arith.andi %22, %24 : vector<1x32xi1>
    %26 = arith.extui %25 : vector<1x32xi1> to vector<1x32xi32>
    %27 = arith.sitofp %26 : vector<1x32xi32> to vector<1x32xf32>
    %c16_i32_10 = arith.constant 16 : i32
    %28 = vector.broadcast %c16_i32_10 : i32 to vector<1x32xi32>
    %29 = arith.cmpi sge, %13, %28 : vector<1x32xi32>
    %c24_i32 = arith.constant 24 : i32
    %30 = vector.broadcast %c24_i32 : i32 to vector<1x32xi32>
    %31 = arith.cmpi slt, %13, %30 : vector<1x32xi32>
    %32 = arith.andi %29, %31 : vector<1x32xi1>
    %33 = arith.extui %32 : vector<1x32xi1> to vector<1x32xi32>
    %34 = arith.sitofp %33 : vector<1x32xi32> to vector<1x32xf32>
    %c24_i32_11 = arith.constant 24 : i32
    %35 = vector.broadcast %c24_i32_11 : i32 to vector<1x32xi32>
    %36 = arith.cmpi sge, %13, %35 : vector<1x32xi32>
    %c32_i32 = arith.constant 32 : i32
    %37 = vector.broadcast %c32_i32 : i32 to vector<1x32xi32>
    %38 = arith.cmpi slt, %13, %37 : vector<1x32xi32>
    %39 = arith.andi %36, %38 : vector<1x32xi1>
    %40 = arith.extui %39 : vector<1x32xi1> to vector<1x32xi32>
    %41 = arith.sitofp %40 : vector<1x32xi32> to vector<1x32xf32>
    %c0_12 = arith.constant 0 : index
    %c0_13 = arith.constant 0 : index
    %c0_14 = arith.constant 0 : index
    %42 = vector.load %arg7[%c0_12, %c0_13, %c0_14] : memref<2x8x128xf32, #tpu.memory_space<vmem>>, vector<1x8x128xf32>
    %43 = vector.shape_cast %42 : vector<1x8x128xf32> to vector<8x128xf32>
    %44 = vector.extract_strided_slice %43 {offsets = [0, 0], sizes = [1, 32], strides = [1, 1]} : vector<8x128xf32> to vector<1x32xf32>
    %45 = vector.extract_strided_slice %43 {offsets = [1, 0], sizes = [1, 32], strides = [1, 1]} : vector<8x128xf32> to vector<1x32xf32>
    %46 = vector.extract_strided_slice %43 {offsets = [2, 0], sizes = [1, 32], strides = [1, 1]} : vector<8x128xf32> to vector<1x32xf32>
    %47 = vector.extract_strided_slice %43 {offsets = [3, 0], sizes = [1, 32], strides = [1, 1]} : vector<8x128xf32> to vector<1x32xf32>
    %48 = vector.extract_strided_slice %43 {offsets = [4, 0], sizes = [1, 32], strides = [1, 1]} : vector<8x128xf32> to vector<1x32xf32>
    %49 = vector.extract_strided_slice %43 {offsets = [5, 0], sizes = [1, 32], strides = [1, 1]} : vector<8x128xf32> to vector<1x32xf32>
    %50 = vector.extract_strided_slice %43 {offsets = [6, 0], sizes = [1, 96], strides = [1, 1]} : vector<8x128xf32> to vector<1x96xf32>
    %c0_15 = arith.constant 0 : index
    %c0_16 = arith.constant 0 : index
    %c0_17 = arith.constant 0 : index
    %51 = vector.load %arg6[%c0_15, %c0_16, %c0_17] : memref<2x128x32xf32, #tpu.memory_space<vmem>>, vector<1x128x32xf32>
    %52 = vector.shape_cast %51 : vector<1x128x32xf32> to vector<128x32xf32>
    %cst_18 = arith.constant dense<0.000000e+00> : vector<40xf32>
    %53 = vector.multi_reduction <add>, %12, %cst_18 [1] : vector<40x32xf32> to vector<40xf32>
    %54 = vector.shape_cast %53 : vector<40xf32> to vector<40x1xf32>
    %cst_19 = arith.constant 3.200000e+01 : f32
    %55 = vector.broadcast %cst_19 : f32 to vector<40x1xf32>
    %56 = arith.divf %54, %55 : vector<40x1xf32>
    %57 = vector.broadcast %56 : vector<40x1xf32> to vector<40x32xf32>
    %58 = arith.subf %12, %57 : vector<40x32xf32>
    %59 = arith.mulf %58, %58 : vector<40x32xf32>
    %cst_20 = arith.constant dense<0.000000e+00> : vector<40xf32>
    %60 = vector.multi_reduction <add>, %59, %cst_20 [1] : vector<40x32xf32> to vector<40xf32>
    %61 = vector.shape_cast %60 : vector<40xf32> to vector<40x1xf32>
    %cst_21 = arith.constant 3.200000e+01 : f32
    %62 = vector.broadcast %cst_21 : f32 to vector<40x1xf32>
    %63 = arith.divf %61, %62 : vector<40x1xf32>
    %cst_22 = arith.constant 9.99999974E-6 : f32
    %64 = vector.broadcast %cst_22 : f32 to vector<40x1xf32>
    %65 = arith.addf %63, %64 : vector<40x1xf32>
    %66 = math.rsqrt %65 : vector<40x1xf32>
    %67 = vector.broadcast %66 : vector<40x1xf32> to vector<40x32xf32>
    %68 = arith.mulf %58, %67 : vector<40x32xf32>
    %69 = vector.broadcast %44 : vector<1x32xf32> to vector<40x32xf32>
    %70 = arith.mulf %68, %69 : vector<40x32xf32>
    %71 = vector.broadcast %45 : vector<1x32xf32> to vector<40x32xf32>
    %72 = arith.addf %70, %71 : vector<40x32xf32>
    %c0_23 = arith.constant 0 : index
    %c0_24 = arith.constant 0 : index
    %c0_25 = arith.constant 0 : index
    %c0_26 = arith.constant 0 : index
    %73 = vector.load %arg5[%c0_23, %c0_24, %c0_25, %c0_26] : memref<2x2x32x96xf32, #tpu.memory_space<vmem>>, vector<1x1x32x96xf32>
    %74 = vector.shape_cast %73 : vector<1x1x32x96xf32> to vector<32x96xf32>
    %cst_27 = arith.constant dense<0.000000e+00> : vector<40x96xf32>
    %75 = tpu.matmul %72, %74, %cst_27 {dimension_numbers = #tpu.dot_dimension_numbers<[1], [0], [0], [1], [0, 0, 1, 1], [], []>} : vector<40x32xf32>, vector<32x96xf32>, vector<40x96xf32> -> vector<40x96xf32>
    %76 = vector.extract_strided_slice %75 {offsets = [0, 0], sizes = [40, 32], strides = [1, 1]} : vector<40x96xf32> to vector<40x32xf32>
    %cst_28 = arith.constant 0.353553385 : f32
    %77 = vector.broadcast %cst_28 : f32 to vector<40x32xf32>
    %78 = arith.mulf %76, %77 : vector<40x32xf32>
    %79 = vector.extract_strided_slice %75 {offsets = [0, 32], sizes = [40, 32], strides = [1, 1]} : vector<40x96xf32> to vector<40x32xf32>
    %80 = vector.extract_strided_slice %75 {offsets = [0, 64], sizes = [40, 32], strides = [1, 1]} : vector<40x96xf32> to vector<40x32xf32>
    %cst_29 = arith.constant 0.000000e+00 : f32
    %81 = vector.broadcast %cst_29 : f32 to vector<40x32xf32>
    %82 = vector.broadcast %20 : vector<1x32xf32> to vector<40x32xf32>
    %83 = arith.mulf %78, %82 : vector<40x32xf32>
    %cst_30 = arith.constant dense<0.000000e+00> : vector<40x40xf32>
    %84 = tpu.matmul %83, %79, %cst_30 {dimension_numbers = #tpu.dot_dimension_numbers<[1], [1], [0], [0], [0, 0, 1, 0], [], []>} : vector<40x32xf32>, vector<40x32xf32>, vector<40x40xf32> -> vector<40x40xf32>
    %cst_31 = arith.constant dense<0xFF800000> : vector<40xf32>
    %85 = vector.multi_reduction <maximumf>, %84, %cst_31 [1] : vector<40x40xf32> to vector<40xf32>
    %86 = vector.shape_cast %85 : vector<40xf32> to vector<40x1xf32>
    %87 = vector.broadcast %86 : vector<40x1xf32> to vector<40x40xf32>
    %88 = arith.subf %84, %87 : vector<40x40xf32>
    %89 = math.exp %88 : vector<40x40xf32>
    %cst_32 = arith.constant dense<0.000000e+00> : vector<40xf32>
    %90 = vector.multi_reduction <add>, %89, %cst_32 [1] : vector<40x40xf32> to vector<40xf32>
    %91 = vector.shape_cast %90 : vector<40xf32> to vector<40x1xf32>
    %92 = vector.broadcast %91 : vector<40x1xf32> to vector<40x40xf32>
    %93 = arith.divf %89, %92 : vector<40x40xf32>
    %cst_33 = arith.constant dense<0.000000e+00> : vector<40x32xf32>
    %94 = tpu.matmul %93, %80, %cst_33 {dimension_numbers = #tpu.dot_dimension_numbers<[1], [0], [0], [1], [0, 0, 1, 1], [], []>} : vector<40x40xf32>, vector<40x32xf32>, vector<40x32xf32> -> vector<40x32xf32>
    %95 = vector.broadcast %20 : vector<1x32xf32> to vector<40x32xf32>
    %96 = arith.mulf %94, %95 : vector<40x32xf32>
    %97 = arith.addf %81, %96 : vector<40x32xf32>
    %98 = vector.broadcast %27 : vector<1x32xf32> to vector<40x32xf32>
    %99 = arith.mulf %78, %98 : vector<40x32xf32>
    %cst_34 = arith.constant dense<0.000000e+00> : vector<40x40xf32>
    %100 = tpu.matmul %99, %79, %cst_34 {dimension_numbers = #tpu.dot_dimension_numbers<[1], [1], [0], [0], [0, 0, 1, 0], [], []>} : vector<40x32xf32>, vector<40x32xf32>, vector<40x40xf32> -> vector<40x40xf32>
    %cst_35 = arith.constant dense<0xFF800000> : vector<40xf32>
    %101 = vector.multi_reduction <maximumf>, %100, %cst_35 [1] : vector<40x40xf32> to vector<40xf32>
    %102 = vector.shape_cast %101 : vector<40xf32> to vector<40x1xf32>
    %103 = vector.broadcast %102 : vector<40x1xf32> to vector<40x40xf32>
    %104 = arith.subf %100, %103 : vector<40x40xf32>
    %105 = math.exp %104 : vector<40x40xf32>
    %cst_36 = arith.constant dense<0.000000e+00> : vector<40xf32>
    %106 = vector.multi_reduction <add>, %105, %cst_36 [1] : vector<40x40xf32> to vector<40xf32>
    %107 = vector.shape_cast %106 : vector<40xf32> to vector<40x1xf32>
    %108 = vector.broadcast %107 : vector<40x1xf32> to vector<40x40xf32>
    %109 = arith.divf %105, %108 : vector<40x40xf32>
    %cst_37 = arith.constant dense<0.000000e+00> : vector<40x32xf32>
    %110 = tpu.matmul %109, %80, %cst_37 {dimension_numbers = #tpu.dot_dimension_numbers<[1], [0], [0], [1], [0, 0, 1, 1], [], []>} : vector<40x40xf32>, vector<40x32xf32>, vector<40x32xf32> -> vector<40x32xf32>
    %111 = vector.broadcast %27 : vector<1x32xf32> to vector<40x32xf32>
    %112 = arith.mulf %110, %111 : vector<40x32xf32>
    %113 = arith.addf %97, %112 : vector<40x32xf32>
    %114 = vector.broadcast %34 : vector<1x32xf32> to vector<40x32xf32>
    %115 = arith.mulf %78, %114 : vector<40x32xf32>
    %cst_38 = arith.constant dense<0.000000e+00> : vector<40x40xf32>
    %116 = tpu.matmul %115, %79, %cst_38 {dimension_numbers = #tpu.dot_dimension_numbers<[1], [1], [0], [0], [0, 0, 1, 0], [], []>} : vector<40x32xf32>, vector<40x32xf32>, vector<40x40xf32> -> vector<40x40xf32>
    %cst_39 = arith.constant dense<0xFF800000> : vector<40xf32>
    %117 = vector.multi_reduction <maximumf>, %116, %cst_39 [1] : vector<40x40xf32> to vector<40xf32>
    %118 = vector.shape_cast %117 : vector<40xf32> to vector<40x1xf32>
    %119 = vector.broadcast %118 : vector<40x1xf32> to vector<40x40xf32>
    %120 = arith.subf %116, %119 : vector<40x40xf32>
    %121 = math.exp %120 : vector<40x40xf32>
    %cst_40 = arith.constant dense<0.000000e+00> : vector<40xf32>
    %122 = vector.multi_reduction <add>, %121, %cst_40 [1] : vector<40x40xf32> to vector<40xf32>
    %123 = vector.shape_cast %122 : vector<40xf32> to vector<40x1xf32>
    %124 = vector.broadcast %123 : vector<40x1xf32> to vector<40x40xf32>
    %125 = arith.divf %121, %124 : vector<40x40xf32>
    %cst_41 = arith.constant dense<0.000000e+00> : vector<40x32xf32>
    %126 = tpu.matmul %125, %80, %cst_41 {dimension_numbers = #tpu.dot_dimension_numbers<[1], [0], [0], [1], [0, 0, 1, 1], [], []>} : vector<40x40xf32>, vector<40x32xf32>, vector<40x32xf32> -> vector<40x32xf32>
    %127 = vector.broadcast %34 : vector<1x32xf32> to vector<40x32xf32>
    %128 = arith.mulf %126, %127 : vector<40x32xf32>
    %129 = arith.addf %113, %128 : vector<40x32xf32>
    %130 = vector.broadcast %41 : vector<1x32xf32> to vector<40x32xf32>
    %131 = arith.mulf %78, %130 : vector<40x32xf32>
    %cst_42 = arith.constant dense<0.000000e+00> : vector<40x40xf32>
    %132 = tpu.matmul %131, %79, %cst_42 {dimension_numbers = #tpu.dot_dimension_numbers<[1], [1], [0], [0], [0, 0, 1, 0], [], []>} : vector<40x32xf32>, vector<40x32xf32>, vector<40x40xf32> -> vector<40x40xf32>
    %cst_43 = arith.constant dense<0xFF800000> : vector<40xf32>
    %133 = vector.multi_reduction <maximumf>, %132, %cst_43 [1] : vector<40x40xf32> to vector<40xf32>
    %134 = vector.shape_cast %133 : vector<40xf32> to vector<40x1xf32>
    %135 = vector.broadcast %134 : vector<40x1xf32> to vector<40x40xf32>
    %136 = arith.subf %132, %135 : vector<40x40xf32>
    %137 = math.exp %136 : vector<40x40xf32>
    %cst_44 = arith.constant dense<0.000000e+00> : vector<40xf32>
    %138 = vector.multi_reduction <add>, %137, %cst_44 [1] : vector<40x40xf32> to vector<40xf32>
    %139 = vector.shape_cast %138 : vector<40xf32> to vector<40x1xf32>
    %140 = vector.broadcast %139 : vector<40x1xf32> to vector<40x40xf32>
    %141 = arith.divf %137, %140 : vector<40x40xf32>
    %cst_45 = arith.constant dense<0.000000e+00> : vector<40x32xf32>
    %142 = tpu.matmul %141, %80, %cst_45 {dimension_numbers = #tpu.dot_dimension_numbers<[1], [0], [0], [1], [0, 0, 1, 1], [], []>} : vector<40x40xf32>, vector<40x32xf32>, vector<40x32xf32> -> vector<40x32xf32>
    %143 = vector.broadcast %41 : vector<1x32xf32> to vector<40x32xf32>
    %144 = arith.mulf %142, %143 : vector<40x32xf32>
    %145 = arith.addf %129, %144 : vector<40x32xf32>
    %146 = vector.extract_strided_slice %52 {offsets = [0, 0], sizes = [32, 32], strides = [1, 1]} : vector<128x32xf32> to vector<32x32xf32>
    %cst_46 = arith.constant dense<0.000000e+00> : vector<40x32xf32>
    %147 = tpu.matmul %145, %146, %cst_46 {dimension_numbers = #tpu.dot_dimension_numbers<[1], [0], [0], [1], [0, 0, 1, 1], [], []>} : vector<40x32xf32>, vector<32x32xf32>, vector<40x32xf32> -> vector<40x32xf32>
    %148 = arith.addf %12, %147 : vector<40x32xf32>
    %149 = vector.broadcast %48 : vector<1x32xf32> to vector<40x32xf32>
    %150 = arith.addf %148, %149 : vector<40x32xf32>
    %cst_47 = arith.constant dense<0.000000e+00> : vector<40xf32>
    %151 = vector.multi_reduction <add>, %150, %cst_47 [1] : vector<40x32xf32> to vector<40xf32>
    %152 = vector.shape_cast %151 : vector<40xf32> to vector<40x1xf32>
    %cst_48 = arith.constant 3.200000e+01 : f32
    %153 = vector.broadcast %cst_48 : f32 to vector<40x1xf32>
    %154 = arith.divf %152, %153 : vector<40x1xf32>
    %155 = vector.broadcast %154 : vector<40x1xf32> to vector<40x32xf32>
    %156 = arith.subf %150, %155 : vector<40x32xf32>
    %157 = arith.mulf %156, %156 : vector<40x32xf32>
    %cst_49 = arith.constant dense<0.000000e+00> : vector<40xf32>
    %158 = vector.multi_reduction <add>, %157, %cst_49 [1] : vector<40x32xf32> to vector<40xf32>
    %159 = vector.shape_cast %158 : vector<40xf32> to vector<40x1xf32>
    %cst_50 = arith.constant 3.200000e+01 : f32
    %160 = vector.broadcast %cst_50 : f32 to vector<40x1xf32>
    %161 = arith.divf %159, %160 : vector<40x1xf32>
    %cst_51 = arith.constant 9.99999974E-6 : f32
    %162 = vector.broadcast %cst_51 : f32 to vector<40x1xf32>
    %163 = arith.addf %161, %162 : vector<40x1xf32>
    %164 = math.rsqrt %163 : vector<40x1xf32>
    %165 = vector.broadcast %164 : vector<40x1xf32> to vector<40x32xf32>
    %166 = arith.mulf %156, %165 : vector<40x32xf32>
    %167 = vector.broadcast %46 : vector<1x32xf32> to vector<40x32xf32>
    %168 = arith.mulf %166, %167 : vector<40x32xf32>
    %169 = vector.broadcast %47 : vector<1x32xf32> to vector<40x32xf32>
    %170 = arith.addf %168, %169 : vector<40x32xf32>
    %c0_52 = arith.constant 0 : index
    %c1 = arith.constant 1 : index
    %c0_53 = arith.constant 0 : index
    %c0_54 = arith.constant 0 : index
    %171 = vector.load %arg5[%c0_52, %c1, %c0_53, %c0_54] : memref<2x2x32x96xf32, #tpu.memory_space<vmem>>, vector<1x1x32x96xf32>
    %172 = vector.shape_cast %171 : vector<1x1x32x96xf32> to vector<32x96xf32>
    %cst_55 = arith.constant dense<0.000000e+00> : vector<40x96xf32>
    %173 = tpu.matmul %170, %172, %cst_55 {dimension_numbers = #tpu.dot_dimension_numbers<[1], [0], [0], [1], [0, 0, 1, 1], [], []>} : vector<40x32xf32>, vector<32x96xf32>, vector<40x96xf32> -> vector<40x96xf32>
    %174 = vector.broadcast %50 : vector<1x96xf32> to vector<40x96xf32>
    %175 = arith.addf %173, %174 : vector<40x96xf32>
    %176 = arith.mulf %175, %175 : vector<40x96xf32>
    %177 = arith.mulf %175, %176 : vector<40x96xf32>
    %cst_56 = arith.constant 4.471500e-02 : f32
    %178 = vector.broadcast %cst_56 : f32 to vector<40x96xf32>
    %179 = arith.mulf %178, %177 : vector<40x96xf32>
    %180 = arith.addf %175, %179 : vector<40x96xf32>
    %cst_57 = arith.constant 0.797884583 : f32
    %181 = vector.broadcast %cst_57 : f32 to vector<40x96xf32>
    %182 = arith.mulf %181, %180 : vector<40x96xf32>
    %183 = math.tanh %182 : vector<40x96xf32>
    %cst_58 = arith.constant 1.000000e+00 : f32
    %184 = vector.broadcast %cst_58 : f32 to vector<40x96xf32>
    %185 = arith.addf %184, %183 : vector<40x96xf32>
    %cst_59 = arith.constant 5.000000e-01 : f32
    %186 = vector.broadcast %cst_59 : f32 to vector<40x96xf32>
    %187 = arith.mulf %186, %185 : vector<40x96xf32>
    %188 = arith.mulf %175, %187 : vector<40x96xf32>
    %189 = vector.extract_strided_slice %52 {offsets = [32, 0], sizes = [96, 32], strides = [1, 1]} : vector<128x32xf32> to vector<96x32xf32>
    %cst_60 = arith.constant dense<0.000000e+00> : vector<40x32xf32>
    %190 = tpu.matmul %188, %189, %cst_60 {dimension_numbers = #tpu.dot_dimension_numbers<[1], [0], [0], [1], [0, 0, 1, 1], [], []>} : vector<40x96xf32>, vector<96x32xf32>, vector<40x32xf32> -> vector<40x32xf32>
    %191 = arith.addf %150, %190 : vector<40x32xf32>
    %192 = vector.broadcast %49 : vector<1x32xf32> to vector<40x32xf32>
    %193 = arith.addf %191, %192 : vector<40x32xf32>
    %c1_61 = arith.constant 1 : index
    %c0_62 = arith.constant 0 : index
    %c0_63 = arith.constant 0 : index
    %194 = vector.load %arg7[%c1_61, %c0_62, %c0_63] : memref<2x8x128xf32, #tpu.memory_space<vmem>>, vector<1x8x128xf32>
    %195 = vector.shape_cast %194 : vector<1x8x128xf32> to vector<8x128xf32>
    %196 = vector.extract_strided_slice %195 {offsets = [0, 0], sizes = [1, 32], strides = [1, 1]} : vector<8x128xf32> to vector<1x32xf32>
    %197 = vector.extract_strided_slice %195 {offsets = [1, 0], sizes = [1, 32], strides = [1, 1]} : vector<8x128xf32> to vector<1x32xf32>
    %198 = vector.extract_strided_slice %195 {offsets = [2, 0], sizes = [1, 32], strides = [1, 1]} : vector<8x128xf32> to vector<1x32xf32>
    %199 = vector.extract_strided_slice %195 {offsets = [3, 0], sizes = [1, 32], strides = [1, 1]} : vector<8x128xf32> to vector<1x32xf32>
    %200 = vector.extract_strided_slice %195 {offsets = [4, 0], sizes = [1, 32], strides = [1, 1]} : vector<8x128xf32> to vector<1x32xf32>
    %201 = vector.extract_strided_slice %195 {offsets = [5, 0], sizes = [1, 32], strides = [1, 1]} : vector<8x128xf32> to vector<1x32xf32>
    %202 = vector.extract_strided_slice %195 {offsets = [6, 0], sizes = [1, 96], strides = [1, 1]} : vector<8x128xf32> to vector<1x96xf32>
    %c1_64 = arith.constant 1 : index
    %c0_65 = arith.constant 0 : index
    %c0_66 = arith.constant 0 : index
    %203 = vector.load %arg6[%c1_64, %c0_65, %c0_66] : memref<2x128x32xf32, #tpu.memory_space<vmem>>, vector<1x128x32xf32>
    %204 = vector.shape_cast %203 : vector<1x128x32xf32> to vector<128x32xf32>
    %cst_67 = arith.constant dense<0.000000e+00> : vector<40xf32>
    %205 = vector.multi_reduction <add>, %193, %cst_67 [1] : vector<40x32xf32> to vector<40xf32>
    %206 = vector.shape_cast %205 : vector<40xf32> to vector<40x1xf32>
    %cst_68 = arith.constant 3.200000e+01 : f32
    %207 = vector.broadcast %cst_68 : f32 to vector<40x1xf32>
    %208 = arith.divf %206, %207 : vector<40x1xf32>
    %209 = vector.broadcast %208 : vector<40x1xf32> to vector<40x32xf32>
    %210 = arith.subf %193, %209 : vector<40x32xf32>
    %211 = arith.mulf %210, %210 : vector<40x32xf32>
    %cst_69 = arith.constant dense<0.000000e+00> : vector<40xf32>
    %212 = vector.multi_reduction <add>, %211, %cst_69 [1] : vector<40x32xf32> to vector<40xf32>
    %213 = vector.shape_cast %212 : vector<40xf32> to vector<40x1xf32>
    %cst_70 = arith.constant 3.200000e+01 : f32
    %214 = vector.broadcast %cst_70 : f32 to vector<40x1xf32>
    %215 = arith.divf %213, %214 : vector<40x1xf32>
    %cst_71 = arith.constant 9.99999974E-6 : f32
    %216 = vector.broadcast %cst_71 : f32 to vector<40x1xf32>
    %217 = arith.addf %215, %216 : vector<40x1xf32>
    %218 = math.rsqrt %217 : vector<40x1xf32>
    %219 = vector.broadcast %218 : vector<40x1xf32> to vector<40x32xf32>
    %220 = arith.mulf %210, %219 : vector<40x32xf32>
    %221 = vector.broadcast %196 : vector<1x32xf32> to vector<40x32xf32>
    %222 = arith.mulf %220, %221 : vector<40x32xf32>
    %223 = vector.broadcast %197 : vector<1x32xf32> to vector<40x32xf32>
    %224 = arith.addf %222, %223 : vector<40x32xf32>
    %c1_72 = arith.constant 1 : index
    %c0_73 = arith.constant 0 : index
    %c0_74 = arith.constant 0 : index
    %c0_75 = arith.constant 0 : index
    %225 = vector.load %arg5[%c1_72, %c0_73, %c0_74, %c0_75] : memref<2x2x32x96xf32, #tpu.memory_space<vmem>>, vector<1x1x32x96xf32>
    %226 = vector.shape_cast %225 : vector<1x1x32x96xf32> to vector<32x96xf32>
    %cst_76 = arith.constant dense<0.000000e+00> : vector<40x96xf32>
    %227 = tpu.matmul %224, %226, %cst_76 {dimension_numbers = #tpu.dot_dimension_numbers<[1], [0], [0], [1], [0, 0, 1, 1], [], []>} : vector<40x32xf32>, vector<32x96xf32>, vector<40x96xf32> -> vector<40x96xf32>
    %228 = vector.extract_strided_slice %227 {offsets = [0, 0], sizes = [40, 32], strides = [1, 1]} : vector<40x96xf32> to vector<40x32xf32>
    %cst_77 = arith.constant 0.353553385 : f32
    %229 = vector.broadcast %cst_77 : f32 to vector<40x32xf32>
    %230 = arith.mulf %228, %229 : vector<40x32xf32>
    %231 = vector.extract_strided_slice %227 {offsets = [0, 32], sizes = [40, 32], strides = [1, 1]} : vector<40x96xf32> to vector<40x32xf32>
    %232 = vector.extract_strided_slice %227 {offsets = [0, 64], sizes = [40, 32], strides = [1, 1]} : vector<40x96xf32> to vector<40x32xf32>
    %cst_78 = arith.constant 0.000000e+00 : f32
    %233 = vector.broadcast %cst_78 : f32 to vector<40x32xf32>
    %234 = vector.broadcast %20 : vector<1x32xf32> to vector<40x32xf32>
    %235 = arith.mulf %230, %234 : vector<40x32xf32>
    %cst_79 = arith.constant dense<0.000000e+00> : vector<40x40xf32>
    %236 = tpu.matmul %235, %231, %cst_79 {dimension_numbers = #tpu.dot_dimension_numbers<[1], [1], [0], [0], [0, 0, 1, 0], [], []>} : vector<40x32xf32>, vector<40x32xf32>, vector<40x40xf32> -> vector<40x40xf32>
    %cst_80 = arith.constant dense<0xFF800000> : vector<40xf32>
    %237 = vector.multi_reduction <maximumf>, %236, %cst_80 [1] : vector<40x40xf32> to vector<40xf32>
    %238 = vector.shape_cast %237 : vector<40xf32> to vector<40x1xf32>
    %239 = vector.broadcast %238 : vector<40x1xf32> to vector<40x40xf32>
    %240 = arith.subf %236, %239 : vector<40x40xf32>
    %241 = math.exp %240 : vector<40x40xf32>
    %cst_81 = arith.constant dense<0.000000e+00> : vector<40xf32>
    %242 = vector.multi_reduction <add>, %241, %cst_81 [1] : vector<40x40xf32> to vector<40xf32>
    %243 = vector.shape_cast %242 : vector<40xf32> to vector<40x1xf32>
    %244 = vector.broadcast %243 : vector<40x1xf32> to vector<40x40xf32>
    %245 = arith.divf %241, %244 : vector<40x40xf32>
    %cst_82 = arith.constant dense<0.000000e+00> : vector<40x32xf32>
    %246 = tpu.matmul %245, %232, %cst_82 {dimension_numbers = #tpu.dot_dimension_numbers<[1], [0], [0], [1], [0, 0, 1, 1], [], []>} : vector<40x40xf32>, vector<40x32xf32>, vector<40x32xf32> -> vector<40x32xf32>
    %247 = vector.broadcast %20 : vector<1x32xf32> to vector<40x32xf32>
    %248 = arith.mulf %246, %247 : vector<40x32xf32>
    %249 = arith.addf %233, %248 : vector<40x32xf32>
    %250 = vector.broadcast %27 : vector<1x32xf32> to vector<40x32xf32>
    %251 = arith.mulf %230, %250 : vector<40x32xf32>
    %cst_83 = arith.constant dense<0.000000e+00> : vector<40x40xf32>
    %252 = tpu.matmul %251, %231, %cst_83 {dimension_numbers = #tpu.dot_dimension_numbers<[1], [1], [0], [0], [0, 0, 1, 0], [], []>} : vector<40x32xf32>, vector<40x32xf32>, vector<40x40xf32> -> vector<40x40xf32>
    %cst_84 = arith.constant dense<0xFF800000> : vector<40xf32>
    %253 = vector.multi_reduction <maximumf>, %252, %cst_84 [1] : vector<40x40xf32> to vector<40xf32>
    %254 = vector.shape_cast %253 : vector<40xf32> to vector<40x1xf32>
    %255 = vector.broadcast %254 : vector<40x1xf32> to vector<40x40xf32>
    %256 = arith.subf %252, %255 : vector<40x40xf32>
    %257 = math.exp %256 : vector<40x40xf32>
    %cst_85 = arith.constant dense<0.000000e+00> : vector<40xf32>
    %258 = vector.multi_reduction <add>, %257, %cst_85 [1] : vector<40x40xf32> to vector<40xf32>
    %259 = vector.shape_cast %258 : vector<40xf32> to vector<40x1xf32>
    %260 = vector.broadcast %259 : vector<40x1xf32> to vector<40x40xf32>
    %261 = arith.divf %257, %260 : vector<40x40xf32>
    %cst_86 = arith.constant dense<0.000000e+00> : vector<40x32xf32>
    %262 = tpu.matmul %261, %232, %cst_86 {dimension_numbers = #tpu.dot_dimension_numbers<[1], [0], [0], [1], [0, 0, 1, 1], [], []>} : vector<40x40xf32>, vector<40x32xf32>, vector<40x32xf32> -> vector<40x32xf32>
    %263 = vector.broadcast %27 : vector<1x32xf32> to vector<40x32xf32>
    %264 = arith.mulf %262, %263 : vector<40x32xf32>
    %265 = arith.addf %249, %264 : vector<40x32xf32>
    %266 = vector.broadcast %34 : vector<1x32xf32> to vector<40x32xf32>
    %267 = arith.mulf %230, %266 : vector<40x32xf32>
    %cst_87 = arith.constant dense<0.000000e+00> : vector<40x40xf32>
    %268 = tpu.matmul %267, %231, %cst_87 {dimension_numbers = #tpu.dot_dimension_numbers<[1], [1], [0], [0], [0, 0, 1, 0], [], []>} : vector<40x32xf32>, vector<40x32xf32>, vector<40x40xf32> -> vector<40x40xf32>
    %cst_88 = arith.constant dense<0xFF800000> : vector<40xf32>
    %269 = vector.multi_reduction <maximumf>, %268, %cst_88 [1] : vector<40x40xf32> to vector<40xf32>
    %270 = vector.shape_cast %269 : vector<40xf32> to vector<40x1xf32>
    %271 = vector.broadcast %270 : vector<40x1xf32> to vector<40x40xf32>
    %272 = arith.subf %268, %271 : vector<40x40xf32>
    %273 = math.exp %272 : vector<40x40xf32>
    %cst_89 = arith.constant dense<0.000000e+00> : vector<40xf32>
    %274 = vector.multi_reduction <add>, %273, %cst_89 [1] : vector<40x40xf32> to vector<40xf32>
    %275 = vector.shape_cast %274 : vector<40xf32> to vector<40x1xf32>
    %276 = vector.broadcast %275 : vector<40x1xf32> to vector<40x40xf32>
    %277 = arith.divf %273, %276 : vector<40x40xf32>
    %cst_90 = arith.constant dense<0.000000e+00> : vector<40x32xf32>
    %278 = tpu.matmul %277, %232, %cst_90 {dimension_numbers = #tpu.dot_dimension_numbers<[1], [0], [0], [1], [0, 0, 1, 1], [], []>} : vector<40x40xf32>, vector<40x32xf32>, vector<40x32xf32> -> vector<40x32xf32>
    %279 = vector.broadcast %34 : vector<1x32xf32> to vector<40x32xf32>
    %280 = arith.mulf %278, %279 : vector<40x32xf32>
    %281 = arith.addf %265, %280 : vector<40x32xf32>
    %282 = vector.broadcast %41 : vector<1x32xf32> to vector<40x32xf32>
    %283 = arith.mulf %230, %282 : vector<40x32xf32>
    %cst_91 = arith.constant dense<0.000000e+00> : vector<40x40xf32>
    %284 = tpu.matmul %283, %231, %cst_91 {dimension_numbers = #tpu.dot_dimension_numbers<[1], [1], [0], [0], [0, 0, 1, 0], [], []>} : vector<40x32xf32>, vector<40x32xf32>, vector<40x40xf32> -> vector<40x40xf32>
    %cst_92 = arith.constant dense<0xFF800000> : vector<40xf32>
    %285 = vector.multi_reduction <maximumf>, %284, %cst_92 [1] : vector<40x40xf32> to vector<40xf32>
    %286 = vector.shape_cast %285 : vector<40xf32> to vector<40x1xf32>
    %287 = vector.broadcast %286 : vector<40x1xf32> to vector<40x40xf32>
    %288 = arith.subf %284, %287 : vector<40x40xf32>
    %289 = math.exp %288 : vector<40x40xf32>
    %cst_93 = arith.constant dense<0.000000e+00> : vector<40xf32>
    %290 = vector.multi_reduction <add>, %289, %cst_93 [1] : vector<40x40xf32> to vector<40xf32>
    %291 = vector.shape_cast %290 : vector<40xf32> to vector<40x1xf32>
    %292 = vector.broadcast %291 : vector<40x1xf32> to vector<40x40xf32>
    %293 = arith.divf %289, %292 : vector<40x40xf32>
    %cst_94 = arith.constant dense<0.000000e+00> : vector<40x32xf32>
    %294 = tpu.matmul %293, %232, %cst_94 {dimension_numbers = #tpu.dot_dimension_numbers<[1], [0], [0], [1], [0, 0, 1, 1], [], []>} : vector<40x40xf32>, vector<40x32xf32>, vector<40x32xf32> -> vector<40x32xf32>
    %295 = vector.broadcast %41 : vector<1x32xf32> to vector<40x32xf32>
    %296 = arith.mulf %294, %295 : vector<40x32xf32>
    %297 = arith.addf %281, %296 : vector<40x32xf32>
    %298 = vector.extract_strided_slice %204 {offsets = [0, 0], sizes = [32, 32], strides = [1, 1]} : vector<128x32xf32> to vector<32x32xf32>
    %cst_95 = arith.constant dense<0.000000e+00> : vector<40x32xf32>
    %299 = tpu.matmul %297, %298, %cst_95 {dimension_numbers = #tpu.dot_dimension_numbers<[1], [0], [0], [1], [0, 0, 1, 1], [], []>} : vector<40x32xf32>, vector<32x32xf32>, vector<40x32xf32> -> vector<40x32xf32>
    %300 = arith.addf %193, %299 : vector<40x32xf32>
    %301 = vector.broadcast %200 : vector<1x32xf32> to vector<40x32xf32>
    %302 = arith.addf %300, %301 : vector<40x32xf32>
    %cst_96 = arith.constant dense<0.000000e+00> : vector<40xf32>
    %303 = vector.multi_reduction <add>, %302, %cst_96 [1] : vector<40x32xf32> to vector<40xf32>
    %304 = vector.shape_cast %303 : vector<40xf32> to vector<40x1xf32>
    %cst_97 = arith.constant 3.200000e+01 : f32
    %305 = vector.broadcast %cst_97 : f32 to vector<40x1xf32>
    %306 = arith.divf %304, %305 : vector<40x1xf32>
    %307 = vector.broadcast %306 : vector<40x1xf32> to vector<40x32xf32>
    %308 = arith.subf %302, %307 : vector<40x32xf32>
    %309 = arith.mulf %308, %308 : vector<40x32xf32>
    %cst_98 = arith.constant dense<0.000000e+00> : vector<40xf32>
    %310 = vector.multi_reduction <add>, %309, %cst_98 [1] : vector<40x32xf32> to vector<40xf32>
    %311 = vector.shape_cast %310 : vector<40xf32> to vector<40x1xf32>
    %cst_99 = arith.constant 3.200000e+01 : f32
    %312 = vector.broadcast %cst_99 : f32 to vector<40x1xf32>
    %313 = arith.divf %311, %312 : vector<40x1xf32>
    %cst_100 = arith.constant 9.99999974E-6 : f32
    %314 = vector.broadcast %cst_100 : f32 to vector<40x1xf32>
    %315 = arith.addf %313, %314 : vector<40x1xf32>
    %316 = math.rsqrt %315 : vector<40x1xf32>
    %317 = vector.broadcast %316 : vector<40x1xf32> to vector<40x32xf32>
    %318 = arith.mulf %308, %317 : vector<40x32xf32>
    %319 = vector.broadcast %198 : vector<1x32xf32> to vector<40x32xf32>
    %320 = arith.mulf %318, %319 : vector<40x32xf32>
    %321 = vector.broadcast %199 : vector<1x32xf32> to vector<40x32xf32>
    %322 = arith.addf %320, %321 : vector<40x32xf32>
    %c1_101 = arith.constant 1 : index
    %c1_102 = arith.constant 1 : index
    %c0_103 = arith.constant 0 : index
    %c0_104 = arith.constant 0 : index
    %323 = vector.load %arg5[%c1_101, %c1_102, %c0_103, %c0_104] : memref<2x2x32x96xf32, #tpu.memory_space<vmem>>, vector<1x1x32x96xf32>
    %324 = vector.shape_cast %323 : vector<1x1x32x96xf32> to vector<32x96xf32>
    %cst_105 = arith.constant dense<0.000000e+00> : vector<40x96xf32>
    %325 = tpu.matmul %322, %324, %cst_105 {dimension_numbers = #tpu.dot_dimension_numbers<[1], [0], [0], [1], [0, 0, 1, 1], [], []>} : vector<40x32xf32>, vector<32x96xf32>, vector<40x96xf32> -> vector<40x96xf32>
    %326 = vector.broadcast %202 : vector<1x96xf32> to vector<40x96xf32>
    %327 = arith.addf %325, %326 : vector<40x96xf32>
    %328 = arith.mulf %327, %327 : vector<40x96xf32>
    %329 = arith.mulf %327, %328 : vector<40x96xf32>
    %cst_106 = arith.constant 4.471500e-02 : f32
    %330 = vector.broadcast %cst_106 : f32 to vector<40x96xf32>
    %331 = arith.mulf %330, %329 : vector<40x96xf32>
    %332 = arith.addf %327, %331 : vector<40x96xf32>
    %cst_107 = arith.constant 0.797884583 : f32
    %333 = vector.broadcast %cst_107 : f32 to vector<40x96xf32>
    %334 = arith.mulf %333, %332 : vector<40x96xf32>
    %335 = math.tanh %334 : vector<40x96xf32>
    %cst_108 = arith.constant 1.000000e+00 : f32
    %336 = vector.broadcast %cst_108 : f32 to vector<40x96xf32>
    %337 = arith.addf %336, %335 : vector<40x96xf32>
    %cst_109 = arith.constant 5.000000e-01 : f32
    %338 = vector.broadcast %cst_109 : f32 to vector<40x96xf32>
    %339 = arith.mulf %338, %337 : vector<40x96xf32>
    %340 = arith.mulf %327, %339 : vector<40x96xf32>
    %341 = vector.extract_strided_slice %204 {offsets = [32, 0], sizes = [96, 32], strides = [1, 1]} : vector<128x32xf32> to vector<96x32xf32>
    %cst_110 = arith.constant dense<0.000000e+00> : vector<40x32xf32>
    %342 = tpu.matmul %340, %341, %cst_110 {dimension_numbers = #tpu.dot_dimension_numbers<[1], [0], [0], [1], [0, 0, 1, 1], [], []>} : vector<40x96xf32>, vector<96x32xf32>, vector<40x32xf32> -> vector<40x32xf32>
    %343 = arith.addf %302, %342 : vector<40x32xf32>
    %344 = vector.broadcast %201 : vector<1x32xf32> to vector<40x32xf32>
    %345 = arith.addf %343, %344 : vector<40x32xf32>
    %c0_111 = arith.constant 0 : index
    %c0_112 = arith.constant 0 : index
    %346 = vector.load %arg9[%c0_111, %c0_112] : memref<8x128xf32, #tpu.memory_space<vmem>>, vector<8x128xf32>
    %347 = vector.extract_strided_slice %345 {offsets = [0, 0], sizes = [4, 32], strides = [1, 1]} : vector<40x32xf32> to vector<4x32xf32>
    %348 = vector.extract_strided_slice %346 {offsets = [0, 0], sizes = [1, 32], strides = [1, 1]} : vector<8x128xf32> to vector<1x32xf32>
    %349 = vector.extract_strided_slice %346 {offsets = [1, 0], sizes = [1, 32], strides = [1, 1]} : vector<8x128xf32> to vector<1x32xf32>
    %cst_113 = arith.constant dense<0.000000e+00> : vector<4xf32>
    %350 = vector.multi_reduction <add>, %347, %cst_113 [1] : vector<4x32xf32> to vector<4xf32>
    %351 = vector.shape_cast %350 : vector<4xf32> to vector<4x1xf32>
    %cst_114 = arith.constant 3.200000e+01 : f32
    %352 = vector.broadcast %cst_114 : f32 to vector<4x1xf32>
    %353 = arith.divf %351, %352 : vector<4x1xf32>
    %354 = vector.broadcast %353 : vector<4x1xf32> to vector<4x32xf32>
    %355 = arith.subf %347, %354 : vector<4x32xf32>
    %356 = arith.mulf %355, %355 : vector<4x32xf32>
    %cst_115 = arith.constant dense<0.000000e+00> : vector<4xf32>
    %357 = vector.multi_reduction <add>, %356, %cst_115 [1] : vector<4x32xf32> to vector<4xf32>
    %358 = vector.shape_cast %357 : vector<4xf32> to vector<4x1xf32>
    %cst_116 = arith.constant 3.200000e+01 : f32
    %359 = vector.broadcast %cst_116 : f32 to vector<4x1xf32>
    %360 = arith.divf %358, %359 : vector<4x1xf32>
    %cst_117 = arith.constant 9.99999974E-6 : f32
    %361 = vector.broadcast %cst_117 : f32 to vector<4x1xf32>
    %362 = arith.addf %360, %361 : vector<4x1xf32>
    %363 = math.rsqrt %362 : vector<4x1xf32>
    %364 = vector.broadcast %363 : vector<4x1xf32> to vector<4x32xf32>
    %365 = arith.mulf %355, %364 : vector<4x32xf32>
    %366 = vector.broadcast %348 : vector<1x32xf32> to vector<4x32xf32>
    %367 = arith.mulf %365, %366 : vector<4x32xf32>
    %368 = vector.broadcast %349 : vector<1x32xf32> to vector<4x32xf32>
    %369 = arith.addf %367, %368 : vector<4x32xf32>
    %c0_118 = arith.constant 0 : index
    %c0_119 = arith.constant 0 : index
    %370 = vector.load %arg8[%c0_118, %c0_119] : memref<32x72xf32, #tpu.memory_space<vmem>>, vector<32x72xf32>
    %cst_120 = arith.constant dense<0.000000e+00> : vector<4x72xf32>
    %371 = tpu.matmul %369, %370, %cst_120 {dimension_numbers = #tpu.dot_dimension_numbers<[1], [0], [0], [1], [0, 0, 1, 1], [], []>} : vector<4x32xf32>, vector<32x72xf32>, vector<4x72xf32> -> vector<4x72xf32>
    %372 = vector.extract_strided_slice %346 {offsets = [2, 0], sizes = [1, 72], strides = [1, 1]} : vector<8x128xf32> to vector<1x72xf32>
    %373 = vector.broadcast %372 : vector<1x72xf32> to vector<4x72xf32>
    %374 = arith.addf %371, %373 : vector<4x72xf32>
    %375 = vector.extract_strided_slice %346 {offsets = [3, 0], sizes = [1, 72], strides = [1, 1]} : vector<8x128xf32> to vector<1x72xf32>
    %376 = vector.extract_strided_slice %346 {offsets = [4, 0], sizes = [1, 72], strides = [1, 1]} : vector<8x128xf32> to vector<1x72xf32>
    %cst_121 = arith.constant dense<0.000000e+00> : vector<4xf32>
    %377 = vector.multi_reduction <add>, %374, %cst_121 [1] : vector<4x72xf32> to vector<4xf32>
    %378 = vector.shape_cast %377 : vector<4xf32> to vector<4x1xf32>
    %cst_122 = arith.constant 7.200000e+01 : f32
    %379 = vector.broadcast %cst_122 : f32 to vector<4x1xf32>
    %380 = arith.divf %378, %379 : vector<4x1xf32>
    %381 = vector.broadcast %380 : vector<4x1xf32> to vector<4x72xf32>
    %382 = arith.subf %374, %381 : vector<4x72xf32>
    %383 = arith.mulf %382, %382 : vector<4x72xf32>
    %cst_123 = arith.constant dense<0.000000e+00> : vector<4xf32>
    %384 = vector.multi_reduction <add>, %383, %cst_123 [1] : vector<4x72xf32> to vector<4xf32>
    %385 = vector.shape_cast %384 : vector<4xf32> to vector<4x1xf32>
    %cst_124 = arith.constant 7.200000e+01 : f32
    %386 = vector.broadcast %cst_124 : f32 to vector<4x1xf32>
    %387 = arith.divf %385, %386 : vector<4x1xf32>
    %cst_125 = arith.constant 9.99999974E-6 : f32
    %388 = vector.broadcast %cst_125 : f32 to vector<4x1xf32>
    %389 = arith.addf %387, %388 : vector<4x1xf32>
    %390 = math.rsqrt %389 : vector<4x1xf32>
    %391 = vector.broadcast %390 : vector<4x1xf32> to vector<4x72xf32>
    %392 = arith.mulf %382, %391 : vector<4x72xf32>
    %393 = vector.broadcast %375 : vector<1x72xf32> to vector<4x72xf32>
    %394 = arith.mulf %392, %393 : vector<4x72xf32>
    %395 = vector.broadcast %376 : vector<1x72xf32> to vector<4x72xf32>
    %396 = arith.addf %394, %395 : vector<4x72xf32>
    %c0_126 = arith.constant 0 : index
    %c0_127 = arith.constant 0 : index
    %397 = vector.load %arg10[%c0_126, %c0_127] : memref<80x640xf32, #tpu.memory_space<vmem>>, vector<72x640xf32>
    %cst_128 = arith.constant dense<0.000000e+00> : vector<4x640xf32>
    %398 = tpu.matmul %396, %397, %cst_128 {dimension_numbers = #tpu.dot_dimension_numbers<[1], [0], [0], [1], [0, 0, 1, 1], [], []>} : vector<4x72xf32>, vector<72x640xf32>, vector<4x640xf32> -> vector<4x640xf32>
    %c72 = arith.constant 72 : index
    %c0_129 = arith.constant 0 : index
    %399 = vector.load %arg10[%c72, %c0_129] : memref<80x640xf32, #tpu.memory_space<vmem>>, vector<1x640xf32>
    %400 = vector.broadcast %399 : vector<1x640xf32> to vector<4x640xf32>
    %401 = arith.addf %398, %400 : vector<4x640xf32>
    %c0_130 = arith.constant 0 : index
    %c0_131 = arith.constant 0 : index
    %c0_132 = arith.constant 0 : index
    %402 = vector.load %arg11[%c0_130, %c0_131, %c0_132] : memref<1x4x640xf32, #tpu.memory_space<vmem>>, vector<1x4x640xf32>
    %403 = vector.shape_cast %402 : vector<1x4x640xf32> to vector<4x640xf32>
    %404 = vector.shape_cast %401 : vector<4x640xf32> to vector<1x4x640xf32>
    tpu.vector_store %arg11[%c0_130, %c0_131, %c0_132], %404 {strides = array<i32>} : memref<1x4x640xf32, #tpu.memory_space<vmem>>, vector<1x4x640xf32>,
    return
  }
  func.func @transform_0(%arg0: i32) -> (i32, i32) {
    %c0_i32 = arith.constant 0 : i32
    %c0_i32_0 = arith.constant 0 : i32
    return %arg0, %c0_i32 : i32, i32
  }
  func.func @transform_1(%arg0: i32) -> (i32, i32) {
    %c0_i32 = arith.constant 0 : i32
    %c0_i32_0 = arith.constant 0 : i32
    %c0_i32_1 = arith.constant 0 : i32
    return %c0_i32, %c0_i32_0 : i32, i32
  }
  func.func @transform_2(%arg0: i32) -> (i32, i32) {
    %c0_i32 = arith.constant 0 : i32
    %c0_i32_0 = arith.constant 0 : i32
    %c0_i32_1 = arith.constant 0 : i32
    return %c0_i32, %c0_i32_0 : i32, i32
  }
  func.func @transform_3(%arg0: i32) -> (i32, i32) {
    %c0_i32 = arith.constant 0 : i32
    %c0_i32_0 = arith.constant 0 : i32
    %c0_i32_1 = arith.constant 0 : i32
    return %c0_i32, %c0_i32_0 : i32, i32
  }
  func.func @transform_4(%arg0: i32) -> (i32, i32, i32, i32) {
    %c0_i32 = arith.constant 0 : i32
    %c0_i32_0 = arith.constant 0 : i32
    %c0_i32_1 = arith.constant 0 : i32
    %c0_i32_2 = arith.constant 0 : i32
    %c0_i32_3 = arith.constant 0 : i32
    return %c0_i32, %c0_i32_0, %c0_i32_1, %c0_i32_2 : i32, i32, i32, i32
  }
  func.func @transform_5(%arg0: i32) -> (i32, i32, i32) {
    %c0_i32 = arith.constant 0 : i32
    %c0_i32_0 = arith.constant 0 : i32
    %c0_i32_1 = arith.constant 0 : i32
    %c0_i32_2 = arith.constant 0 : i32
    return %c0_i32, %c0_i32_0, %c0_i32_1 : i32, i32, i32
  }
  func.func @transform_6(%arg0: i32) -> (i32, i32, i32) {
    %c0_i32 = arith.constant 0 : i32
    %c0_i32_0 = arith.constant 0 : i32
    %c0_i32_1 = arith.constant 0 : i32
    %c0_i32_2 = arith.constant 0 : i32
    return %c0_i32, %c0_i32_0, %c0_i32_1 : i32, i32, i32
  }
  func.func @transform_7(%arg0: i32) -> (i32, i32) {
    %c0_i32 = arith.constant 0 : i32
    %c0_i32_0 = arith.constant 0 : i32
    %c0_i32_1 = arith.constant 0 : i32
    return %c0_i32, %c0_i32_0 : i32, i32
  }
  func.func @transform_8(%arg0: i32) -> (i32, i32) {
    %c0_i32 = arith.constant 0 : i32
    %c0_i32_0 = arith.constant 0 : i32
    %c0_i32_1 = arith.constant 0 : i32
    return %c0_i32, %c0_i32_0 : i32, i32
  }
  func.func @transform_9(%arg0: i32) -> (i32, i32) {
    %c0_i32 = arith.constant 0 : i32
    %c0_i32_0 = arith.constant 0 : i32
    %c0_i32_1 = arith.constant 0 : i32
    return %c0_i32, %c0_i32_0 : i32, i32
  }
  func.func @transform_10(%arg0: i32) -> (i32, i32, i32) {
    %c0_i32 = arith.constant 0 : i32
    %c0_i32_0 = arith.constant 0 : i32
    %c0_i32_1 = arith.constant 0 : i32
    return %arg0, %c0_i32, %c0_i32_0 : i32, i32, i32
  }
}

</mosaic_0001>

<bundles_post_ra>
// kernel: _forward_core.1
= control target key start
LH: loop header
LB: loop body
LE: loop exit
PB: predicated region body
PF: predicated region fallthrough
CT: control target
= control target key end

     0   :  { %s4606_s13 = smov 0   ;;  %s6720_s0 = inlined_call_operand.vmem [shape: f32[80,768], index: 0, kind: input, shape index: {}]   ;;  %s6721_s1 = inlined_call_operand.vmem [shape: f32[768,128], index: 1, kind: input, shape index: {}]   ;;  %s6722_s2 = inlined_call_operand.vmem [shape: f32[128,32], index: 2, kind: input, shape index: {}]   ;;  %s6723_s3 = inlined_call_operand.vmem [shape: f32[48,128], index: 3, kind: input, shape index: {}]   ;;  %s6724_s4 = inlined_call_operand.vmem [shape: f32[2,2,32,96], index: 4, kind: input, shape index: {}]   ;;  %s6725_s5 = inlined_call_operand.vmem [shape: f32[2,128,32], index: 5, kind: input, shape index: {}]   ;;  %s6726_s6 = inlined_call_operand.vmem [shape: f32[2,8,128], index: 6, kind: input, shape index: {}]   ;;  %s6727_s7 = inlined_call_operand.vmem [shape: f32[32,72], index: 7, kind: input, shape index: {}]   ;;  %s6728_s8 = inlined_call_operand.vmem [shape: f32[8,128], index: 8, kind: input, shape index: {}]   ;;  %s6729_s9 = inlined_call_operand.vmem [shape: f32[80,640], index: 9, kind: input, shape index: {}]   ;;  %s6730_s10 = inlined_call_operand.vmem [shape: f32[2,4,640], index: 10, kind: output, shape index: {}]  }
   0x1 LB: > { %s4612_s14 = sadd.s32 4294967295, %s4544_s13   ;;  %p4067_p0 = scmp.ge.s32.totalorder %s4544_s13, 1  ;;  %s4544_s13 = sphi %s4606_s13, %s20_s13  }
   0x2   : > { %p314_p1 = scmp.lt.s32.totalorder %s4544_s13, 3 }
   0x4   : > { %p315_p2 = pnand %p4067_p0, %p314_p1 }
   0x5   : > { %s353_s11 = smul.u32 (!%p315_p2), 5, %s4612_s14  ;;  %s4547_s21 = smov (!%p315_p2), 96  }
   0x6   : > { %318 = sbr.rel (%p315_p2) target bundleno = 4976 (0x1370), region = 60  ;;  %s4548_s22 = smov (!%p315_p2), 64  }
   0x7   : > { %p4721_p3 = scmp.lt.s32.totalorder (!%p315_p2), %s353_s11, 9  ;;  %p360_p4 = scmp.lt.s32.totalorder (!%p315_p2), %s4612_s14, 1 }
   0xb   : > { %v416_v0 = vld [vmem:[%s6721_s1 + $0x78] sm:$0xff]  ;;  %v415_v2 = vld [vmem:[%s6721_s1 + $0x70] sm:$0xff]  ;;  %v414_v6 = vld [vmem:[%s6721_s1 + $0x68] sm:$0xff]  ;;  %s6755_s11 = smov (!%p4721_p3, %s353_s11), 9  ;;  %vm782_vm0 = vcmask 261120   ;;  %s6757_s14 = smov (!%p360_p4, %s4612_s14), 1 }
   0xc   : > { %v448_v1 = vld [vmem:[%s6721_s1 + $0x178] sm:$0xff]  ;;  %498 = vmatpush.msra.mxu0 %v416_v0  ;;  %v447_v4 = vld [vmem:[%s6721_s1 + $0x170] sm:$0xff]  ;;  %v446_v8 = vld [vmem:[%s6721_s1 + $0x168] sm:$0xff]  ;;  %s4273_s29 = smul.u32 48, %s6755_s11 }
   0xd   : > { %562 = vmatpush.msra.mxu2 %v448_v1  ;;  %v432_v3 = vld [vmem:[%s6721_s1 + $0xf8] sm:$0xff]  ;;  %v431_v7 = vld [vmem:[%s6721_s1 + $0xf0] sm:$0xff]  ;;  %v430_v10 = vld [vmem:[%s6721_s1 + $0xe8] sm:$0xff]  ;;  %s4274_s27 = smul.u32 20, %s6757_s14 }
   0xe   : > { %v464_v5 = vld [vmem:[%s6721_s1 + $0x1f8] sm:$0xff]  ;;  %530 = vmatpush.msra.mxu1 %v432_v3  ;;  %499 = vmatpush.msra.mxu0 %v415_v2  ;;  %v463_v9 = vld [vmem:[%s6721_s1 + $0x1f0] sm:$0xff]  ;;  %v413_v11 = vld [vmem:[%s6721_s1 + $0x60] sm:$0xff]  ;;  %s4807_s15 = scalar_lea.vmem %s6720_s0, %s4273_s29 }
   0xf   : > { %594 = vmatpush.msra.mxu3 %v464_v5  ;;  %563 = vmatpush.msra.mxu2 %v447_v4  ;;  %v445_v12 = vld [vmem:[%s6721_s1 + $0x160] sm:$0xff]  ;;  %v462_v13 = vld [vmem:[%s6721_s1 + $0x1e8] sm:$0xff]  ;;  %v412_v16 = vld [vmem:[%s6721_s1 + $0x58] sm:$0xff]  ;;  %s364_s12 = scalar_lea.vmem %s6730_s10, %s4274_s27 }
  0x10   : > { %531 = vmatpush.msra.mxu1 %v431_v7  ;;  %500 = vmatpush.msra.mxu0 %v414_v6  ;;  %v429_v14 = vld [vmem:[%s6721_s1 + $0xe0] sm:$0xff]  ;;  %v444_v17 = vld [vmem:[%s6721_s1 + $0x158] sm:$0xff]  ;;  %v411_v20 = vld [vmem:[%s6721_s1 + $0x50] sm:$0xff] }
  0x11   : > { %595 = vmatpush.msra.mxu3 %v463_v9  ;;  %564 = vmatpush.msra.mxu2 %v446_v8  ;;  %v461_v15 = vld [vmem:[%s6721_s1 + $0x1e0] sm:$0xff]  ;;  %v428_v18 = vld [vmem:[%s6721_s1 + $0xd8] sm:$0xff]  ;;  %v443_v21 = vld [vmem:[%s6721_s1 + $0x150] sm:$0xff] }
  0x12   : > { %532 = vmatpush.msra.mxu1 %v430_v10  ;;  %501 = vmatpush.msra.mxu0 %v413_v11  ;;  %v460_v19 = vld [vmem:[%s6721_s1 + $0x1d8] sm:$0xff]  ;;  %v427_v22 = vld [vmem:[%s6721_s1 + $0xd0] sm:$0xff]  ;;  %v410_v24 = vld [vmem:[%s6721_s1 + $0x48] sm:$0xff] }
  0x13   : > { %596 = vmatpush.msra.mxu3 %v462_v13  ;;  %565 = vmatpush.msra.mxu2 %v445_v12  ;;  %v459_v23 = vld [vmem:[%s6721_s1 + $0x1d0] sm:$0xff]  ;;  %v442_v25 = vld [vmem:[%s6721_s1 + $0x148] sm:$0xff]  ;;  %v409_v28 = vld [vmem:[%s6721_s1 + $0x40] sm:$0xff] }
  0x14   : > { %533 = vmatpush.msra.mxu1 %v429_v14  ;;  %502 = vmatpush.msra.mxu0 %v412_v16  ;;  %v426_v26 = vld [vmem:[%s6721_s1 + $0xc8] sm:$0xff]  ;;  %v441_v29 = vld [vmem:[%s6721_s1 + $0x140] sm:$0xff]  ;;  %v408_v32 = vld [vmem:[%s6721_s1 + $0x38] sm:$0xff] }
  0x15   : > { %597 = vmatpush.msra.mxu3 %v461_v15  ;;  %566 = vmatpush.msra.mxu2 %v444_v17  ;;  %v458_v27 = vld [vmem:[%s6721_s1 + $0x1c8] sm:$0xff]  ;;  %v425_v30 = vld [vmem:[%s6721_s1 + $0xc0] sm:$0xff]  ;;  %v440_v33 = vld [vmem:[%s6721_s1 + $0x138] sm:$0xff] }
  0x16   : > { %534 = vmatpush.msra.mxu1 %v428_v18  ;;  %503 = vmatpush.msra.mxu0 %v411_v20  ;;  %v457_v31 = vld [vmem:[%s6721_s1 + $0x1c0] sm:$0xff]  ;;  %v424_v34 = vld [vmem:[%s6721_s1 + $0xb8] sm:$0xff]  ;;  %v407_v36 = vld [vmem:[%s6721_s1 + $0x30] sm:$0xff] }
  0x17   : > { %598 = vmatpush.msra.mxu3 %v460_v19  ;;  %567 = vmatpush.msra.mxu2 %v443_v21  ;;  %v456_v35 = vld [vmem:[%s6721_s1 + $0x1b8] sm:$0xff]  ;;  %v439_v37 = vld [vmem:[%s6721_s1 + $0x130] sm:$0xff]  ;;  %v406_v40 = vld [vmem:[%s6721_s1 + $0x28] sm:$0xff] }
  0x18   : > { %535 = vmatpush.msra.mxu1 %v427_v22  ;;  %504 = vmatpush.msra.mxu0 %v410_v24  ;;  %v423_v38 = vld [vmem:[%s6721_s1 + $0xb0] sm:$0xff]  ;;  %v438_v41 = vld [vmem:[%s6721_s1 + $0x128] sm:$0xff]  ;;  %v405_v44 = vld [vmem:[%s6721_s1 + $0x20] sm:$0xff] }
  0x19   : > { %599 = vmatpush.msra.mxu3 %v459_v23  ;;  %568 = vmatpush.msra.mxu2 %v442_v25  ;;  %v455_v39 = vld [vmem:[%s6721_s1 + $0x1b0] sm:$0xff]  ;;  %v422_v42 = vld [vmem:[%s6721_s1 + $0xa8] sm:$0xff]  ;;  %v437_v45 = vld [vmem:[%s6721_s1 + $0x120] sm:$0xff] }
  0x1a   : > { %536 = vmatpush.msra.mxu1 %v426_v26  ;;  %505 = vmatpush.msra.mxu0 %v409_v28  ;;  %v454_v43 = vld [vmem:[%s6721_s1 + $0x1a8] sm:$0xff]  ;;  %v421_v46 = vld [vmem:[%s6721_s1 + $0xa0] sm:$0xff]  ;;  %v404_v48 = vld [vmem:[%s6721_s1 + $0x18] sm:$0xff] }
  0x1b   : > { %600 = vmatpush.msra.mxu3 %v458_v27  ;;  %569 = vmatpush.msra.mxu2 %v441_v29  ;;  %v453_v47 = vld [vmem:[%s6721_s1 + $0x1a0] sm:$0xff]  ;;  %v436_v49 = vld [vmem:[%s6721_s1 + $0x118] sm:$0xff]  ;;  %v403_v52 = vld [vmem:[%s6721_s1 + $0x10] sm:$0xff] }
  0x1c   : > { %537 = vmatpush.msra.mxu1 %v425_v30  ;;  %506 = vmatpush.msra.mxu0 %v408_v32  ;;  %v420_v50 = vld [vmem:[%s6721_s1 + $0x98] sm:$0xff]  ;;  %v435_v53 = vld [vmem:[%s6721_s1 + $0x110] sm:$0xff]  ;;  %v402_v56 = vld [vmem:[%s6721_s1 + $0x8] sm:$0xff] }
  0x1d   : > { %601 = vmatpush.msra.mxu3 %v457_v31  ;;  %570 = vmatpush.msra.mxu2 %v440_v33  ;;  %v452_v51 = vld [vmem:[%s6721_s1 + $0x198] sm:$0xff]  ;;  %v419_v54 = vld [vmem:[%s6721_s1 + $0x90] sm:$0xff]  ;;  %v434_v57 = vld [vmem:[%s6721_s1 + $0x108] sm:$0xff] }
  0x1e   : > { %538 = vmatpush.msra.mxu1 %v424_v34  ;;  %507 = vmatpush.msra.mxu0 %v407_v36  ;;  %v451_v55 = vld [vmem:[%s6721_s1 + $0x190] sm:$0xff]  ;;  %v418_v58 = vld [vmem:[%s6721_s1 + $0x88] sm:$0xff]  ;;  %v401_v60 = vld [vmem:[%s6721_s1] sm:$0xff] }
  0x1f   : > { %602 = vmatpush.msra.mxu3 %v456_v35  ;;  %571 = vmatpush.msra.mxu2 %v439_v37  ;;  %v450_v59 = vld [vmem:[%s6721_s1 + $0x188] sm:$0xff]  ;;  %v433_v61 = vld [vmem:[%s6721_s1 + $0x100] sm:$0xff]  ;;  %v373_v63 = vld [vmem:[%s4807_s15 + $0x10] sm:$0xff] }
  0x20   : > { %539 = vmatpush.msra.mxu1 %v423_v38  ;;  %508 = vmatpush.msra.mxu0 %v406_v40  ;;  %v371_v62 = vld [vmem:[%s4807_s15] sm:$0xff]  ;;  %v372_v2 = vld [vmem:[%s4807_s15 + $0x8] sm:$0xff]  ;;  %v374_v3 = vld [vmem:[%s4807_s15 + $0x18] sm:$0xff] }
  0x21   : > { %603 = vmatpush.msra.mxu3 %v455_v39  ;;  %572 = vmatpush.msra.mxu2 %v438_v41  ;;  %v417_v0 = vld [vmem:[%s6721_s1 + $0x80] sm:$0xff]  ;;  %v480_v4 = vld [vmem:[%s6721_s1 + $0x278] sm:$0xff]  ;;  %v479_v6 = vld [vmem:[%s6721_s1 + $0x270] sm:$0xff] }
  0x22   : > { %540 = vmatpush.msra.mxu1 %v422_v42  ;;  %509 = vmatpush.msra.mxu0 %v405_v44  ;;  %v449_v1 = vld [vmem:[%s6721_s1 + $0x180] sm:$0xff]  ;;  %v496_v5 = vld [vmem:[%s6721_s1 + $0x2f8] sm:$0xff]  ;;  %v495_v7 = vld [vmem:[%s6721_s1 + $0x2f0] sm:$0xff] }
  0x23   : > { %604 = vmatpush.msra.mxu3 %v454_v43  ;;  %573 = vmatpush.msra.mxu2 %v437_v45  ;;  %v478_v8 = vld [vmem:[%s6721_s1 + $0x268] sm:$0xff]  ;;  %v377_v10 = vld [vmem:[%s4807_s15 + $0x30] sm:$0xff]  ;;  %v379_v11 = vld [vmem:[%s4807_s15 + $0x40] sm:$0xff] }
  0x24   : > { %541 = vmatpush.msra.mxu1 %v421_v46  ;;  %510 = vmatpush.msra.mxu0 %v404_v48  ;;  %v494_v9 = vld [vmem:[%s6721_s1 + $0x2e8] sm:$0xff]  ;;  %v477_v12 = vld [vmem:[%s6721_s1 + $0x260] sm:$0xff]  ;;  %v378_v14 = vld [vmem:[%s4807_s15 + $0x38] sm:$0xff] }
  0x25   : > { %605 = vmatpush.msra.mxu3 %v453_v47  ;;  %574 = vmatpush.msra.mxu2 %v436_v49  ;;  %v493_v13 = vld [vmem:[%s6721_s1 + $0x2e0] sm:$0xff]  ;;  %v380_v15 = vld [vmem:[%s4807_s15 + $0x48] sm:$0xff]  ;;  %v476_v16 = vld [vmem:[%s6721_s1 + $0x258] sm:$0xff] }
  0x26   : > { %542 = vmatpush.msra.mxu1 %v420_v50  ;;  %511 = vmatpush.msra.mxu0 %v403_v52  ;;  %v492_v17 = vld [vmem:[%s6721_s1 + $0x2d8] sm:$0xff]  ;;  %v475_v18 = vld [vmem:[%s6721_s1 + $0x250] sm:$0xff]  ;;  %v474_v20 = vld [vmem:[%s6721_s1 + $0x248] sm:$0xff] }
  0x27   : > { %606 = vmatpush.msra.mxu3 %v452_v51  ;;  %575 = vmatpush.msra.mxu2 %v435_v53  ;;  %v491_v19 = vld [vmem:[%s6721_s1 + $0x2d0] sm:$0xff]  ;;  %v490_v21 = vld [vmem:[%s6721_s1 + $0x2c8] sm:$0xff]  ;;  %v383_v22 = vld [vmem:[%s4807_s15 + $0x60] sm:$0xff] }
  0x28   : > { %543 = vmatpush.msra.mxu1 %v419_v54  ;;  %512 = vmatpush.msra.mxu0 %v402_v56  ;;  %v385_v23 = vld [vmem:[%s4807_s15 + $0x70] sm:$0xff]  ;;  %v473_v24 = vld [vmem:[%s6721_s1 + $0x240] sm:$0xff]  ;;  %v384_v26 = vld [vmem:[%s4807_s15 + $0x68] sm:$0xff] }
  0x29   : > { %607 = vmatpush.msra.mxu3 %v451_v55  ;;  %576 = vmatpush.msra.mxu2 %v434_v57  ;;  %v489_v25 = vld [vmem:[%s6721_s1 + $0x2c0] sm:$0xff]  ;;  %v386_v27 = vld [vmem:[%s4807_s15 + $0x78] sm:$0xff]  ;;  %v471_v30 = vld [vmem:[%s6721_s1 + $0x230] sm:$0xff] }
  0x2a   : > { %544 = vmatpush.msra.mxu1 %v418_v58  ;;  %513 = vmatpush.msra.mxu0 %v401_v60  ;;  %v472_v28 = vld [vmem:[%s6721_s1 + $0x238] sm:$0xff]  ;;  %v487_v31 = vld [vmem:[%s6721_s1 + $0x2b0] sm:$0xff]  ;;  %v470_v32 = vld [vmem:[%s6721_s1 + $0x228] sm:$0xff] }
  0x2b   : > { %608 = vmatpush.msra.mxu3 %v450_v59  ;;  %577 = vmatpush.msra.mxu2 %v433_v61  ;;  %v488_v29 = vld [vmem:[%s6721_s1 + $0x2b8] sm:$0xff]  ;;  %v486_v33 = vld [vmem:[%s6721_s1 + $0x2a8] sm:$0xff]  ;;  %v389_v34 = vld [vmem:[%s4807_s15 + $0x90] sm:$0xff] }
  0x2c   : > { %514 = vmatmul.f32.vlgmr.msra.gmra.mxu0 %v371_v62  ;;  %578 = vmatmul.f32.vlgmr.msra.gmra.mxu2 %v373_v63  ;;  %v391_v35 = vld [vmem:[%s4807_s15 + $0xa0] sm:$0xff]  ;;  %v390_v38 = vld [vmem:[%s4807_s15 + $0x98] sm:$0xff]  ;;  %v392_v39 = vld [vmem:[%s4807_s15 + $0xa8] sm:$0xff] }
  0x2d   : > { %545 = vmatpush.msra.mxu1 %v417_v0  ;;  %609 = vmatpush.msra.mxu3 %v449_v1  ;;  %v469_v36 = vld [vmem:[%s6721_s1 + $0x220] sm:$0xff]  ;;  %v468_v40 = vld [vmem:[%s6721_s1 + $0x218] sm:$0xff]  ;;  %v467_v42 = vld [vmem:[%s6721_s1 + $0x210] sm:$0xff] }
  0x2e   : > { %546 = vmatmul.f32.vlgmr.msra.gmra.mxu1 %v372_v2  ;;  %610 = vmatmul.f32.vlgmr.msra.gmra.mxu3 %v374_v3  ;;  %v485_v37 = vld [vmem:[%s6721_s1 + $0x2a0] sm:$0xff]  ;;  %v484_v41 = vld [vmem:[%s6721_s1 + $0x298] sm:$0xff]  ;;  %v483_v43 = vld [vmem:[%s6721_s1 + $0x290] sm:$0xff] }
  0x2f   : > { %626 = vmatpush.msrb.mxu0 %v480_v4  ;;  %658 = vmatpush.msrb.mxu1 %v496_v5  ;;  %v466_v44 = vld [vmem:[%s6721_s1 + $0x208] sm:$0xff]  ;;  %v395_v46 = vld [vmem:[%s4807_s15 + $0xc0] sm:$0xff]  ;;  %v397_v47 = vld [vmem:[%s4807_s15 + $0xd0] sm:$0xff] }
  0x30   : > { %v482_v45 = vld [vmem:[%s6721_s1 + $0x288] sm:$0xff]  ;;  %v465_v48 = vld [vmem:[%s6721_s1 + $0x200] sm:$0xff]  ;;  %v398_v51 = vld [vmem:[%s4807_s15 + $0xd8] sm:$0xff] }
  0x31   : > { %627 = vmatpush.msrb.mxu0 %v479_v6  ;;  %659 = vmatpush.msrb.mxu1 %v495_v7  ;;  %v481_v49 = vld [vmem:[%s6721_s1 + $0x280] sm:$0xff]  ;;  %v396_v50 = vld [vmem:[%s4807_s15 + $0xc8] sm:$0xff]  ;;  %v381_v54 = vld [vmem:[%s4807_s15 + $0x50] sm:$0xff] }
  0x32   : > { %v375_v52 = vld [vmem:[%s4807_s15 + $0x20] sm:$0xff]  ;;  %v376_v53 = vld [vmem:[%s4807_s15 + $0x28] sm:$0xff]  ;;  %v382_v55 = vld [vmem:[%s4807_s15 + $0x58] sm:$0xff] }
  0x33   : > { %628 = vmatpush.msrb.mxu0 %v478_v8  ;;  %660 = vmatpush.msrb.mxu1 %v494_v9  ;;  %v387_v56 = vld [vmem:[%s4807_s15 + $0x80] sm:$0xff]  ;;  %v388_v57 = vld [vmem:[%s4807_s15 + $0x88] sm:$0xff]  ;;  %v393_v58 = vld [vmem:[%s4807_s15 + $0xb0] sm:$0xff] }
  0x34   : > { %517 = vmatmul.f32.gmra.mxu0 %v377_v10  ;;  %581 = vmatmul.f32.gmra.mxu2 %v379_v11  ;;  %v394_v59 = vld [vmem:[%s4807_s15 + $0xb8] sm:$0xff]  ;;  %v399_v60 = vld [vmem:[%s4807_s15 + $0xe0] sm:$0xff]  ;;  %v400_v61 = vld [vmem:[%s4807_s15 + $0xe8] sm:$0xff] }
  0x35   : > { %629 = vmatpush.msrb.mxu0 %v477_v12  ;;  %661 = vmatpush.msrb.mxu1 %v493_v13  ;;  %v710_v62 = vld [vmem:[%s6722_s2 + $0x78] sm:$0xff]  ;;  %v709_v63 = vld [vmem:[%s6722_s2 + $0x70] sm:$0xff]  ;;  %v708_v0 = vld [vmem:[%s6722_s2 + $0x68] sm:$0xff] }
  0x36   : > { %549 = vmatmul.f32.gmra.mxu1 %v378_v14  ;;  %613 = vmatmul.f32.gmra.mxu3 %v380_v15  ;;  %v707_v1 = vld [vmem:[%s6722_s2 + $0x60] sm:$0xff]  ;;  %v706_v2 = vld [vmem:[%s6722_s2 + $0x58] sm:$0xff]  ;;  %v705_v3 = vld [vmem:[%s6722_s2 + $0x50] sm:$0xff] }
  0x37   : > { %630 = vmatpush.msrb.mxu0 %v476_v16  ;;  %662 = vmatpush.msrb.mxu1 %v492_v17  ;;  %v704_v4 = vld [vmem:[%s6722_s2 + $0x48] sm:$0xff]  ;;  %v703_v5 = vld [vmem:[%s6722_s2 + $0x40] sm:$0xff]  ;;  %v702_v6 = vld [vmem:[%s6722_s2 + $0x38] sm:$0xff] }
  0x38   : > { %711 = vmatpush.msrb.mxu2 %v710_v62  ;;  %v701_v8 = vld [vmem:[%s6722_s2 + $0x30] sm:$0xff]  ;;  %v700_v10 = vld [vmem:[%s6722_s2 + $0x28] sm:$0xff]  ;;  %v699_v11 = vld [vmem:[%s6722_s2 + $0x20] sm:$0xff] }
  0x39   : > { %631 = vmatpush.msrb.mxu0 %v475_v18  ;;  %663 = vmatpush.msrb.mxu1 %v491_v19  ;;  %v698_v12 = vld [vmem:[%s6722_s2 + $0x18] sm:$0xff]  ;;  %v697_v14 = vld [vmem:[%s6722_s2 + $0x10] sm:$0xff]  ;;  %v696_v16 = vld [vmem:[%s6722_s2 + $0x8] sm:$0xff] }
  0x3a   : > { %712 = vmatpush.msrb.mxu2 %v709_v63  ;;  %v695_v17 = vld [vmem:[%s6722_s2] sm:$0xff] }
  0x3b   : > { %632 = vmatpush.msrb.mxu0 %v474_v20  ;;  %664 = vmatpush.msrb.mxu1 %v490_v21  ;;  %v370_v20 = vld [vmem:[%s6723_s3 + $0x28] sm:$0xff] }
  0x3c   : > { %520 = vmatmul.f32.gmra.mxu0 %v383_v22  ;;  %584 = vmatmul.f32.gmra.mxu2 %v385_v23  ;;  %v497_v23 = vperm.slane %v370_v20, 0 }
  0x3d   : > { %633 = vmatpush.msrb.mxu0 %v473_v24  ;;  %665 = vmatpush.msrb.mxu1 %v489_v25 }
  0x3e   : > { %552 = vmatmul.f32.gmra.mxu1 %v384_v26  ;;  %616 = vmatmul.f32.gmra.mxu3 %v386_v27 }
  0x3f   : > { %634 = vmatpush.msrb.mxu0 %v472_v28  ;;  %666 = vmatpush.msrb.mxu1 %v488_v29 }
  0x40   : > { %713 = vmatpush.msrb.mxu2 %v708_v0 }
  0x41   : > { %635 = vmatpush.msrb.mxu0 %v471_v30  ;;  %667 = vmatpush.msrb.mxu1 %v487_v31 }
  0x42   : > { %714 = vmatpush.msrb.mxu2 %v707_v1 }
  0x43   : > { %636 = vmatpush.msrb.mxu0 %v470_v32  ;;  %668 = vmatpush.msrb.mxu1 %v486_v33 }
  0x44   : > { %523 = vmatmul.f32.gmra.mxu0 %v389_v34  ;;  %587 = vmatmul.f32.gmra.mxu2 %v391_v35 }
  0x45   : > { %637 = vmatpush.msrb.mxu0 %v469_v36  ;;  %669 = vmatpush.msrb.mxu1 %v485_v37 }
  0x46   : > { %555 = vmatmul.f32.gmra.mxu1 %v390_v38  ;;  %619 = vmatmul.f32.gmra.mxu3 %v392_v39 }
  0x47   : > { %638 = vmatpush.msrb.mxu0 %v468_v40  ;;  %670 = vmatpush.msrb.mxu1 %v484_v41 }
  0x48   : > { %715 = vmatpush.msrb.mxu2 %v706_v2 }
  0x49   : > { %639 = vmatpush.msrb.mxu0 %v467_v42  ;;  %671 = vmatpush.msrb.mxu1 %v483_v43 }
  0x4a   : > { %716 = vmatpush.msrb.mxu2 %v705_v3 }
  0x4b   : > { %640 = vmatpush.msrb.mxu0 %v466_v44  ;;  %672 = vmatpush.msrb.mxu1 %v482_v45 }
  0x4c   : > { %526 = vmatmul.f32.gmra.mxu0 %v395_v46  ;;  %590 = vmatmul.f32.gmra.mxu2 %v397_v47 }
  0x4d   : > { %641 = vmatpush.msrb.mxu0 %v465_v48  ;;  %673 = vmatpush.msrb.mxu1 %v481_v49 }
  0x4e   : > { %558 = vmatmul.f32.gmra.mxu1 %v396_v50  ;;  %622 = vmatmul.f32.gmra.mxu3 %v398_v51 }
  0x4f   : > { %717 = vmatpush.msrb.mxu2 %v704_v4 }
  0x51   : > { %718 = vmatpush.msrb.mxu2 %v703_v5 }
  0x53   : > { %719 = vmatpush.msrb.mxu2 %v702_v6 }
  0x54   : > { %642 = vmatmul.f32.vlgmr.msrb.gmra.mxu0 %v375_v52 }
  0x55   : > { %720 = vmatpush.msrb.mxu2 %v701_v8 }
  0x56   : > { %674 = vmatmul.f32.vlgmr.msrb.gmra.mxu1 %v376_v53 }
  0x57   : > { %721 = vmatpush.msrb.mxu2 %v700_v10 }
  0x59   : > { %722 = vmatpush.msrb.mxu2 %v699_v11 }
  0x5b   : > { %723 = vmatpush.msrb.mxu2 %v698_v12 }
  0x5c   : > { %645 = vmatmul.f32.gmra.mxu0 %v381_v54 }
  0x5d   : > { %724 = vmatpush.msrb.mxu2 %v697_v14 }
  0x5e   : > { %677 = vmatmul.f32.gmra.mxu1 %v382_v55 }
  0x5f   : > { %725 = vmatpush.msrb.mxu2 %v696_v16 }
  0x61   : > { %726 = vmatpush.msrb.mxu2 %v695_v17  ;;  %v365_v17 = vld [vmem:[%s6723_s3] sm:$0xff] }
  0x64   : > { %648 = vmatmul.f32.gmra.mxu0 %v387_v56 }
  0x66   : > { %680 = vmatmul.f32.gmra.mxu1 %v388_v57 }
  0x6c   : > { %651 = vmatmul.f32.gmra.mxu0 %v393_v58 }
  0x6e   : > { %683 = vmatmul.f32.gmra.mxu1 %v394_v59 }
  0x74   : > { %654 = vmatmul.f32.gmra.mxu0 %v399_v60 }
  0x76   : > { %686 = vmatmul.f32.gmra.mxu1 %v400_v61 }
  0xa9   : > { %v515_v7 = vpop.f32.mrf.mxu0 }
  0xaa   : > { %v516_v26 = vadd.f32 %v515_v7, %v497_v23 }
  0xab   : > { %v547_v9 = vpop.f32.mrf.mxu1 }
  0xac   : > { %v548_v28 = vadd.f32 %v547_v9, %v516_v26 }
  0xaf   : > { %v579_v21 = vpop.f32.mrf.mxu2 }
  0xb0   : > { %v580_v31 = vadd.f32 %v579_v21, %v548_v28  ;;  %v366_v21 = vld [vmem:[%s6723_s3 + $0x8] sm:$0xff] }
  0xb1   : > { %v518_v13 = vpop.f32.mrf.mxu0  ;;  %v611_v25 = vpop.f32.mrf.mxu3 }
  0xb2   : > { %v519_v32 = vadd.f32 %v518_v13, %v497_v23  ;;  %v612_v34 = vadd.f32 %v611_v25, %v580_v31  ;;  %v367_v25 = vld [vmem:[%s6723_s3 + $0x10] sm:$0xff] }
  0xb3   : > { %v550_v15 = vpop.f32.mrf.mxu1 }
  0xb4   : > { %v551_v36 = vadd.f32 %v550_v15, %v519_v32 }
  0xb7   : > { %v582_v29 = vpop.f32.mrf.mxu2 }
  0xb8   : > { %v583_v39 = vadd.f32 %v582_v29, %v551_v36  ;;  %v368_v29 = vld [vmem:[%s6723_s3 + $0x18] sm:$0xff] }
  0xb9   : > { %v521_v18 = vpop.f32.mrf.mxu0  ;;  %v614_v33 = vpop.f32.mrf.mxu3 }
  0xba   : > { %v522_v42 = vadd.f32 %v521_v18, %v497_v23  ;;  %v615_v44 = vadd.f32 %v614_v33, %v583_v39  ;;  %v369_v33 = vld [vmem:[%s6723_s3 + $0x20] sm:$0xff] }
  0xbb   : > { %v553_v19 = vpop.f32.mrf.mxu1 }
  0xbc   : > { %v554_v47 = vadd.f32 %v553_v19, %v522_v42 }
  0xbf   : > { %v585_v41 = vpop.f32.mrf.mxu2 }
  0xc0   : > { %v586_v50 = vadd.f32 %v585_v41, %v554_v47 }
  0xc1   : > { %v524_v22 = vpop.f32.mrf.mxu0  ;;  %v617_v45 = vpop.f32.mrf.mxu3 }
  0xc2   : > { %v525_v52 = vadd.f32 %v524_v22, %v497_v23  ;;  %v618_v55 = vadd.f32 %v617_v45, %v586_v50 }
  0xc3   : > { %v556_v24 = vpop.f32.mrf.mxu1 }
  0xc4   : > { %v557_v57 = vadd.f32 %v556_v24, %v525_v52 }
  0xc7   : > { %v588_v54 = vpop.f32.mrf.mxu2 }
  0xc8   : > { %v589_v61 = vadd.f32 %v588_v54, %v557_v57 }
  0xc9   : > { %v527_v27 = vpop.f32.mrf.mxu0  ;;  %v620_v59 = vpop.f32.mrf.mxu3 }
  0xca   : > { %v528_v63 = vadd.f32 %v527_v27, %v497_v23  ;;  %v621_v1 = vadd.f32 %v620_v59, %v589_v61 }
  0xcb   : > { %v559_v30 = vpop.f32.mrf.mxu1 }
  0xcc   : > { %v560_v4 = vadd.f32 %v559_v30, %v528_v63 }
  0xcf   : > { %v591_v2 = vpop.f32.mrf.mxu2 }
  0xd0   : > { %v592_v7 = vadd.f32 %v591_v2, %v560_v4 }
  0xd1   : > { %v643_v35 = vpop.f32.mrf.mxu0  ;;  %v623_v9 = vpop.f32.mrf.mxu3 }
  0xd2   : > { %v644_v37 = vadd.f32 %v643_v35, %v612_v34  ;;  %v624_v11 = vadd.f32 %v623_v9, %v592_v7  ;;  %v913_v7 = vld [vmem:[%s6724_s4 + $0x8] sm:$0xff] }
  0xd3   : > { %v675_v38 = vpop.f32.mrf.mxu1 }
  0xd4   : > { %v676_v40 = vadd.f32 %v675_v38, %v644_v37  ;;  %v4546_v37 = vmov 32.0  }
  0xd5   : > { %4308 = vrcp.f32 %v4546_v37 }
  0xd6   : > { %v690_v43 = vmax.f32 %v676_v40, 0.0 }
  0xd8   : > { %727 = vmatmul.f32.vlgmr.msrb.gmra.mxu2 %v690_v43 }
  0xd9   : > { %v646_v46 = vpop.f32.mrf.mxu0 }
  0xda   : > { %v647_v48 = vadd.f32 %v646_v46, %v615_v44 }
  0xdb   : > { %v678_v49 = vpop.f32.mrf.mxu1  ;;  %v4309_v38 = vpop.eup %4308 }
  0xdc   : > { %v679_v51 = vadd.f32 %v678_v49, %v647_v48  ;;  %v799_v39 = vmul.f32 32.0, %v4309_v38  ;;  %vm803_vm1 = vweird.f32 %v4309_v38 }
  0xde   : > { %v691_v53 = vmax.f32 %v679_v51, 0.0  ;;  %v800_v40 = vsub.f32 1.0, %v799_v39 }
  0xe0   : > { %730 = vmatmul.f32.gmra.mxu2 %v691_v53  ;;  %v801_v41 = vmul.f32 %v4309_v38, %v800_v40 }
  0xe1   : > { %v649_v56 = vpop.f32.mrf.mxu0 }
  0xe2   : > { %v650_v58 = vadd.f32 %v649_v56, %v618_v55  ;;  %v802_v42 = vadd.f32 %v4309_v38, %v801_v41 }
  0xe3   : > { %v681_v60 = vpop.f32.mrf.mxu1 }
  0xe4   : > { %v682_v62 = vadd.f32 %v681_v60, %v650_v58  ;;  %v5039_v43 = vsel %vm803_vm1, %v4309_v38, %v802_v42 }
  0xe6   : > { %v692_v0 = vmax.f32 %v682_v62, 0.0 }
  0xe8   : > { %733 = vmatmul.f32.gmra.mxu2 %v692_v0 }
  0xe9   : > { %v652_v3 = vpop.f32.mrf.mxu0 }
  0xea   : > { %v653_v5 = vadd.f32 %v652_v3, %v621_v1 }
  0xeb   : > { %v684_v6 = vpop.f32.mrf.mxu1 }
  0xec   : > { %v685_v8 = vadd.f32 %v684_v6, %v653_v5  ;;  %v915_v5 = vld [vmem:[%s6724_s4 + $0x18] sm:$0xff]  ;;  %v914_v6 = vld [vmem:[%s6724_s4 + $0x10] sm:$0xff] }
  0xed   : > { %943 = vmatpush.msrb.mxu3 %v915_v5 }
  0xee   : > { %v693_v10 = vmax.f32 %v685_v8, 0.0  ;;  %v912_v8 = vld [vmem:[%s6724_s4] sm:$0xff] }
  0xef   : > { %944 = vmatpush.msrb.mxu3 %v914_v6 }
  0xf0   : > { %736 = vmatmul.f32.gmra.mxu2 %v693_v10 }
  0xf1   : > { %v655_v12 = vpop.f32.mrf.mxu0  ;;  %945 = vmatpush.msrb.mxu3 %v913_v7 }
  0xf2   : > { %v656_v13 = vadd.f32 %v655_v12, %v624_v11 }
  0xf3   : > { %v687_v14 = vpop.f32.mrf.mxu1  ;;  %946 = vmatpush.msrb.mxu3 %v912_v8 }
  0xf4   : > { %v688_v15 = vadd.f32 %v687_v14, %v656_v13 }
  0xf6   : > { %v694_v16 = vmax.f32 %v688_v15, 0.0 }
  0xf8   : > { %739 = vmatmul.f32.gmra.mxu2 %v694_v16 }
 0x15b   : > { %v728_v18 = vpop.f32.mrf.mxu2 }
 0x15c   : > { %v5007_v19 = vadd.f32 %v728_v18, %v365_v17 }
 0x15e   : > { %v783_v20 = vsel %vm782_vm0, %v5007_v19, 0.0 }
 0x15f   : > { %784 = vadd.xlane.f32.xlu0 %v783_v20 }
 0x163   : > { %v731_v22 = vpop.f32.mrf.mxu2 }
 0x164   : > { %v5014_v23 = vadd.f32 %v731_v22, %v366_v21 }
 0x166   : > { %v786_v24 = vsel %vm782_vm0, %v5014_v23, 0.0 }
 0x167   : > { %787 = vadd.xlane.f32.xlu0 %v786_v24  ;;  %v765_v24 = vld [vmem:[%s6726_s6] sm:$0xff] }
 0x16b   : > { %v734_v26 = vpop.f32.mrf.mxu2 }
 0x16c   : > { %v5021_v27 = vadd.f32 %v734_v26, %v367_v25 }
 0x16e   : > { %v789_v28 = vsel %vm782_vm0, %v5021_v27, 0.0 }
 0x16f   : > { %790 = vadd.xlane.f32.xlu1 %v789_v28 }
 0x173   : > { %v737_v30 = vpop.f32.mrf.mxu2 }
 0x174   : > { %v5028_v31 = vadd.f32 %v737_v30, %v368_v29  ;;  %v5094_v30 = vperm.slane %v765_v24, 0 }
 0x176   : > { %v792_v32 = vsel %vm782_vm0, %v5028_v31, 0.0 }
 0x177   : > { %793 = vadd.xlane.f32.xlu1 %v792_v32 }
 0x17b   : > { %v740_v34 = vpop.f32.mrf.mxu2 }
 0x17c   : > { %v5035_v35 = vadd.f32 %v740_v34, %v369_v33 }
 0x17e   : > { %v795_v36 = vsel %vm782_vm0, %v5035_v35, 0.0 }
 0x17f   : > { %796 = vadd.xlane.f32.xlu2 %v795_v36  ;;  %v5097_v36 = vperm.slane %v765_v24, 1 }
 0x1d2   : > { %v785_v44 = vpop.xlane.xlu0 %784 }
 0x1d3   : > { %v805_v45 = vmul.f32 %v5039_v43, %v785_v44 }
 0x1d5   : > { %v5043_v46 = vsub.f32 %v5007_v19, %v805_v45 }
 0x1d7   : > { %v815_v47 = vmul.f32 %v5043_v46, %v5043_v46 }
 0x1d9   : > { %v820_v48 = vsel %vm782_vm0, %v815_v47, 0.0 }
 0x1da   : > { %821 = vadd.xlane.f32.xlu2 %v820_v48  ;;  %v788_v49 = vpop.xlane.xlu0 %787 }
 0x1db   : > { %v806_v50 = vmul.f32 %v5039_v43, %v788_v49 }
 0x1dd   : > { %v5050_v51 = vsub.f32 %v5014_v23, %v806_v50 }
 0x1df   : > { %v816_v52 = vmul.f32 %v5050_v51, %v5050_v51 }
 0x1e1   : > { %v823_v53 = vsel %vm782_vm0, %v816_v52, 0.0 }
 0x1e2   : > { %v791_v54 = vpop.xlane.xlu1 %790  ;;  %824 = vadd.xlane.f32.xlu0 %v823_v53 }
 0x1e3   : > { %v807_v55 = vmul.f32 %v5039_v43, %v791_v54 }
 0x1e5   : > { %v5057_v56 = vsub.f32 %v5021_v27, %v807_v55 }
 0x1e7   : > { %v817_v57 = vmul.f32 %v5057_v56, %v5057_v56 }
 0x1e9   : > { %v826_v58 = vsel %vm782_vm0, %v817_v57, 0.0 }
 0x1ea   : > { %827 = vadd.xlane.f32.xlu1 %v826_v58  ;;  %v794_v59 = vpop.xlane.xlu1 %793 }
 0x1eb   : > { %v808_v60 = vmul.f32 %v5039_v43, %v794_v59 }
 0x1ed   : > { %v5064_v61 = vsub.f32 %v5028_v31, %v808_v60 }
 0x1ef   : > { %v818_v62 = vmul.f32 %v5064_v61, %v5064_v61 }
 0x1f1   : > { %v829_v63 = vsel %vm782_vm0, %v818_v62, 0.0 }
 0x1f2   : > { %v797_v0 = vpop.xlane.xlu2 %796  ;;  %830 = vadd.xlane.f32.xlu2 %v829_v63 }
 0x1f3   : > { %v809_v1 = vmul.f32 %v5039_v43, %v797_v0 }
 0x1f5   : > { %v5071_v2 = vsub.f32 %v5035_v35, %v809_v1 }
 0x1f7   : > { %v819_v3 = vmul.f32 %v5071_v2, %v5071_v2 }
 0x1f9   : > { %v832_v4 = vsel %vm782_vm0, %v819_v3, 0.0 }
 0x1fa   : > { %833 = vadd.xlane.f32.xlu0 %v832_v4 }
 0x24d   : > { %v822_v9 = vpop.xlane.xlu2 %821 }
 0x24e   : > { %v835_v10 = vmul.f32 %v822_v9, %v5039_v43 }
 0x250   : > { %v840_v11 = vadd.f32 1e-05, %v835_v10 }
 0x252   : > { %4310 = vrsqrt.f32 %v840_v11  ;;  %vm851_vm3 = vweird.f32 %v840_v11 }
 0x255   : > { %v825_v12 = vpop.xlane.xlu0 %824 }
 0x256   : > { %v836_v13 = vmul.f32 %v825_v12, %v5039_v43 }
 0x258   : > { %v4311_v14 = vpop.eup %4310  ;;  %v841_v15 = vadd.f32 1e-05, %v836_v13 }
 0x259   : > { %v846_v16 = vmul.f32 %v4311_v14, %v840_v11  ;;  %vm852_vm2 = vweird.f32 %v4311_v14 }
 0x25a   : > { %4312 = vrsqrt.f32 %v841_v15  ;;  %vm853_vm4 = vmor %vm851_vm3, %vm852_vm2  ;;  %vm861_vm6 = vweird.f32 %v841_v15 }
 0x25b   : > { %v847_v17 = vmul.f32 %v4311_v14, %v846_v16 }
 0x25d   : > { %v848_v18 = vmul.f32 0.5, %v847_v17  ;;  %v828_v20 = vpop.xlane.xlu1 %827 }
 0x25e   : > { %v837_v21 = vmul.f32 %v828_v20, %v5039_v43 }
 0x25f   : > { %v849_v22 = vsub.f32 1.5, %v848_v18 }
 0x260   : > { %v4313_v25 = vpop.eup %4312  ;;  %v842_v26 = vadd.f32 1e-05, %v837_v21 }
 0x261   : > { %v850_v28 = vmul.f32 %v4311_v14, %v849_v22  ;;  %v856_v29 = vmul.f32 %v4313_v25, %v841_v15  ;;  %vm862_vm5 = vweird.f32 %v4313_v25 }
 0x262   : > { %4314 = vrsqrt.f32 %v842_v26  ;;  %vm863_vm7 = vmor %vm861_vm6, %vm862_vm5  ;;  %vm871_vm9 = vweird.f32 %v842_v26 }
 0x263   : > { %v854_v32 = vsel %vm853_vm4, %v4311_v14, %v850_v28  ;;  %v857_v33 = vmul.f32 %v4313_v25, %v856_v29 }
 0x264   : > { %v895_v34 = vmul.f32 %v854_v32, %v5043_v46 }
 0x265   : > { %v858_v37 = vmul.f32 0.5, %v857_v33  ;;  %v831_v38 = vpop.xlane.xlu2 %830 }
 0x266   : > { %v838_v39 = vmul.f32 %v831_v38, %v5039_v43  ;;  %v901_v40 = vmul.f32 %v5094_v30, %v895_v34 }
 0x267   : > { %v859_v41 = vsub.f32 1.5, %v858_v37 }
 0x268   : > { %v4315_v42 = vpop.eup %4314  ;;  %v843_v44 = vadd.f32 1e-05, %v838_v39  ;;  %v907_v45 = vadd.f32 %v5097_v36, %v901_v40  ;;  %v4549_v40 = vmov 0.0  }
 0x269   : > { %v860_v47 = vmul.f32 %v4313_v25, %v859_v41  ;;  %v866_v48 = vmul.f32 %v4315_v42, %v842_v26  ;;  %vm872_vm8 = vweird.f32 %v4315_v42 }
 0x26a   : > { %4316 = vrsqrt.f32 %v843_v44  ;;  %4074 = vmatmul.msk.f32.vlgmr.msrb.gmra.mxu3 %vm782_vm0, %v907_v45  ;;  %vm873_vm10 = vmor %vm871_vm9, %vm872_vm8  ;;  %vm881_vm12 = vweird.f32 %v843_v44 }
 0x26b   : > { %v864_v46 = vsel %vm863_vm7, %v4313_v25, %v860_v47  ;;  %v867_v49 = vmul.f32 %v4315_v42, %v866_v48 }
 0x26c   : > { %v896_v50 = vmul.f32 %v864_v46, %v5050_v51 }
 0x26d   : > { %v868_v52 = vmul.f32 0.5, %v867_v49  ;;  %v834_v53 = vpop.xlane.xlu0 %833 }
 0x26e   : > { %v839_v54 = vmul.f32 %v834_v53, %v5039_v43  ;;  %v902_v55 = vmul.f32 %v5094_v30, %v896_v50 }
 0x26f   : > { %v869_v57 = vsub.f32 1.5, %v868_v52 }
 0x270   : > { %v4317_v58 = vpop.eup %4316  ;;  %v844_v59 = vadd.f32 1e-05, %v839_v54  ;;  %v908_v60 = vadd.f32 %v5097_v36, %v902_v55 }
 0x271   : > { %v870_v62 = vmul.f32 %v4315_v42, %v869_v57  ;;  %v876_v63 = vmul.f32 %v4317_v58, %v843_v44  ;;  %vm882_vm11 = vweird.f32 %v4317_v58 }
 0x272   : > { %4318 = vrsqrt.f32 %v844_v59  ;;  %4075 = vmatmul.msk.f32.gmra.mxu3 %vm782_vm0, %v908_v60  ;;  %vm883_vm13 = vmor %vm881_vm12, %vm882_vm11  ;;  %vm891_vm15 = vweird.f32 %v844_v59  ;;  %vm1045_vm12 = vcmask 326656  }
 0x273   : > { %v874_v51 = vsel %vm873_vm10, %v4315_v42, %v870_v62  ;;  %v877_v0 = vmul.f32 %v4317_v58, %v876_v63 }
 0x274   : > { %v897_v1 = vmul.f32 %v874_v51, %v5057_v56 }
 0x275   : > { %v878_v3 = vmul.f32 0.5, %v877_v0 }
 0x276   : > { %v903_v4 = vmul.f32 %v5094_v30, %v897_v1 }
 0x277   : > { %v879_v5 = vsub.f32 1.5, %v878_v3 }
 0x278   : > { %v4319_v6 = vpop.eup %4318  ;;  %v909_v7 = vadd.f32 %v5097_v36, %v903_v4 }
 0x279   : > { %v880_v8 = vmul.f32 %v4317_v58, %v879_v5  ;;  %v886_v9 = vmul.f32 %v4319_v6, %v844_v59  ;;  %vm892_vm14 = vweird.f32 %v4319_v6 }
 0x27a   : > { %4076 = vmatmul.msk.f32.gmra.mxu3 %vm782_vm0, %v909_v7  ;;  %vm893_vm1 = vmor %vm891_vm15, %vm892_vm14 }
 0x27b   : > { %v884_v10 = vsel %vm883_vm13, %v4317_v58, %v880_v8  ;;  %v887_v11 = vmul.f32 %v4319_v6, %v886_v9 }
 0x27c   : > { %v898_v12 = vmul.f32 %v884_v10, %v5064_v61 }
 0x27d   : > { %v888_v13 = vmul.f32 0.5, %v887_v11 }
 0x27e   : > { %v904_v56 = vmul.f32 %v5094_v30, %v898_v12 }
 0x27f   : > { %v889_v14 = vsub.f32 1.5, %v888_v13 }
 0x280   : > { %v910_v15 = vadd.f32 %v5097_v36, %v904_v56 }
 0x281   : > { %v890_v16 = vmul.f32 %v4319_v6, %v889_v14 }
 0x282   : > { %4077 = vmatmul.msk.f32.gmra.mxu3 %vm782_vm0, %v910_v15 }
 0x283   : > { %v894_v17 = vsel %vm893_vm1, %v4319_v6, %v890_v16 }
 0x284   : > { %v899_v18 = vmul.f32 %v894_v17, %v5071_v2 }
 0x286   : > { %v905_v20 = vmul.f32 %v5094_v30, %v899_v18 }
 0x288   : > { %v911_v21 = vadd.f32 %v5097_v36, %v905_v20  ;;  %v743_v36 = vlaneseq }
 0x28a   : > { %4078 = vmatmul.msk.f32.gmra.mxu3 %vm782_vm0, %v911_v21  ;;  %v744_v37 = vand.u32 127, %v743_v36 }
 0x28c   : > { %vm750_vm2 = vcmp.ge.s32.totalorder %v744_v37, 8  ;;  %vm751_vm3 = vcmp.lt.s32.totalorder %v744_v37, 16  ;;  %vm746_vm4 = vcmp.lt.s32.totalorder %v744_v37, 8  ;;  %vm755_vm6 = vcmp.ge.s32.totalorder %v744_v37, 16 }
 0x28d   : > { %vm752_vm5 = vmand %vm750_vm2, %vm751_vm3  ;;  %v5160_v41 = vsel %vm746_vm4, 1.0, %v4549_v40  ;;  %vm756_vm7 = vcmp.lt.s32.totalorder %v744_v37, 24  ;;  %vm760_vm8 = vcmp.ge.s32.totalorder %v744_v37, 24  ;;  %vm761_vm9 = vcmp.lt.s32.totalorder %v744_v37, 32 }
 0x28e   : > { %v5162_v42 = vsel %vm752_vm5, 1.0, %v4549_v40  ;;  %vm757_vm10 = vmand %vm755_vm6, %vm756_vm7 }
 0x28f   : > { %vm762_vm11 = vmand %vm760_vm8, %vm761_vm9  ;;  %v5200_v62 = vsel %vm757_vm10, 1.0, %v4549_v40 }
 0x290   : > { %v5202_v63 = vsel %vm762_vm11, 1.0, %v4549_v40 }
 0x2ed   : > { %v5120_v61 = vpop.f32.mrf.mxu3 }
 0x2ee   : > { %v963_v39 = vmul.f32 0.35355338, %v5120_v61 }
 0x2f0   : > { %v968_v45 = vmul.f32 %v5160_v41, %v963_v39  ;;  %v1238_v47 = vmul.f32 %v5162_v42, %v963_v39  ;;  %v1467_v51 = vmul.f32 %v5200_v62, %v963_v39  ;;  %v1696_v0 = vmul.f32 %v5202_v63, %v963_v39 }
 0x2f5   : > { %v5122_v22 = vpop.f32.mrf.mxu3 }
 0x2f6   : > { %v964_v48 = vmul.f32 0.35355338, %v5122_v22 }
 0x2f8   : > { %v969_v46 = vmul.f32 %v5160_v41, %v964_v48  ;;  %v1239_v49 = vmul.f32 %v5162_v42, %v964_v48  ;;  %v1468_v1 = vmul.f32 %v5200_v62, %v964_v48  ;;  %v1697_v3 = vmul.f32 %v5202_v63, %v964_v48 }
 0x2fd   : > { %v5124_v24 = vpop.f32.mrf.mxu3 }
 0x2fe   : > { %982 = vrot.lane.b32.xlu0 %v5124_v24, %s4547_s21  ;;  %v965_v50 = vmul.f32 0.35355338, %v5124_v24 }
 0x300   : > { %v970_v52 = vmul.f32 %v5160_v41, %v965_v50  ;;  %v1240_v53 = vmul.f32 %v5162_v42, %v965_v50  ;;  %v1469_v4 = vmul.f32 %v5200_v62, %v965_v50  ;;  %v1698_v5 = vmul.f32 %v5202_v63, %v965_v50 }
 0x305   : > { %v5128_v25 = vpop.f32.mrf.mxu3 }
 0x306   : > { %984 = vrot.lane.b32.xlu2 %v5128_v25, %s4547_s21  ;;  %v966_v54 = vmul.f32 0.35355338, %v5128_v25 }
 0x308   : > { %v971_v55 = vmul.f32 %v5160_v41, %v966_v54  ;;  %v1241_v57 = vmul.f32 %v5162_v42, %v966_v54  ;;  %v1470_v6 = vmul.f32 %v5200_v62, %v966_v54  ;;  %v1699_v7 = vmul.f32 %v5202_v63, %v966_v54 }
 0x30d   : > { %v5132_v2 = vpop.f32.mrf.mxu3 }
 0x30e   : > { %980 = vrot.lane.b32.xlu2 %v5122_v22, %s4547_s21  ;;  %986 = vrot.lane.b32.xlu1 %v5132_v2, %s4547_s21  ;;  %v4288_v26 = vpack.i.bf16 %v5128_v25, %v5132_v2  ;;  %v967_v58 = vmul.f32 0.35355338, %v5132_v2 }
 0x310   : > { %v972_v59 = vmul.f32 %v5160_v41, %v967_v58  ;;  %v1242_v60 = vmul.f32 %v5162_v42, %v967_v58  ;;  %v1471_v8 = vmul.f32 %v5200_v62, %v967_v58  ;;  %v1700_v9 = vmul.f32 %v5202_v63, %v967_v58 }
 0x316   : > { %4289 = vrot.lane.b32.xlu2 %v4288_v26, %s4548_s22  ;;  %978 = vrot.lane.b32.xlu1 %v5120_v61, %s4547_s21 }
 0x360   : > { %v985_v28 = vpop.permute.xlu2 %984 }
 0x368   : > { %v981_v29 = vpop.permute.xlu2 %980 }
 0x370   : > { %v4290_v30 = vpop.permute.xlu2 %4289  ;;  %v983_v38 = vpop.permute.xlu0 %982 }
 0x371   : > { %v5143_v32 = vunpack.i.l.bf16 %v4290_v30  ;;  %v5145_v33 = vunpack.i.h.bf16 %v4290_v30 }
 0x373   : > { %1207 = vmatpush.msra.mxu1 %v5143_v32  ;;  %1436 = vmatpush.msra.mxu3 %v5143_v32 }
 0x375   : > { %1208 = vmatpush.msra.mxu1 %v5145_v33  ;;  %1437 = vmatpush.msra.mxu3 %v5145_v33 }
 0x380   : > { %v987_v34 = vpop.permute.xlu1 %986 }
 0x381   : > { %4079 = vmatpush.xpose.msk.msra.mxu0 %vm782_vm0, %v987_v34  ;;  %4094 = vmatpush.xpose.msk.msra.mxu2 %vm782_vm0, %v987_v34 }
 0x385   : > { %4080 = vmatpush.xpose.msk.msra.mxu0 %vm782_vm0, %v985_v28  ;;  %4095 = vmatpush.xpose.msk.msra.mxu2 %vm782_vm0, %v985_v28 }
 0x388   : > { %v979_v44 = vpop.permute.xlu1 %978 }
 0x389   : > { %4081 = vmatpush.xpose.msk.msra.mxu0 %vm782_vm0, %v983_v38  ;;  %4096 = vmatpush.xpose.msk.msra.mxu2 %vm782_vm0, %v983_v38 }
 0x38d   : > { %4082 = vmatpush.xpose.msk.msra.mxu0 %vm782_vm0, %v981_v29  ;;  %4097 = vmatpush.xpose.msk.msra.mxu2 %vm782_vm0, %v981_v29 }
 0x391   : > { %4083 = vmatpush.xpose.msk.msra.mxu0 %vm782_vm0, %v979_v44  ;;  %4098 = vmatpush.xpose.msk.msra.mxu2 %vm782_vm0, %v979_v44 }
 0x394   : > { %4084 = vmatmul.msk.f32.vlgmr.msra.gmra.mxu0 %vm782_vm0, %v968_v45  ;;  %4099 = vmatmul.msk.f32.vlgmr.msra.gmra.mxu2 %vm782_vm0, %v1238_v47 }
 0x395   : > { %4109 = vmatpush.xpose.msk.msrb.mxu0 %vm782_vm0, %v987_v34  ;;  %4124 = vmatpush.xpose.msk.msrb.mxu2 %vm782_vm0, %v987_v34 }
 0x399   : > { %4110 = vmatpush.xpose.msk.msrb.mxu0 %vm782_vm0, %v985_v28  ;;  %4125 = vmatpush.xpose.msk.msrb.mxu2 %vm782_vm0, %v985_v28 }
 0x39c   : > { %4085 = vmatmul.msk.f32.gmra.mxu0 %vm782_vm0, %v969_v46  ;;  %4100 = vmatmul.msk.f32.gmra.mxu2 %vm782_vm0, %v1239_v49 }
 0x39d   : > { %4111 = vmatpush.xpose.msk.msrb.mxu0 %vm782_vm0, %v983_v38  ;;  %4126 = vmatpush.xpose.msk.msrb.mxu2 %vm782_vm0, %v983_v38 }
 0x3a1   : > { %4112 = vmatpush.xpose.msk.msrb.mxu0 %vm782_vm0, %v981_v29  ;;  %4127 = vmatpush.xpose.msk.msrb.mxu2 %vm782_vm0, %v981_v29 }
 0x3a4   : > { %4086 = vmatmul.msk.f32.gmra.mxu0 %vm782_vm0, %v970_v52  ;;  %4101 = vmatmul.msk.f32.gmra.mxu2 %vm782_vm0, %v1240_v53 }
 0x3a5   : > { %4113 = vmatpush.xpose.msk.msrb.mxu0 %vm782_vm0, %v979_v44  ;;  %4128 = vmatpush.xpose.msk.msrb.mxu2 %vm782_vm0, %v979_v44 }
 0x3ac   : > { %4087 = vmatmul.msk.f32.gmra.mxu0 %vm782_vm0, %v971_v55  ;;  %4102 = vmatmul.msk.f32.gmra.mxu2 %vm782_vm0, %v1241_v57 }
 0x3b4   : > { %4088 = vmatmul.msk.f32.gmra.mxu0 %vm782_vm0, %v972_v59  ;;  %4103 = vmatmul.msk.f32.gmra.mxu2 %vm782_vm0, %v1242_v60 }
 0x3bc   : > { %4114 = vmatmul.msk.f32.vlgmr.msrb.gmra.mxu0 %vm782_vm0, %v1467_v51  ;;  %4129 = vmatmul.msk.f32.vlgmr.msrb.gmra.mxu2 %vm782_vm0, %v1696_v0 }
 0x3c4   : > { %4115 = vmatmul.msk.f32.gmra.mxu0 %vm782_vm0, %v1468_v1  ;;  %4130 = vmatmul.msk.f32.gmra.mxu2 %vm782_vm0, %v1697_v3 }
 0x3cc   : > { %4116 = vmatmul.msk.f32.gmra.mxu0 %vm782_vm0, %v1469_v4  ;;  %4131 = vmatmul.msk.f32.gmra.mxu2 %vm782_vm0, %v1698_v5 }
 0x3d4   : > { %4117 = vmatmul.msk.f32.gmra.mxu0 %vm782_vm0, %v1470_v6  ;;  %4132 = vmatmul.msk.f32.gmra.mxu2 %vm782_vm0, %v1699_v7 }
 0x3dc   : > { %4118 = vmatmul.msk.f32.gmra.mxu0 %vm782_vm0, %v1471_v8  ;;  %4133 = vmatmul.msk.f32.gmra.mxu2 %vm782_vm0, %v1700_v9 }
 0x411   : > { %v1030_v10 = vpop.f32.mrf.mxu0 }
 0x412   : > { %v1046_v11 = vsel %vm1045_vm12, %v1030_v10, -inf }
 0x413   : > { %1047 = vmax.xlane.f32.xlu2 %v1046_v11 }
 0x417   : > { %v1275_v12 = vpop.f32.mrf.mxu2 }
 0x418   : > { %v1290_v13 = vsel %vm1045_vm12, %v1275_v12, -inf }
 0x419   : > { %1291 = vmax.xlane.f32.xlu0 %v1290_v13  ;;  %v1033_v56 = vpop.f32.mrf.mxu0 }
 0x41a   : > { %v1049_v16 = vsel %vm1045_vm12, %v1033_v56, -inf }
 0x41f   : > { %v5226_v14 = vpop.f32.mrf.mxu2 }
 0x420   : > { %v1293_v15 = vsel %vm1045_vm12, %v5226_v14, -inf }
 0x421   : > { %1294 = vmax.xlane.f32.xlu1 %v1293_v15  ;;  %1050 = vmax.xlane.f32.xlu0 %v1049_v16  ;;  %v5231_v17 = vpop.f32.mrf.mxu0 }
 0x422   : > { %v1052_v21 = vsel %vm1045_vm12, %v5231_v17, -inf }
 0x427   : > { %v5233_v18 = vpop.f32.mrf.mxu2 }
 0x428   : > { %v1296_v20 = vsel %vm1045_vm12, %v5233_v18, -inf }
 0x429   : > { %1297 = vmax.xlane.f32.xlu2 %v1296_v20  ;;  %1053 = vmax.xlane.f32.xlu1 %v1052_v21  ;;  %v5239_v25 = vpop.f32.mrf.mxu0 }
 0x42a   : > { %v1055_v28 = vsel %vm1045_vm12, %v5239_v25, -inf }
 0x42f   : > { %v5241_v2 = vpop.f32.mrf.mxu2 }
 0x430   : > { %v1299_v26 = vsel %vm1045_vm12, %v5241_v2, -inf }
 0x431   : > { %1300 = vmax.xlane.f32.xlu0 %v1299_v26  ;;  %1056 = vmax.xlane.f32.xlu2 %v1055_v28  ;;  %v5247_v29 = vpop.f32.mrf.mxu0 }
 0x432   : > { %v1058_v36 = vsel %vm1045_vm12, %v5247_v29, -inf }
 0x437   : > { %v5249_v30 = vpop.f32.mrf.mxu2 }
 0x438   : > { %v1302_v34 = vsel %vm1045_vm12, %v5249_v30, -inf }
 0x439   : > { %1303 = vmax.xlane.f32.xlu1 %v1302_v34  ;;  %v5255_v37 = vpop.f32.mrf.mxu0  ;;  %1059 = vmax.xlane.f32.xlu0 %v1058_v36 }
 0x43a   : > { %v1519_v40 = vsel %vm1045_vm12, %v5255_v37, -inf }
 0x43f   : > { %v5257_v38 = vpop.f32.mrf.mxu2 }
 0x440   : > { %v1748_v39 = vsel %vm1045_vm12, %v5257_v38, -inf }
 0x441   : > { %1749 = vmax.xlane.f32.xlu2 %v1748_v39  ;;  %1520 = vmax.xlane.f32.xlu1 %v1519_v40  ;;  %v5263_v44 = vpop.f32.mrf.mxu0 }
 0x442   : > { %v1522_v47 = vsel %vm1045_vm12, %v5263_v44, -inf }
 0x447   : > { %v5265_v45 = vpop.f32.mrf.mxu2 }
 0x448   : > { %v1751_v48 = vsel %vm1045_vm12, %v5265_v45, -inf }
 0x449   : > { %1523 = vmax.xlane.f32.xlu1 %v1522_v47  ;;  %1752 = vmax.xlane.f32.xlu0 %v1751_v48  ;;  %v5271_v46 = vpop.f32.mrf.mxu0 }
 0x44a   : > { %v1525_v52 = vsel %vm1045_vm12, %v5271_v46, -inf }
 0x44f   : > { %v5273_v49 = vpop.f32.mrf.mxu2 }
 0x450   : > { %v1754_v50 = vsel %vm1045_vm12, %v5273_v49, -inf }
 0x451   : > { %1755 = vmax.xlane.f32.xlu2 %v1754_v50  ;;  %1526 = vmax.xlane.f32.xlu0 %v1525_v52  ;;  %v5289_v7 = vpop.f32.mrf.mxu0 }
 0x452   : > { %v1528_v11 = vsel %vm1045_vm12, %v5289_v7, -inf }
 0x457   : > { %v5279_v53 = vpop.f32.mrf.mxu2 }
 0x458   : > { %v1757_v54 = vsel %vm1045_vm12, %v5279_v53, -inf }
 0x459   : > { %1758 = vmax.xlane.f32.xlu0 %v1757_v54  ;;  %v5317_v54 = vpop.f32.mrf.mxu0 }
 0x486   : > { %v1048_v55 = vpop.xlane.xlu2 %1047 }
 0x487   : > { %v1061_v57 = vsub.f32 %v1030_v10, %v1048_v55 }
 0x489   : > { %v1066_v58 = vmul.f32 1.442695, %v1061_v57  ;;  %v1531_v57 = vsel %vm1045_vm12, %v5317_v54, -inf }
 0x48b   : > { %4320 = vpow2.f32 %v1066_v58 }
 0x48c   : > { %v1292_v59 = vpop.xlane.xlu0 %1291 }
 0x48d   : > { %v1305_v60 = vsub.f32 %v1275_v12, %v1292_v59 }
 0x48f   : > { %v1310_v51 = vmul.f32 1.442695, %v1305_v60 }
 0x491   : > { %v5283_v0 = vpop.eup %4320  ;;  %4322 = vpow2.f32 %v1310_v51  ;;  %v4293_v51 = vpack.i.bf16 %v5122_v22, %v5124_v24 }
 0x492   : > { %v1076_v1 = vsel %vm1045_vm12, %v5283_v0, 0.0 }
 0x493   : > { %1077 = vadd.xlane.f32.xlu0 %v1076_v1 }
 0x494   : > { %v1295_v3 = vpop.xlane.xlu1 %1294  ;;  %v1051_v4 = vpop.xlane.xlu0 %1050 }
 0x495   : > { %v1062_v5 = vsub.f32 %v1033_v56, %v1051_v4  ;;  %v1306_v9 = vsub.f32 %v5226_v14, %v1295_v3 }
 0x497   : > { %v5287_v6 = vpop.eup %4322  ;;  %v1068_v8 = vmul.f32 1.442695, %v1062_v5  ;;  %v1312_v12 = vmul.f32 1.442695, %v1306_v9 }
 0x498   : > { %v1320_v10 = vsel %vm1045_vm12, %v5287_v6, 0.0 }
 0x499   : > { %1321 = vadd.xlane.f32.xlu2 %v1320_v10  ;;  %4324 = vpow2.f32 %v1068_v8 }
 0x49a   : > { %4326 = vpow2.f32 %v1312_v12 }
 0x49b   : > { %1529 = vmax.xlane.f32.xlu0 %v1528_v11 }
 0x49c   : > { %v1054_v13 = vpop.xlane.xlu1 %1053  ;;  %v1298_v15 = vpop.xlane.xlu2 %1297 }
 0x49d   : > { %v1063_v56 = vsub.f32 %v5231_v17, %v1054_v13  ;;  %v1307_v14 = vsub.f32 %v5233_v18, %v1298_v15 }
 0x49f   : > { %v1070_v16 = vmul.f32 1.442695, %v1063_v56  ;;  %v5297_v20 = vpop.eup %4324  ;;  %v1314_v26 = vmul.f32 1.442695, %v1307_v14 }
 0x4a0   : > { %v1079_v21 = vsel %vm1045_vm12, %v5297_v20, 0.0  ;;  %v5302_v28 = vpop.eup %4326 }
 0x4a1   : > { %4328 = vpow2.f32 %v1070_v16  ;;  %1080 = vadd.xlane.f32.xlu1 %v1079_v21  ;;  %v1323_v17 = vsel %vm1045_vm12, %v5302_v28, 0.0  ;;  %v5343_v16 = vpop.f32.mrf.mxu2 }
 0x4a2   : > { %4330 = vpow2.f32 %v1314_v26  ;;  %v1760_v21 = vsel %vm1045_vm12, %v5343_v16, -inf }
 0x4a4   : > { %v1301_v18 = vpop.xlane.xlu0 %1300  ;;  %v1057_v39 = vpop.xlane.xlu2 %1056 }
 0x4a5   : > { %v1064_v47 = vsub.f32 %v5239_v25, %v1057_v39  ;;  %v1308_v26 = vsub.f32 %v5241_v2, %v1301_v18 }
 0x4a7   : > { %v5304_v34 = vpop.eup %4328  ;;  %v1072_v50 = vmul.f32 1.442695, %v1064_v47 }
 0x4a8   : > { %v1082_v36 = vsel %vm1045_vm12, %v5304_v34, 0.0  ;;  %v5310_v40 = vpop.eup %4330 }
 0x4a9   : > { %1324 = vadd.xlane.f32.xlu1 %v1323_v17  ;;  %1083 = vadd.xlane.f32.xlu0 %v1082_v36  ;;  %v1326_v48 = vsel %vm1045_vm12, %v5310_v40, 0.0  ;;  %4332 = vpow2.f32 %v1072_v50 }
 0x4ac   : > { %v1060_v52 = vpop.xlane.xlu0 %1059  ;;  %v1304_v25 = vpop.xlane.xlu1 %1303 }
 0x4ad   : > { %v1065_v55 = vsub.f32 %v5247_v29, %v1060_v52 }
 0x4af   : > { %v1074_v58 = vmul.f32 1.442695, %v1065_v55  ;;  %v5322_v59 = vpop.eup %4332 }
 0x4b0   : > { %v1085_v60 = vsel %vm1045_vm12, %v5322_v59, 0.0 }
 0x4b1   : > { %1166 = vrot.lane.b32.xlu2 %v5120_v61, %s4548_s22  ;;  %1327 = vadd.xlane.f32.xlu0 %v1326_v48  ;;  %v1309_v61 = vsub.f32 %v5249_v30, %v1304_v25  ;;  %4334 = vpow2.f32 %v1074_v58 }
 0x4b3   : > { %v1318_v29 = vmul.f32 1.442695, %v1309_v61 }
 0x4b4   : > { %v1750_v1 = vpop.xlane.xlu2 %1749  ;;  %v1521_v9 = vpop.xlane.xlu1 %1520 }
 0x4b5   : > { %4336 = vpow2.f32 %v1318_v29  ;;  %v1763_v4 = vsub.f32 %v5257_v38, %v1750_v1  ;;  %v1534_v22 = vsub.f32 %v5255_v37, %v1521_v9 }
 0x4b7   : > { %v5330_v3 = vpop.eup %4334  ;;  %v1768_v8 = vmul.f32 1.442695, %v1763_v4  ;;  %v1539_v12 = vmul.f32 1.442695, %v1534_v22 }
 0x4b8   : > { %v1088_v30 = vsel %vm1045_vm12, %v5330_v3, 0.0 }
 0x4b9   : > { %1532 = vmax.xlane.f32.xlu0 %v1531_v57  ;;  %4338 = vpow2.f32 %v1768_v8 }
 0x4ba   : > { %4340 = vpow2.f32 %v1539_v12 }
 0x4bb   : > { %v5335_v10 = vpop.eup %4336 }
 0x4bc   : > { %v1753_v5 = vpop.xlane.xlu0 %1752  ;;  %v1332_v11 = vsel %vm1045_vm12, %v5335_v10, 0.0  ;;  %v1524_v48 = vpop.xlane.xlu1 %1523 }
 0x4bd   : > { %v1764_v24 = vsub.f32 %v5265_v45, %v1753_v5  ;;  %v1535_v2 = vsub.f32 %v5263_v44, %v1524_v48 }
 0x4bf   : > { %v1770_v38 = vmul.f32 1.442695, %v1764_v24  ;;  %v5341_v56 = vpop.eup %4338  ;;  %v1541_v55 = vmul.f32 1.442695, %v1535_v2 }
 0x4c0   : > { %v1778_v45 = vsel %vm1045_vm12, %v5341_v56, 0.0  ;;  %v5352_v39 = vpop.eup %4340 }
 0x4c1   : > { %1086 = vadd.xlane.f32.xlu0 %v1085_v60  ;;  %4342 = vpow2.f32 %v1770_v38  ;;  %v1549_v50 = vsel %vm1045_vm12, %v5352_v39, 0.0 }
 0x4c2   : > { %4294 = vrot.lane.b32.xlu1 %v4293_v51, %s4548_s22 }
 0x4c4   : > { %v1756_v13 = vpop.xlane.xlu2 %1755  ;;  %v1527_v15 = vpop.xlane.xlu0 %1526 }
 0x4c5   : > { %v1765_v14 = vsub.f32 %v5273_v49, %v1756_v13  ;;  %v1536_v37 = vsub.f32 %v5271_v46, %v1527_v15  ;;  %v1316_v49 = vmul.f32 1.442695, %v1308_v26 }
 0x4c7   : > { %v1772_v17 = vmul.f32 1.442695, %v1765_v14  ;;  %v1543_v36 = vmul.f32 1.442695, %v1536_v37  ;;  %v5354_v47 = vpop.eup %4342 }
 0x4c8   : > { %v1781_v46 = vsel %vm1045_vm12, %v5354_v47, 0.0 }
 0x4c9   : > { %1089 = vadd.xlane.f32.xlu0 %v1088_v30  ;;  %4344 = vpow2.f32 %v1772_v17 }
 0x4ca   : > { %4346 = vpow2.f32 %v1543_v36 }
 0x4cb   : > { %4348 = vpow2.f32 %v1316_v49 }
 0x4cc   : > { %v1759_v57 = vpop.xlane.xlu0 %1758  ;;  %4350 = vpow2.f32 %v1541_v55 }
 0x4cd   : > { %v1766_v60 = vsub.f32 %v5279_v53, %v1759_v57 }
 0x4cf   : > { %v5361_v18 = vpop.eup %4344  ;;  %v1774_v51 = vmul.f32 1.442695, %v1766_v60 }
 0x4d0   : > { %v5363_v52 = vpop.eup %4346  ;;  %v1784_v61 = vsel %vm1045_vm12, %v5361_v18, 0.0 }
 0x4d1   : > { %1333 = vadd.xlane.f32.xlu0 %v1332_v11  ;;  %v5365_v58 = vpop.eup %4348  ;;  %v1555_v25 = vsel %vm1045_vm12, %v5363_v52, 0.0  ;;  %4352 = vpow2.f32 %v1774_v51 }
 0x4d2   : > { %v1329_v44 = vsel %vm1045_vm12, %v5365_v58, 0.0  ;;  %v5374_v29 = vpop.eup %4350 }
 0x4d3   : > { %v1552_v1 = vsel %vm1045_vm12, %v5374_v29, 0.0 }
 0x4d7   : > { %v5378_v4 = vpop.eup %4352 }
 0x4d8   : > { %v1787_v30 = vsel %vm1045_vm12, %v5378_v4, 0.0 }
 0x4d9   : > { %1779 = vadd.xlane.f32.xlu0 %v1778_v45 }
 0x4da   : > { %1761 = vmax.xlane.f32.xlu2 %v1760_v21 }
 0x4e1   : > { %1782 = vadd.xlane.f32.xlu0 %v1781_v46 }
 0x4e2   : > { %1550 = vadd.xlane.f32.xlu2 %v1549_v50 }
 0x4e9   : > { %1556 = vadd.xlane.f32.xlu0 %v1555_v25 }
 0x4ea   : > { %1785 = vadd.xlane.f32.xlu2 %v1784_v61 }
 0x4ec   : > { %1330 = vadd.xlane.f32.xlu1 %v1329_v44 }
 0x4f4   : > { %1553 = vadd.xlane.f32.xlu1 %v1552_v1 }
 0x4fc   : > { %1788 = vadd.xlane.f32.xlu1 %v1787_v30 }
 0x506   : > { %v1078_v5 = vpop.xlane.xlu0 %1077 }
 0x507   : > { %vm1096_vm15 = vweird.f32 %v1078_v5  ;;  %v1102_v51 = vand.u32 2147483648, %v1078_v5 }
 0x50c   : > { %v1322_v24 = vpop.xlane.xlu2 %1321 }
 0x50d   : > { %v1346_v1 = vand.u32 2147483648, %v1322_v24  ;;  %vm1340_vm2 = vweird.f32 %v1322_v24 }
 0x50e   : > { %v1530_v53 = vpop.xlane.xlu0 %1529 }
 0x50f   : > { %v1537_v8 = vsub.f32 %v5289_v7, %v1530_v53 }
 0x511   : > { %v1545_v9 = vmul.f32 1.442695, %v1537_v8 }
 0x513   : > { %4354 = vpow2.f32 %v1545_v9  ;;  %v1100_v9 = vand.u32 2147483647, %v1078_v5 }
 0x514   : > { %v5383_v22 = vpop.xlane.xlu1 %1080  ;;  %4356 = vrcp.f32 %v1078_v5 }
 0x515   : > { %4358 = vrcp.f32 %v1322_v24  ;;  %vm1101_vm4 = vcmp.eq.f32.partialorder %v1100_v9, 8.507059e+37  ;;  %vm1111_vm8 = vweird.f32 %v5383_v22  ;;  %v1115_v9 = vand.u32 2147483647, %v5383_v22 }
 0x516   : > { %4360 = vrcp.f32 %v5383_v22 }
 0x519   : > { %v5385_v11 = vpop.eup %4354 }
 0x51a   : > { %v1558_v12 = vsel %vm1045_vm12, %v5385_v11, 0.0  ;;  %v4357_v13 = vpop.eup %4356 }
 0x51b   : > { %1559 = vadd.xlane.f32.xlu2 %v1558_v12  ;;  %v4359_v15 = vpop.eup %4358  ;;  %v1092_v7 = vmul.f32 %v4357_v13, %v1078_v5  ;;  %vm1097_vm13 = vweird.f32 %v4357_v13  ;;  %v1347_v5 = vor.u32 1.1754944e-38, %v1346_v1 }
 0x51c   : > { %v5389_v38 = vpop.xlane.xlu0 %1083  ;;  %v5391_v14 = vpop.xlane.xlu1 %1324  ;;  %v1336_v37 = vmul.f32 %v4359_v15, %v1322_v24  ;;  %vm1341_vm14 = vweird.f32 %v4359_v15  ;;  %vm5412_vm1 = vmor %vm1096_vm15, %vm1097_vm13  ;;  %vm1116_vm13 = vcmp.eq.f32.partialorder %v1115_v9, 8.507059e+37 }
 0x51d   : > { %4362 = vrcp.f32 %v5391_v14  ;;  %v1093_v21 = vsub.f32 1.0, %v1092_v7  ;;  %v5397_v17 = vpop.eup %4360  ;;  %vm5416_vm3 = vmor %vm1340_vm2, %vm1341_vm14  ;;  %v1361_v8 = vand.u32 2147483648, %v5391_v14  ;;  %vm1355_vm9 = vweird.f32 %v5391_v14 }
 0x51e   : > { %v1337_v26 = vsub.f32 1.0, %v1336_v37  ;;  %4364 = vrcp.f32 %v5389_v38  ;;  %v1107_v46 = vmul.f32 %v5397_v17, %v5383_v22  ;;  %vm1112_vm6 = vweird.f32 %v5397_v17 }
 0x51f   : > { %v1094_v49 = vmul.f32 %v4357_v13, %v1093_v21  ;;  %vm5450_vm10 = vmor %vm1111_vm8, %vm1112_vm6  ;;  %vm1126_vm2 = vweird.f32 %v5389_v38 }
 0x520   : > { %v1338_v48 = vmul.f32 %v4359_v15, %v1337_v26  ;;  %v1108_v61 = vsub.f32 1.0, %v1107_v46 }
 0x521   : > { %v1095_v57 = vadd.f32 %v4357_v13, %v1094_v49  ;;  %v1103_v49 = vor.u32 1.1754944e-38, %v1102_v51 }
 0x522   : > { %v1339_v25 = vadd.f32 %v4359_v15, %v1338_v48  ;;  %v1109_v21 = vmul.f32 %v5397_v17, %v1108_v61 }
 0x523   : > { %v5399_v36 = vpop.eup %4362  ;;  %v1099_v7 = vsel %vm5412_vm1, %v4357_v13, %v1095_v57 }
 0x524   : > { %v5395_v45 = vpop.xlane.xlu0 %1327  ;;  %v1351_v50 = vmul.f32 %v5399_v36, %v5391_v14  ;;  %v5408_v44 = vpop.eup %4364  ;;  %v1343_v37 = vsel %vm5416_vm3, %v4359_v15, %v1339_v25  ;;  %v1104_v15 = vsel %vm1101_vm4, %v1103_v49, %v1099_v7  ;;  %v1110_v61 = vadd.f32 %v5397_v17, %v1109_v21 }
 0x525   : > { %4366 = vrcp.f32 %v5395_v45  ;;  %v1122_v26 = vmul.f32 %v5408_v44, %v5389_v38  ;;  %vm1356_vm7 = vweird.f32 %v5399_v36  ;;  %v1105_v12 = vmul.f32 %v5283_v0, %v1104_v15 }
 0x526   : > { %v1352_v30 = vsub.f32 1.0, %v1351_v50  ;;  %v1359_v21 = vand.u32 2147483647, %v5391_v14  ;;  %v1114_v0 = vsel %vm5450_vm10, %v5397_v17, %v1110_v61  ;;  %vm5463_vm11 = vmor %vm1355_vm9, %vm1356_vm7  ;;  %vm1127_vm15 = vweird.f32 %v5408_v44 }
 0x527   : > { %v1123_v57 = vsub.f32 1.0, %v1122_v26  ;;  %v1376_v61 = vand.u32 2147483648, %v5395_v45  ;;  %vm1370_vm3 = vweird.f32 %v5395_v45  ;;  %vm5493_vm4 = vmor %vm1126_vm2, %vm1127_vm15 }
 0x528   : > { %vm1360_vm14 = vcmp.eq.f32.partialorder %v1359_v21, 8.507059e+37 }
 0x529   : > { %v1377_v9 = vor.u32 1.1754944e-38, %v1376_v61 }
 0x52b   : > { %v5410_v53 = vpop.eup %4366 }
 0x52c   : > { %v1533_v2 = vpop.xlane.xlu0 %1532  ;;  %v1366_v48 = vmul.f32 %v5410_v53, %v5395_v45  ;;  %vm1371_vm1 = vweird.f32 %v5410_v53 }
 0x52d   : > { %v1538_v55 = vsub.f32 %v5317_v54, %v1533_v2  ;;  %v1344_v54 = vand.u32 2147483647, %v1322_v24  ;;  %v1353_v24 = vmul.f32 %v5399_v36, %v1352_v30  ;;  %v1117_v30 = vand.u32 2147483648, %v5383_v22 }
 0x52e   : > { %v1124_v22 = vmul.f32 %v5408_v44, %v1123_v57 }
 0x52f   : > { %v1547_v60 = vmul.f32 1.442695, %v1538_v55  ;;  %vm1345_vm5 = vcmp.eq.f32.partialorder %v1344_v54, 8.507059e+37  ;;  %v1354_v1 = vadd.f32 %v5399_v36, %v1353_v24  ;;  %v1167_v54 = vpop.permute.xlu2 %1166  ;;  %v1118_v24 = vor.u32 1.1754944e-38, %v1117_v30 }
 0x530   : > { %v1348_v2 = vsel %vm1345_vm5, %v1347_v5, %v1343_v37  ;;  %v1374_v30 = vand.u32 2147483647, %v5395_v45  ;;  %vm1372_vm5 = vmor %vm1370_vm3, %vm1371_vm1 }
 0x531   : > { %4368 = vpow2.f32 %v1547_v60  ;;  %v1367_v60 = vsub.f32 1.0, %v1366_v48  ;;  %v1349_v7 = vmul.f32 %v5287_v6, %v1348_v2  ;;  %v1358_v17 = vsel %vm5463_vm11, %v5399_v36, %v1354_v1 }
 0x532   : > { %v1362_v48 = vor.u32 1.1754944e-38, %v1361_v8  ;;  %v1125_v2 = vadd.f32 %v5408_v44, %v1124_v22  ;;  %vm1375_vm7 = vcmp.eq.f32.partialorder %v1374_v30, 8.507059e+37 }
 0x533   : > { %v1368_v49 = vmul.f32 %v5410_v53, %v1367_v60 }
 0x534   : > { %v4295_v46 = vpop.permute.xlu1 %4294  ;;  %v5430_v50 = vpop.xlane.xlu0 %1086  ;;  %v1363_v15 = vsel %vm1360_vm14, %v1362_v48, %v1358_v17 }
 0x535   : > { %v4296_v13 = vunpack.i.l.bf16 %v4295_v46  ;;  %4370 = vrcp.f32 %v5430_v50  ;;  %v4297_v25 = vunpack.i.h.bf16 %v4295_v46  ;;  %v1119_v46 = vsel %vm1116_vm13, %v1118_v24, %v1114_v0 }
 0x536   : > { %v1369_v57 = vadd.f32 %v5410_v53, %v1368_v49  ;;  %v1120_v60 = vmul.f32 %v5297_v20, %v1119_v46  ;;  %v1147_v21 = vand.u32 2147483648, %v5430_v50  ;;  %vm1141_vm9 = vweird.f32 %v5430_v50 }
 0x537   : > { %v5433_v55 = vpop.eup %4368  ;;  %1209 = vmatpush.msra.mxu1 %v4296_v13  ;;  %1438 = vmatpush.msra.mxu3 %v4296_v13  ;;  %v1145_v0 = vand.u32 2147483647, %v5430_v50 }
 0x538   : > { %v1561_v51 = vsel %vm1045_vm12, %v5433_v55, 0.0  ;;  %v1373_v45 = vsel %vm1372_vm5, %v5410_v53, %v1369_v57  ;;  %v1148_v17 = vor.u32 1.1754944e-38, %v1147_v21 }
 0x539   : > { %1210 = vmatpush.msra.mxu1 %v4297_v25  ;;  %1439 = vmatpush.msra.mxu3 %v4297_v25  ;;  %vm1146_vm11 = vcmp.eq.f32.partialorder %v1145_v0, 8.507059e+37 }
 0x53a   : > { %1562 = vadd.xlane.f32.xlu1 %v1561_v51  ;;  %v1364_v51 = vmul.f32 %v5302_v28, %v1363_v15 }
 0x53b   : > { %v5455_v26 = vpop.eup %4370  ;;  %1211 = vmatpush.msra.mxu1 %v1167_v54  ;;  %1440 = vmatpush.msra.mxu3 %v1167_v54 }
 0x53c   : > { %v1137_v14 = vmul.f32 %v5455_v26, %v5430_v50  ;;  %4089 = vmatmul.msk.f32.vlgmr.msra.gmra.mxu1 %vm1045_vm12, %v1105_v12  ;;  %4104 = vmatmul.msk.f32.vlgmr.msra.gmra.mxu3 %vm1045_vm12, %v1349_v7  ;;  %v5472_v5 = vpop.xlane.xlu0 %1089  ;;  %v1378_v12 = vsel %vm1375_vm7, %v1377_v9, %v1373_v45  ;;  %vm1142_vm8 = vweird.f32 %v5455_v26 }
 0x53d   : > { %1665 = vmatpush.msrb.mxu1 %v5143_v32  ;;  %1894 = vmatpush.msrb.mxu3 %v5143_v32  ;;  %4372 = vrcp.f32 %v5472_v5  ;;  %v1132_v32 = vand.u32 2147483648, %v5389_v38  ;;  %v1379_v53 = vmul.f32 %v5310_v40, %v1378_v12  ;;  %vm1143_vm10 = vmor %vm1141_vm9, %vm1142_vm8  ;;  %v1162_v50 = vand.u32 2147483648, %v5472_v5 }
 0x53e   : > { %v1138_v36 = vsub.f32 1.0, %v1137_v14  ;;  %vm1156_vm14 = vweird.f32 %v5472_v5  ;;  %v1160_v15 = vand.u32 2147483647, %v5472_v5 }
 0x53f   : > { %1666 = vmatpush.msrb.mxu1 %v5145_v33  ;;  %1895 = vmatpush.msrb.mxu3 %v5145_v33  ;;  %v1130_v33 = vand.u32 2147483647, %v5389_v38 }
 0x540   : > { %v1139_v20 = vmul.f32 %v5455_v26, %v1138_v36  ;;  %vm1161_vm1 = vcmp.eq.f32.partialorder %v1160_v15, 8.507059e+37 }
 0x541   : > { %1667 = vmatpush.msrb.mxu1 %v4296_v13  ;;  %1896 = vmatpush.msrb.mxu3 %v4296_v13  ;;  %v1129_v13 = vsel %vm5493_vm4, %v5408_v44, %v1125_v2  ;;  %vm1131_vm6 = vcmp.eq.f32.partialorder %v1130_v33, 8.507059e+37 }
 0x542   : > { %v1140_v37 = vadd.f32 %v5455_v26, %v1139_v20 }
 0x543   : > { %v4373_v8 = vpop.eup %4372  ;;  %1668 = vmatpush.msrb.mxu1 %v4297_v25  ;;  %1897 = vmatpush.msrb.mxu3 %v4297_v25  ;;  %v1133_v25 = vor.u32 1.1754944e-38, %v1132_v32 }
 0x544   : > { %v1152_v28 = vmul.f32 %v4373_v8, %v5472_v5  ;;  %4090 = vmatmul.msk.f32.gmra.mxu1 %vm1045_vm12, %v1120_v60  ;;  %4105 = vmatmul.msk.f32.gmra.mxu3 %vm1045_vm12, %v1364_v51  ;;  %v5507_v38 = vpop.xlane.xlu0 %1333  ;;  %v1144_v14 = vsel %vm1143_vm10, %v5455_v26, %v1140_v37  ;;  %vm1157_vm13 = vweird.f32 %v4373_v8 }
 0x545   : > { %1669 = vmatpush.msrb.mxu1 %v1167_v54  ;;  %1898 = vmatpush.msrb.mxu3 %v1167_v54  ;;  %v1134_v44 = vsel %vm1131_vm6, %v1133_v25, %v1129_v13  ;;  %vm1158_vm15 = vmor %vm1156_vm14, %vm1157_vm13  ;;  %vm1400_vm9 = vweird.f32 %v5507_v38 }
 0x546   : > { %v1153_v7 = vsub.f32 1.0, %v1152_v28  ;;  %v1135_v22 = vmul.f32 %v5304_v34, %v1134_v44  ;;  %v1149_v34 = vsel %vm1146_vm11, %v1148_v17, %v1144_v14 }
 0x547   : > { %v1150_v46 = vmul.f32 %v5322_v59, %v1149_v34 }
 0x548   : > { %v1154_v54 = vmul.f32 %v4373_v8, %v1153_v7 }
 0x54a   : > { %v1155_v40 = vadd.f32 %v4373_v8, %v1154_v54 }
 0x54c   : > { %4091 = vmatmul.msk.f32.gmra.mxu1 %vm1045_vm12, %v1135_v22  ;;  %4106 = vmatmul.msk.f32.gmra.mxu3 %vm1045_vm12, %v1379_v53  ;;  %v5519_v6 = vpop.xlane.xlu0 %1779  ;;  %v1159_v2 = vsel %vm1158_vm15, %v4373_v8, %v1155_v40 }
 0x54d   : > { %v1762_v49 = vpop.xlane.xlu2 %1761 }
 0x54e   : > { %v1767_v24 = vsub.f32 %v5343_v16, %v1762_v49  ;;  %v1163_v16 = vor.u32 1.1754944e-38, %v1162_v50 }
 0x550   : > { %v1776_v48 = vmul.f32 1.442695, %v1767_v24  ;;  %v1164_v57 = vsel %vm1161_vm1, %v1163_v16, %v1159_v2  ;;  %vm1798_vm1 = vweird.f32 %v5519_v6 }
 0x551   : > { %v1165_v5 = vmul.f32 %v5330_v3, %v1164_v57 }
 0x552   : > { %4374 = vpow2.f32 %v1776_v48 }
 0x554   : > { %4092 = vmatmul.msk.f32.gmra.mxu1 %vm1045_vm12, %v1150_v46  ;;  %v5528_v36 = vpop.xlane.xlu0 %1782 }
 0x555   : > { %v1551_v26 = vpop.xlane.xlu2 %1550 }
 0x556   : > { %4376 = vrcp.f32 %v1551_v26  ;;  %v1575_v13 = vand.u32 2147483648, %v1551_v26  ;;  %v1573_v3 = vand.u32 2147483647, %v1551_v26  ;;  %vm1569_vm3 = vweird.f32 %v1551_v26 }
 0x557   : > { %4378 = vrcp.f32 %v5507_v38 }
 0x558   : > { %v5531_v32 = vpop.eup %4374  ;;  %v1576_v45 = vor.u32 1.1754944e-38, %v1575_v13  ;;  %vm1574_vm5 = vcmp.eq.f32.partialorder %v1573_v3, 8.507059e+37 }
 0x559   : > { %v1790_v59 = vsel %vm1045_vm12, %v5531_v32, 0.0 }
 0x55a   : > { %1791 = vadd.xlane.f32.xlu0 %v1790_v59  ;;  %v1406_v59 = vand.u32 2147483648, %v5507_v38 }
 0x55c   : > { %v4377_v61 = vpop.eup %4376  ;;  %4093 = vmatmul.msk.f32.gmra.mxu1 %vm1045_vm12, %v1165_v5  ;;  %v5539_v1 = vpop.xlane.xlu0 %1556 }
 0x55d   : > { %v5537_v33 = vpop.eup %4378  ;;  %v1565_v60 = vmul.f32 %v4377_v61, %v1551_v26  ;;  %vm1570_vm2 = vweird.f32 %v4377_v61  ;;  %v5562_v2 = vpop.xlane.xlu2 %1785 }
 0x55e   : > { %v1396_v8 = vmul.f32 %v5537_v33, %v5507_v38  ;;  %vm1571_vm4 = vmor %vm1569_vm3, %vm1570_vm2  ;;  %vm1401_vm8 = vweird.f32 %v5537_v33 }
 0x55f   : > { %v1566_v51 = vsub.f32 1.0, %v1565_v60  ;;  %v1331_v30 = vpop.xlane.xlu1 %1330  ;;  %vm5565_vm13 = vmor %vm1400_vm9, %vm1401_vm8  ;;  %v1404_v60 = vand.u32 2147483647, %v5507_v38  ;;  %vm1599_vm8 = vweird.f32 %v5539_v1 }
 0x560   : > { %4380 = vrcp.f32 %v1331_v30  ;;  %v1397_v25 = vsub.f32 1.0, %v1396_v8  ;;  %v1391_v14 = vand.u32 2147483648, %v1331_v30  ;;  %vm1385_vm7 = vweird.f32 %v1331_v30 }
 0x561   : > { %4382 = vrcp.f32 %v5519_v6  ;;  %v1567_v20 = vmul.f32 %v4377_v61, %v1566_v51  ;;  %vm1405_vm15 = vcmp.eq.f32.partialorder %v1404_v60, 8.507059e+37 }
 0x562   : > { %4384 = vrcp.f32 %v5539_v1  ;;  %v1398_v0 = vmul.f32 %v5537_v33, %v1397_v25  ;;  %v1392_v46 = vor.u32 1.1754944e-38, %v1391_v14  ;;  %v1605_v14 = vand.u32 2147483648, %v5539_v1 }
 0x563   : > { %v1568_v28 = vadd.f32 %v4377_v61, %v1567_v20 }
 0x564   : > { %v1399_v48 = vadd.f32 %v5537_v33, %v1398_v0 }
 0x565   : > { %v1572_v9 = vsel %vm1571_vm4, %v4377_v61, %v1568_v28  ;;  %v1817_v61 = vand.u32 2147483647, %v5528_v36 }
 0x566   : > { %v4381_v44 = vpop.eup %4380  ;;  %v1577_v12 = vsel %vm1574_vm5, %v1576_v45, %v1572_v9  ;;  %v1403_v8 = vsel %vm5565_vm13, %v5537_v33, %v1399_v48  ;;  %v1603_v48 = vand.u32 2147483647, %v5539_v1 }
 0x567   : > { %v5545_v7 = vpop.eup %4382  ;;  %v1381_v37 = vmul.f32 %v4381_v44, %v1331_v30  ;;  %v1554_v21 = vpop.xlane.xlu1 %1553  ;;  %v1578_v22 = vmul.f32 %v5352_v39, %v1577_v12  ;;  %vm1386_vm6 = vweird.f32 %v4381_v44  ;;  %v1389_v39 = vand.u32 2147483647, %v1331_v30 }
 0x568   : > { %v5548_v53 = vpop.eup %4384  ;;  %4386 = vrcp.f32 %v1554_v21  ;;  %v1794_v49 = vmul.f32 %v5545_v7, %v5519_v6  ;;  %vm1387_vm10 = vmor %vm1385_vm7, %vm1386_vm6  ;;  %v1590_v3 = vand.u32 2147483648, %v1554_v21  ;;  %v1588_v38 = vand.u32 2147483647, %v1554_v21 }
 0x569   : > { %4388 = vrcp.f32 %v5528_v36  ;;  %v1382_v54 = vsub.f32 1.0, %v1381_v37  ;;  %4119 = vmatmul.msk.f32.vlgmr.msrb.gmra.mxu1 %vm1045_vm12, %v1578_v22  ;;  %v1595_v17 = vmul.f32 %v5548_v53, %v5539_v1  ;;  %vm1390_vm11 = vcmp.eq.f32.partialorder %v1389_v39, 8.507059e+37 }
 0x56a   : > { %v1795_v50 = vsub.f32 1.0, %v1794_v49  ;;  %4390 = vrcp.f32 %v5562_v2  ;;  %vm1799_vm2 = vweird.f32 %v5545_v7  ;;  %vm1584_vm3 = vweird.f32 %v1554_v21 }
 0x56b   : > { %v1383_v24 = vmul.f32 %v4381_v44, %v1382_v54  ;;  %v1596_v26 = vsub.f32 1.0, %v1595_v17  ;;  %vm1589_vm5 = vcmp.eq.f32.partialorder %v1588_v38, 8.507059e+37  ;;  %vm1600_vm6 = vweird.f32 %v5548_v53  ;;  %vm5594_vm7 = vmor %vm1798_vm1, %vm1799_vm2 }
 0x56c   : > { %v1796_v13 = vmul.f32 %v5545_v7, %v1795_v50  ;;  %v1802_v49 = vand.u32 2147483647, %v5519_v6  ;;  %vm1601_vm9 = vmor %vm1599_vm8, %vm1600_vm6  ;;  %vm1818_vm1 = vcmp.eq.f32.partialorder %v1817_v61, 8.507059e+37 }
 0x56d   : > { %v1384_v34 = vadd.f32 %v4381_v44, %v1383_v24  ;;  %v1597_v28 = vmul.f32 %v5548_v53, %v1596_v26 }
 0x56e   : > { %v4387_v40 = vpop.eup %4386  ;;  %v1797_v25 = vadd.f32 %v5545_v7, %v1796_v13 }
 0x56f   : > { %v5560_v15 = vpop.eup %4388  ;;  %v1580_v16 = vmul.f32 %v4387_v40, %v1554_v21  ;;  %v1388_v57 = vsel %vm1387_vm10, %v4381_v44, %v1384_v34  ;;  %vm1585_vm14 = vweird.f32 %v4387_v40  ;;  %v1591_v44 = vor.u32 1.1754944e-38, %v1590_v3  ;;  %v5583_v37 = vpop.xlane.xlu1 %1788 }
 0x570   : > { %v1393_v5 = vsel %vm1390_vm11, %v1392_v46, %v1388_v57  ;;  %v1809_v20 = vmul.f32 %v5560_v15, %v5528_v36  ;;  %vm1586_vm4 = vmor %vm1584_vm3, %vm1585_vm14  ;;  %v1598_v0 = vadd.f32 %v5548_v53, %v1597_v28  ;;  %v4391_v54 = vpop.eup %4390  ;;  %v1804_v21 = vand.u32 2147483648, %v5519_v6 }
 0x571   : > { %v1581_v51 = vsub.f32 1.0, %v1580_v16  ;;  %v1394_v30 = vmul.f32 %v5365_v58, %v1393_v5  ;;  %v1407_v58 = vor.u32 1.1754944e-38, %v1406_v59  ;;  %4392 = vrcp.f32 %v5583_v37 }
 0x572   : > { %v1810_v9 = vsub.f32 1.0, %v1809_v20  ;;  %v1824_v50 = vmul.f32 %v4391_v54, %v5562_v2  ;;  %v1606_v46 = vor.u32 1.1754944e-38, %v1605_v14  ;;  %vm1803_vm10 = vcmp.eq.f32.partialorder %v1802_v49, 8.507059e+37 }
 0x573   : > { %v1582_v45 = vmul.f32 %v4387_v40, %v1581_v51  ;;  %4107 = vmatmul.msk.f32.gmra.mxu3 %vm1045_vm12, %v1394_v30  ;;  %v1408_v12 = vsel %vm1405_vm15, %v1407_v58, %v1403_v8  ;;  %vm1604_vm11 = vcmp.eq.f32.partialorder %v1603_v48, 8.507059e+37  ;;  %vm1814_vm13 = vweird.f32 %v5560_v15 }
 0x574   : > { %v1409_v39 = vmul.f32 %v5335_v10, %v1408_v12  ;;  %v1811_v6 = vmul.f32 %v5560_v15, %v1810_v9  ;;  %v1602_v10 = vsel %vm1601_vm9, %v5548_v53, %v1598_v0  ;;  %v1819_v59 = vand.u32 2147483648, %v5528_v36 }
 0x575   : > { %v1583_v33 = vadd.f32 %v4387_v40, %v1582_v45  ;;  %v1607_v26 = vsel %vm1604_vm11, %v1606_v46, %v1602_v10  ;;  %vm1813_vm14 = vweird.f32 %v5528_v36  ;;  %vm1829_vm2 = vweird.f32 %v4391_v54 }
 0x576   : > { %v1812_v16 = vadd.f32 %v5560_v15, %v1811_v6  ;;  %v1608_v5 = vmul.f32 %v5363_v52, %v1607_v26  ;;  %vm1815_vm15 = vmor %vm1813_vm14, %vm1814_vm13  ;;  %v1820_v8 = vor.u32 1.1754944e-38, %v1819_v59  ;;  %vm1828_vm3 = vweird.f32 %v5562_v2 }
 0x577   : > { %v1587_v22 = vsel %vm1586_vm4, %v4387_v40, %v1583_v33  ;;  %v1801_v40 = vsel %vm5594_vm7, %v5545_v7, %v1797_v25  ;;  %v1825_v7 = vsub.f32 1.0, %v1824_v50  ;;  %v4393_v57 = vpop.eup %4392  ;;  %v1832_v36 = vand.u32 2147483647, %v5562_v2  ;;  %vm1830_vm4 = vmor %vm1828_vm3, %vm1829_vm2 }
 0x578   : > { %v1592_v17 = vsel %vm1589_vm5, %v1591_v44, %v1587_v22  ;;  %v1839_v51 = vmul.f32 %v4393_v57, %v5583_v37  ;;  %v1816_v30 = vsel %vm1815_vm15, %v5560_v15, %v1812_v16  ;;  %vm1844_vm6 = vweird.f32 %v4393_v57 }
 0x579   : > { %v1593_v34 = vmul.f32 %v5374_v29, %v1592_v17  ;;  %v1805_v29 = vor.u32 1.1754944e-38, %v1804_v21  ;;  %v1826_v60 = vmul.f32 %v4391_v54, %v1825_v7  ;;  %v1821_v13 = vsel %vm1818_vm1, %v1820_v8, %v1816_v30 }
 0x57a   : > { %v1840_v20 = vsub.f32 1.0, %v1839_v51  ;;  %v1822_v52 = vmul.f32 %v5354_v47, %v1821_v13  ;;  %vm1833_vm5 = vcmp.eq.f32.partialorder %v1832_v36, 8.507059e+37  ;;  %v1849_v25 = vand.u32 2147483648, %v5583_v37  ;;  %v769_v36 = vld [vmem:[%s6725_s5 + $0x18] sm:$0xff] }
 0x57b   : > { %4108 = vmatmul.msk.f32.gmra.mxu3 %vm1045_vm12, %v1409_v39  ;;  %4120 = vmatmul.msk.f32.gmra.mxu1 %vm1045_vm12, %v1593_v34  ;;  %v1806_v1 = vsel %vm1803_vm10, %v1805_v29, %v1801_v40  ;;  %v1827_v3 = vadd.f32 %v4391_v54, %v1826_v60  ;;  %vm1843_vm7 = vweird.f32 %v5583_v37 }
 0x57c   : > { %v1807_v53 = vmul.f32 %v5341_v56, %v1806_v1  ;;  %v1834_v56 = vand.u32 2147483648, %v5562_v2  ;;  %v1841_v28 = vmul.f32 %v4393_v57, %v1840_v20  ;;  %v1847_v2 = vand.u32 2147483647, %v5583_v37  ;;  %vm1845_vm8 = vmor %vm1843_vm7, %vm1844_vm6  ;;  %1952 = vmatpush.msra.mxu0 %v769_v36 }
 0x57d   : > { %v1831_v45 = vsel %vm1830_vm4, %v4391_v54, %v1827_v3  ;;  %v1850_v12 = vor.u32 1.1754944e-38, %v1849_v25 }
 0x57e   : > { %v1835_v15 = vor.u32 1.1754944e-38, %v1834_v56  ;;  %v1842_v33 = vadd.f32 %v4393_v57, %v1841_v28  ;;  %vm1848_vm9 = vcmp.eq.f32.partialorder %v1847_v2, 8.507059e+37 }
 0x580   : > { %v1836_v58 = vsel %vm1833_vm5, %v1835_v15, %v1831_v45  ;;  %v1846_v9 = vsel %vm1845_vm8, %v4393_v57, %v1842_v33  ;;  %v768_v45 = vld [vmem:[%s6725_s5 + $0x10] sm:$0xff]  ;;  %v767_v15 = vld [vmem:[%s6725_s5 + $0x8] sm:$0xff] }
 0x581   : > { %v1837_v47 = vmul.f32 %v5361_v18, %v1836_v58  ;;  %v1851_v0 = vsel %vm1848_vm9, %v1850_v12, %v1846_v9  ;;  %1953 = vmatpush.msra.mxu0 %v768_v45 }
 0x582   : > { %v1852_v14 = vmul.f32 %v5378_v4, %v1851_v0 }
 0x583   : > { %4121 = vmatmul.msk.f32.gmra.mxu1 %vm1045_vm12, %v1608_v5  ;;  %4134 = vmatmul.msk.f32.vlgmr.msrb.gmra.mxu3 %vm1045_vm12, %v1807_v53 }
 0x584   : > { %1954 = vmatpush.msra.mxu0 %v767_v15 }
 0x58b   : > { %4135 = vmatmul.msk.f32.gmra.mxu3 %vm1045_vm12, %v1822_v52 }
 0x58e   : > { %v1560_v38 = vpop.xlane.xlu2 %1559 }
 0x58f   : > { %4394 = vrcp.f32 %v1560_v38  ;;  %v1620_v49 = vand.u32 2147483648, %v1560_v38  ;;  %v1618_v17 = vand.u32 2147483647, %v1560_v38  ;;  %vm1614_vm11 = vweird.f32 %v1560_v38 }
 0x591   : > { %v1621_v37 = vor.u32 1.1754944e-38, %v1620_v49  ;;  %vm1619_vm14 = vcmp.eq.f32.partialorder %v1618_v17, 8.507059e+37 }
 0x593   : > { %4136 = vmatmul.msk.f32.gmra.mxu3 %vm1045_vm12, %v1837_v47 }
 0x595   : > { %v4395_v44 = vpop.eup %4394 }
 0x596   : > { %v1610_v22 = vmul.f32 %v4395_v44, %v1560_v38  ;;  %vm1615_vm10 = vweird.f32 %v4395_v44 }
 0x597   : > { %vm1616_vm13 = vmor %vm1614_vm11, %vm1615_vm10 }
 0x598   : > { %v1611_v54 = vsub.f32 1.0, %v1610_v22 }
 0x59a   : > { %v1612_v21 = vmul.f32 %v4395_v44, %v1611_v54 }
 0x59b   : > { %4137 = vmatmul.msk.f32.gmra.mxu3 %vm1045_vm12, %v1852_v14 }
 0x59c   : > { %v1613_v18 = vadd.f32 %v4395_v44, %v1612_v21 }
 0x59e   : > { %v1617_v24 = vsel %vm1616_vm13, %v4395_v44, %v1613_v18 }
 0x59f   : > { %v1622_v39 = vsel %vm1619_vm14, %v1621_v37, %v1617_v24 }
 0x5a0   : > { %v1623_v34 = vmul.f32 %v5385_v11, %v1622_v39 }
 0x5a2   : > { %4122 = vmatmul.msk.f32.gmra.mxu1 %vm1045_vm12, %v1623_v34 }
 0x5ad   : > { %v1563_v48 = vpop.xlane.xlu1 %1562 }
 0x5ae   : > { %4396 = vrcp.f32 %v1563_v48  ;;  %v1635_v50 = vand.u32 2147483648, %v1563_v48  ;;  %v1633_v29 = vand.u32 2147483647, %v1563_v48  ;;  %vm1629_vm1 = vweird.f32 %v1563_v48 }
 0x5b0   : > { %v1636_v1 = vor.u32 1.1754944e-38, %v1635_v50  ;;  %vm1634_vm3 = vcmp.eq.f32.partialorder %v1633_v29, 8.507059e+37 }
 0x5b4   : > { %v4397_v40 = vpop.eup %4396 }
 0x5b5   : > { %v1625_v6 = vmul.f32 %v4397_v40, %v1563_v48  ;;  %vm1630_vm15 = vweird.f32 %v4397_v40 }
 0x5b6   : > { %vm1631_vm2 = vmor %vm1629_vm1, %vm1630_vm15 }
 0x5b7   : > { %v1626_v4 = vsub.f32 1.0, %v1625_v6 }
 0x5b9   : > { %v1627_v10 = vmul.f32 %v4397_v40, %v1626_v4  ;;  %v1213_v57 = vpop.f32.mrf.mxu1 }
 0x5ba   : > { %v1228_v44 = vmul.f32 %v5160_v41, %v1213_v57 }
 0x5bb   : > { %v1628_v46 = vadd.f32 %v4397_v40, %v1627_v10 }
 0x5bd   : > { %v1632_v26 = vsel %vm1631_vm2, %v4397_v40, %v1628_v46 }
 0x5be   : > { %v1637_v7 = vsel %vm1634_vm3, %v1636_v1, %v1632_v26 }
 0x5bf   : > { %v1638_v11 = vmul.f32 %v5433_v55, %v1637_v7  ;;  %v1442_v8 = vpop.f32.mrf.mxu3 }
 0x5c0   : > { %v1457_v9 = vmul.f32 %v5162_v42, %v1442_v8 }
 0x5c1   : > { %4123 = vmatmul.msk.f32.gmra.mxu1 %vm1045_vm12, %v1638_v11  ;;  %v1216_v61 = vpop.f32.mrf.mxu1 }
 0x5c2   : > { %v1462_v22 = vadd.f32 %v1457_v9, %v1228_v44  ;;  %v1229_v18 = vmul.f32 %v5160_v41, %v1216_v61 }
 0x5c7   : > { %v1445_v28 = vpop.f32.mrf.mxu3 }
 0x5c8   : > { %v1458_v14 = vmul.f32 %v5162_v42, %v1445_v28  ;;  %v5680_v28 = vld [vmem:[%s6726_s6] sm:$0xff] }
 0x5c9   : > { %v1219_v52 = vpop.f32.mrf.mxu1  ;;  %v1977_v45 = vperm.slane %v5680_v28, 4 }
 0x5ca   : > { %v1463_v24 = vadd.f32 %v1458_v14, %v1229_v18  ;;  %v1230_v50 = vmul.f32 %v5160_v41, %v1219_v52 }
 0x5cd   : > { %v1792_v16 = vpop.xlane.xlu0 %1791 }
 0x5ce   : > { %4398 = vrcp.f32 %v1792_v16  ;;  %v1864_v60 = vand.u32 2147483648, %v1792_v16  ;;  %v1862_v30 = vand.u32 2147483647, %v1792_v16  ;;  %vm1858_vm5 = vweird.f32 %v1792_v16 }
 0x5cf   : > { %v1448_v58 = vpop.f32.mrf.mxu3 }
 0x5d0   : > { %v1865_v20 = vor.u32 1.1754944e-38, %v1864_v60  ;;  %vm1863_vm7 = vcmp.eq.f32.partialorder %v1862_v30, 8.507059e+37  ;;  %v1459_v6 = vmul.f32 %v5162_v42, %v1448_v58 }
 0x5d1   : > { %v1222_v38 = vpop.f32.mrf.mxu1 }
 0x5d2   : > { %v1464_v29 = vadd.f32 %v1459_v6, %v1230_v50 }
 0x5d4   : > { %v4399_v59 = vpop.eup %4398 }
 0x5d5   : > { %v1854_v5 = vmul.f32 %v4399_v59, %v1792_v16  ;;  %vm1859_vm4 = vweird.f32 %v4399_v59  ;;  %v1231_v16 = vmul.f32 %v5160_v41, %v1222_v38 }
 0x5d6   : > { %vm1860_vm6 = vmor %vm1858_vm5, %vm1859_vm4 }
 0x5d7   : > { %v1855_v53 = vsub.f32 1.0, %v1854_v5 }
 0x5d9   : > { %v1856_v51 = vmul.f32 %v4399_v59, %v1855_v53  ;;  %v1225_v33 = vpop.f32.mrf.mxu1 }
 0x5db   : > { %v1857_v13 = vadd.f32 %v4399_v59, %v1856_v51 }
 0x5dd   : > { %v1861_v3 = vsel %vm1860_vm6, %v4399_v59, %v1857_v13  ;;  %v1232_v13 = vmul.f32 %v5160_v41, %v1225_v33 }
 0x5de   : > { %v1866_v55 = vsel %vm1863_vm7, %v1865_v20, %v1861_v3 }
 0x5df   : > { %v1867_v56 = vmul.f32 %v5531_v32, %v1866_v55  ;;  %v766_v32 = vld [vmem:[%s6725_s5] sm:$0xff] }
 0x5e0   : > { %1955 = vmatpush.msra.mxu0 %v766_v32 }
 0x5e1   : > { %4138 = vmatmul.msk.f32.gmra.mxu3 %vm1045_vm12, %v1867_v56 }
 0x5e6   : > { %v1671_v47 = vpop.f32.mrf.mxu1 }
 0x5e7   : > { %v1686_v12 = vmul.f32 %v5200_v62, %v1671_v47 }
 0x5e9   : > { %v1691_v49 = vadd.f32 %v1686_v12, %v1462_v22 }
 0x5f6   : > { %v1451_v25 = vpop.f32.mrf.mxu3 }
 0x5f7   : > { %v1460_v11 = vmul.f32 %v5162_v42, %v1451_v25 }
 0x5f8   : > { %v1674_v0 = vpop.f32.mrf.mxu1 }
 0x5f9   : > { %v1687_v37 = vmul.f32 %v5200_v62, %v1674_v0  ;;  %v1465_v5 = vadd.f32 %v1460_v11, %v1231_v16 }
 0x5fb   : > { %v1692_v34 = vadd.f32 %v1687_v37, %v1463_v24 }
 0x5fe   : > { %v1454_v2 = vpop.f32.mrf.mxu3 }
 0x5ff   : > { %v1461_v8 = vmul.f32 %v5162_v42, %v1454_v2 }
 0x600   : > { %v1677_v40 = vpop.f32.mrf.mxu1 }
 0x601   : > { %v1688_v10 = vmul.f32 %v5200_v62, %v1677_v40  ;;  %v1466_v3 = vadd.f32 %v1461_v8, %v1232_v13 }
 0x603   : > { %v1693_v1 = vadd.f32 %v1688_v10, %v1464_v29 }
 0x606   : > { %v1900_v54 = vpop.f32.mrf.mxu3 }
 0x607   : > { %v1915_v21 = vmul.f32 %v5202_v63, %v1900_v54 }
 0x609   : > { %v1920_v17 = vadd.f32 %v1915_v21, %v1691_v49 }
 0x60b   : > { %4139 = vmatmul.msk.f32.vlgmr.msra.gmra.mxu0 %vm782_vm0, %v1920_v17 }
 0x60e   : > { %v1903_v39 = vpop.f32.mrf.mxu3 }
 0x60f   : > { %v1916_v48 = vmul.f32 %v5202_v63, %v1903_v39 }
 0x611   : > { %v1921_v4 = vadd.f32 %v1916_v48, %v1692_v34 }
 0x613   : > { %4140 = vmatmul.msk.f32.gmra.mxu0 %vm782_vm0, %v1921_v4 }
 0x616   : > { %v1906_v46 = vpop.f32.mrf.mxu3 }
 0x617   : > { %v1917_v26 = vmul.f32 %v5202_v63, %v1906_v46 }
 0x619   : > { %v1922_v7 = vadd.f32 %v1917_v26, %v1693_v1 }
 0x61b   : > { %4141 = vmatmul.msk.f32.gmra.mxu0 %vm782_vm0, %v1922_v7 }
 0x61e   : > { %v1909_v57 = vpop.f32.mrf.mxu3 }
 0x61f   : > { %v1680_v59 = vpop.f32.mrf.mxu1  ;;  %v1918_v61 = vmul.f32 %v5202_v63, %v1909_v57 }
 0x620   : > { %v1689_v53 = vmul.f32 %v5200_v62, %v1680_v59 }
 0x622   : > { %v1694_v60 = vadd.f32 %v1689_v53, %v1465_v5 }
 0x624   : > { %v1923_v51 = vadd.f32 %v1918_v61, %v1694_v60  ;;  %v4147_v61 = vld [vmem:[%s6724_s4 + $0x38] sm:$0xff]  ;;  %v4146_v60 = vld [vmem:[%s6724_s4 + $0x30] sm:$0xff] }
 0x625   : > { %2138 = vmatpush.msra.mxu1 %v4147_v61 }
 0x626   : > { %4142 = vmatmul.msk.f32.gmra.mxu0 %vm782_vm0, %v1923_v51  ;;  %v4145_v51 = vld [vmem:[%s6724_s4 + $0x28] sm:$0xff] }
 0x627   : > { %2139 = vmatpush.msra.mxu1 %v4146_v60 }
 0x629   : > { %2140 = vmatpush.msra.mxu1 %v4145_v51 }
 0x63e   : > { %v1683_v30 = vpop.f32.mrf.mxu1 }
 0x63f   : > { %v1690_v20 = vmul.f32 %v5200_v62, %v1683_v30  ;;  %v4144_v30 = vld [vmem:[%s6724_s4 + $0x20] sm:$0xff] }
 0x640   : > { %2141 = vmatpush.msra.mxu1 %v4144_v30 }
 0x641   : > { %v1695_v56 = vadd.f32 %v1690_v20, %v1466_v3 }
 0x664   : > { %v1912_v55 = vpop.f32.mrf.mxu3 }
 0x665   : > { %v1919_v52 = vmul.f32 %v5202_v63, %v1912_v55 }
 0x667   : > { %v1924_v36 = vadd.f32 %v1919_v52, %v1695_v56 }
 0x669   : > { %4143 = vmatmul.msk.f32.gmra.mxu0 %vm782_vm0, %v1924_v36 }
 0x688   : > { %v1957_v15 = vpop.f32.mrf.mxu0 }
 0x689   : > { %v1972_v32 = vadd.f32 %v1957_v15, %v5007_v19 }
 0x68b   : > { %v5684_v38 = vadd.f32 %v1977_v45, %v1972_v32 }
 0x68d   : > { %v1983_v58 = vsel %vm782_vm0, %v5684_v38, 0.0 }
 0x68e   : > { %1984 = vadd.xlane.f32.xlu2 %v1983_v58 }
 0x690   : > { %v1960_v33 = vpop.f32.mrf.mxu0 }
 0x691   : > { %v1973_v25 = vadd.f32 %v1960_v33, %v5014_v23 }
 0x693   : > { %v5689_v47 = vadd.f32 %v1977_v45, %v1973_v25 }
 0x695   : > { %v1986_v2 = vsel %vm782_vm0, %v5689_v47, 0.0 }
 0x696   : > { %1987 = vadd.xlane.f32.xlu0 %v1986_v2 }
 0x698   : > { %v1963_v9 = vpop.f32.mrf.mxu0 }
 0x699   : > { %v1974_v44 = vadd.f32 %v1963_v9, %v5021_v27 }
 0x69b   : > { %v5694_v12 = vadd.f32 %v1977_v45, %v1974_v44 }
 0x69d   : > { %v1989_v19 = vsel %vm782_vm0, %v5694_v12, 0.0 }
 0x69e   : > { %1990 = vadd.xlane.f32.xlu1 %v1989_v19  ;;  %v5755_v19 = vperm.slane %v5680_v28, 2 }
 0x6a3   : > { %v1966_v22 = vpop.f32.mrf.mxu0 }
 0x6a4   : > { %v1975_v0 = vadd.f32 %v1966_v22, %v5028_v31 }
 0x6a6   : > { %v5699_v54 = vadd.f32 %v1977_v45, %v1975_v0 }
 0x6a8   : > { %v1992_v23 = vsel %vm782_vm0, %v5699_v54, 0.0 }
 0x6a9   : > { %1993 = vadd.xlane.f32.xlu2 %v1992_v23 }
 0x6e6   : > { %v1969_v49 = vpop.f32.mrf.mxu0 }
 0x6e7   : > { %v1976_v21 = vadd.f32 %v1969_v49, %v5035_v35  ;;  %v5758_v49 = vperm.slane %v5680_v28, 3 }
 0x6e9   : > { %v5704_v14 = vadd.f32 %v1977_v45, %v1976_v21 }
 0x6eb   : > { %v1995_v27 = vsel %vm782_vm0, %v5704_v14, 0.0 }
 0x6ec   : > { %1996 = vadd.xlane.f32.xlu0 %v1995_v27 }
 0x701   : > { %v1985_v17 = vpop.xlane.xlu2 %1984 }
 0x702   : > { %v1998_v18 = vmul.f32 %v1985_v17, %v5039_v43 }
 0x704   : > { %v2003_v31 = vsub.f32 %v5684_v38, %v1998_v18 }
 0x706   : > { %v2008_v37 = vmul.f32 %v2003_v31, %v2003_v31 }
 0x708   : > { %v2013_v24 = vsel %vm782_vm0, %v2008_v37, 0.0 }
 0x709   : > { %2014 = vadd.xlane.f32.xlu1 %v2013_v24  ;;  %v1988_v39 = vpop.xlane.xlu0 %1987 }
 0x70a   : > { %v1999_v34 = vmul.f32 %v1988_v39, %v5039_v43 }
 0x70c   : > { %v5713_v35 = vsub.f32 %v5689_v47, %v1999_v34 }
 0x70e   : > { %v2009_v48 = vmul.f32 %v5713_v35, %v5713_v35 }
 0x710   : > { %v2016_v40 = vsel %vm782_vm0, %v2009_v48, 0.0 }
 0x711   : > { %v1991_v6 = vpop.xlane.xlu1 %1990  ;;  %2017 = vadd.xlane.f32.xlu2 %v2016_v40 }
 0x712   : > { %v2000_v4 = vmul.f32 %v1991_v6, %v5039_v43 }
 0x714   : > { %v5720_v50 = vsub.f32 %v5694_v12, %v2000_v4 }
 0x716   : > { %v2010_v10 = vmul.f32 %v5720_v50, %v5720_v50 }
 0x718   : > { %v2019_v29 = vsel %vm782_vm0, %v2010_v10, 0.0 }
 0x719   : > { %2020 = vadd.xlane.f32.xlu0 %v2019_v29 }
 0x71c   : > { %v1994_v46 = vpop.xlane.xlu2 %1993 }
 0x71d   : > { %v2001_v1 = vmul.f32 %v1994_v46, %v5039_v43 }
 0x71f   : > { %v5727_v26 = vsub.f32 %v5699_v54, %v2001_v1 }
 0x721   : > { %v2011_v7 = vmul.f32 %v5727_v26, %v5727_v26 }
 0x723   : > { %v2022_v11 = vsel %vm782_vm0, %v2011_v7, 0.0 }
 0x724   : > { %2023 = vadd.xlane.f32.xlu1 %v2022_v11 }
 0x75f   : > { %v1997_v16 = vpop.xlane.xlu0 %1996 }
 0x760   : > { %v2002_v57 = vmul.f32 %v1997_v16, %v5039_v43 }
 0x762   : > { %v5734_v59 = vsub.f32 %v5704_v14, %v2002_v57 }
 0x764   : > { %v2012_v5 = vmul.f32 %v5734_v59, %v5734_v59 }
 0x766   : > { %v2025_v53 = vsel %vm782_vm0, %v2012_v5, 0.0 }
 0x767   : > { %2026 = vadd.xlane.f32.xlu2 %v2025_v53 }
 0x77c   : > { %v2015_v8 = vpop.xlane.xlu1 %2014 }
 0x77d   : > { %v2028_v13 = vmul.f32 %v2015_v8, %v5039_v43 }
 0x77f   : > { %v2033_v20 = vadd.f32 1e-05, %v2028_v13 }
 0x781   : > { %4400 = vrsqrt.f32 %v2033_v20  ;;  %vm2044_vm9 = vweird.f32 %v2033_v20 }
 0x784   : > { %v2018_v3 = vpop.xlane.xlu2 %2017 }
 0x785   : > { %v2029_v55 = vmul.f32 %v2018_v3, %v5039_v43 }
 0x787   : > { %v4401_v56 = vpop.eup %4400  ;;  %v2034_v52 = vadd.f32 1e-05, %v2029_v55 }
 0x788   : > { %v2039_v36 = vmul.f32 %v4401_v56, %v2033_v20  ;;  %vm2045_vm8 = vweird.f32 %v4401_v56 }
 0x789   : > { %4402 = vrsqrt.f32 %v2034_v52  ;;  %vm2046_vm10 = vmor %vm2044_vm9, %vm2045_vm8  ;;  %vm2054_vm13 = vweird.f32 %v2034_v52  ;;  %vm2203_vm9 = vcmask 785408  }
 0x78a   : > { %v2040_v45 = vmul.f32 %v4401_v56, %v2039_v36 }
 0x78c   : > { %v2041_v15 = vmul.f32 0.5, %v2040_v45  ;;  %v2021_v32 = vpop.xlane.xlu0 %2020 }
 0x78d   : > { %v2030_v58 = vmul.f32 %v2021_v32, %v5039_v43 }
 0x78e   : > { %v2042_v33 = vsub.f32 1.5, %v2041_v15 }
 0x78f   : > { %v4403_v25 = vpop.eup %4402  ;;  %v2035_v2 = vadd.f32 1e-05, %v2030_v58 }
 0x790   : > { %v2043_v9 = vmul.f32 %v4401_v56, %v2042_v33  ;;  %v2049_v44 = vmul.f32 %v4403_v25, %v2034_v52  ;;  %vm2055_vm11 = vweird.f32 %v4403_v25 }
 0x791   : > { %4404 = vrsqrt.f32 %v2035_v2  ;;  %vm2056_vm14 = vmor %vm2054_vm13, %vm2055_vm11  ;;  %vm2064_vm1 = vweird.f32 %v2035_v2 }
 0x792   : > { %v2047_v22 = vsel %vm2046_vm10, %v4401_v56, %v2043_v9  ;;  %v2050_v0 = vmul.f32 %v4403_v25, %v2049_v44  ;;  %v781_v9 = vld [vmem:[%s6725_s5 + $0x78] sm:$0xff]  ;;  %v780_v44 = vld [vmem:[%s6725_s5 + $0x70] sm:$0xff] }
 0x793   : > { %v2088_v23 = vmul.f32 %v2047_v22, %v2003_v31  ;;  %2223 = vmatpush.msra.mxu2 %v781_v9  ;;  %v777_v22 = vld [vmem:[%s6725_s5 + $0x58] sm:$0xff] }
 0x794   : > { %v2051_v21 = vmul.f32 0.5, %v2050_v0  ;;  %v776_v0 = vld [vmem:[%s6725_s5 + $0x50] sm:$0xff] }
 0x795   : > { %v2094_v27 = vmul.f32 %v5755_v19, %v2088_v23  ;;  %2224 = vmatpush.msra.mxu2 %v780_v44  ;;  %v775_v23 = vld [vmem:[%s6725_s5 + $0x48] sm:$0xff] }
 0x796   : > { %v2052_v17 = vsub.f32 1.5, %v2051_v21  ;;  %v773_v21 = vld [vmem:[%s6725_s5 + $0x38] sm:$0xff] }
 0x797   : > { %v2024_v18 = vpop.xlane.xlu1 %2023  ;;  %v4405_v37 = vpop.eup %4404  ;;  %v2100_v39 = vadd.f32 %v5758_v49, %v2094_v27  ;;  %v772_v27 = vld [vmem:[%s6725_s5 + $0x30] sm:$0xff] }
 0x798   : > { %v2031_v24 = vmul.f32 %v2024_v18, %v5039_v43  ;;  %v2053_v34 = vmul.f32 %v4403_v25, %v2052_v17  ;;  %v2059_v48 = vmul.f32 %v4405_v37, %v2035_v2  ;;  %vm2065_vm15 = vweird.f32 %v4405_v37  ;;  %v771_v17 = vld [vmem:[%s6725_s5 + $0x28] sm:$0xff]  ;;  %v770_v18 = vld [vmem:[%s6725_s5 + $0x20] sm:$0xff] }
 0x799   : > { %4148 = vmatmul.msk.f32.vlgmr.msra.gmra.mxu1 %vm782_vm0, %v2100_v39  ;;  %vm2066_vm2 = vmor %vm2064_vm1, %vm2065_vm15 }
 0x79a   : > { %v2036_v40 = vadd.f32 1e-05, %v2031_v24  ;;  %v2057_v31 = vsel %vm2056_vm14, %v4403_v25, %v2053_v34  ;;  %v2060_v6 = vmul.f32 %v4405_v37, %v2059_v48 }
 0x79b   : > { %v2089_v4 = vmul.f32 %v2057_v31, %v5713_v35 }
 0x79c   : > { %4406 = vrsqrt.f32 %v2036_v40  ;;  %v2061_v10 = vmul.f32 0.5, %v2060_v6  ;;  %vm2074_vm4 = vweird.f32 %v2036_v40 }
 0x79d   : > { %v2095_v29 = vmul.f32 %v5755_v19, %v2089_v4 }
 0x79e   : > { %v2062_v46 = vsub.f32 1.5, %v2061_v10 }
 0x79f   : > { %v2101_v1 = vadd.f32 %v5758_v49, %v2095_v29 }
 0x7a0   : > { %v2063_v7 = vmul.f32 %v4405_v37, %v2062_v46 }
 0x7a1   : > { %4149 = vmatmul.msk.f32.gmra.mxu1 %vm782_vm0, %v2101_v1 }
 0x7a2   : > { %v4407_v11 = vpop.eup %4406  ;;  %v2067_v16 = vsel %vm2066_vm2, %v4405_v37, %v2063_v7  ;;  %v2110_v37 = vperm.slane %v5680_v28, 6 }
 0x7a3   : > { %v2069_v57 = vmul.f32 %v4407_v11, %v2036_v40  ;;  %v2090_v5 = vmul.f32 %v2067_v16, %v5720_v50  ;;  %vm2075_vm3 = vweird.f32 %v4407_v11 }
 0x7a4   : > { %vm2076_vm5 = vmor %vm2074_vm4, %vm2075_vm3 }
 0x7a5   : > { %v2070_v53 = vmul.f32 %v4407_v11, %v2069_v57  ;;  %v2096_v35 = vmul.f32 %v5755_v19, %v2090_v5 }
 0x7a7   : > { %v2071_v61 = vmul.f32 0.5, %v2070_v53  ;;  %v2102_v60 = vadd.f32 %v5758_v49, %v2096_v35 }
 0x7a9   : > { %v2072_v51 = vsub.f32 1.5, %v2071_v61  ;;  %4150 = vmatmul.msk.f32.gmra.mxu1 %vm782_vm0, %v2102_v60 }
 0x7ab   : > { %v2073_v30 = vmul.f32 %v4407_v11, %v2072_v51 }
 0x7ad   : > { %v2077_v8 = vsel %vm2076_vm5, %v4407_v11, %v2073_v30 }
 0x7ae   : > { %v2091_v13 = vmul.f32 %v2077_v8, %v5727_v26 }
 0x7b0   : > { %v2097_v20 = vmul.f32 %v5755_v19, %v2091_v13 }
 0x7b2   : > { %v2103_v50 = vadd.f32 %v5758_v49, %v2097_v20 }
 0x7b4   : > { %4151 = vmatmul.msk.f32.gmra.mxu1 %vm782_vm0, %v2103_v50 }
 0x7da   : > { %v2027_v3 = vpop.xlane.xlu2 %2026 }
 0x7db   : > { %v2032_v55 = vmul.f32 %v2027_v3, %v5039_v43 }
 0x7dd   : > { %v2037_v56 = vadd.f32 1e-05, %v2032_v55 }
 0x7df   : > { %4408 = vrsqrt.f32 %v2037_v56  ;;  %vm2084_vm7 = vweird.f32 %v2037_v56 }
 0x7e5   : > { %v4409_v52 = vpop.eup %4408 }
 0x7e6   : > { %v2079_v36 = vmul.f32 %v4409_v52, %v2037_v56  ;;  %vm2085_vm6 = vweird.f32 %v4409_v52 }
 0x7e7   : > { %vm2086_vm8 = vmor %vm2084_vm7, %vm2085_vm6 }
 0x7e8   : > { %v2080_v45 = vmul.f32 %v4409_v52, %v2079_v36 }
 0x7ea   : > { %v2081_v15 = vmul.f32 0.5, %v2080_v45 }
 0x7ec   : > { %v2082_v32 = vsub.f32 1.5, %v2081_v15 }
 0x7ee   : > { %v2083_v58 = vmul.f32 %v4409_v52, %v2082_v32 }
 0x7f0   : > { %v2087_v26 = vsel %vm2086_vm8, %v4409_v52, %v2083_v58 }
 0x7f1   : > { %v2092_v33 = vmul.f32 %v2087_v26, %v5734_v59  ;;  %v779_v59 = vld [vmem:[%s6725_s5 + $0x68] sm:$0xff] }
 0x7f2   : > { %2225 = vmatpush.msra.mxu2 %v779_v59 }
 0x7f3   : > { %v2098_v25 = vmul.f32 %v5755_v19, %v2092_v33  ;;  %v778_v19 = vld [vmem:[%s6725_s5 + $0x60] sm:$0xff] }
 0x7f4   : > { %2226 = vmatpush.msra.mxu2 %v778_v19 }
 0x7f5   : > { %v2104_v2 = vadd.f32 %v5758_v49, %v2098_v25  ;;  %v774_v49 = vld [vmem:[%s6725_s5 + $0x40] sm:$0xff] }
 0x7f6   : > { %2227 = vmatpush.msra.mxu2 %v777_v22 }
 0x7f7   : > { %4152 = vmatmul.msk.f32.gmra.mxu1 %vm782_vm0, %v2104_v2 }
 0x7f8   : > { %2228 = vmatpush.msra.mxu2 %v776_v0 }
 0x7fa   : > { %2229 = vmatpush.msra.mxu2 %v775_v23 }
 0x7fc   : > { %2230 = vmatpush.msra.mxu2 %v774_v49 }
 0x7fe   : > { %2231 = vmatpush.msra.mxu2 %v773_v21 }
 0x800   : > { %2232 = vmatpush.msra.mxu2 %v772_v27 }
 0x802   : > { %2233 = vmatpush.msra.mxu2 %v771_v17 }
 0x804   : > { %2234 = vmatpush.msra.mxu2 %v770_v18 }
 0x816   : > { %v2143_v24 = vpop.f32.mrf.mxu1 }
 0x817   : > { %v2144_v39 = vadd.f32 %v2143_v24, %v2110_v37 }
 0x819   : > { %v2158_v34 = vmul.f32 %v2144_v39, %v2144_v39 }
 0x81b   : > { %v2163_v48 = vmul.f32 %v2158_v34, %v2144_v39 }
 0x81d   : > { %v2168_v40 = vmul.f32 0.044715, %v2163_v48  ;;  %v2256_v48 = vperm.slane %v5680_v28, 5 }
 0x81e   : > { %v2146_v31 = vpop.f32.mrf.mxu1 }
 0x81f   : > { %v2173_v6 = vadd.f32 %v2168_v40, %v2144_v39  ;;  %v2147_v4 = vadd.f32 %v2146_v31, %v2110_v37 }
 0x821   : > { %v2178_v10 = vmul.f32 0.7978846, %v2173_v6  ;;  %v2159_v29 = vmul.f32 %v2147_v4, %v2147_v4 }
 0x823   : > { %4410 = vtanh.f32 %v2178_v10  ;;  %v2164_v46 = vmul.f32 %v2159_v29, %v2147_v4 }
 0x825   : > { %v2169_v1 = vmul.f32 0.044715, %v2164_v46 }
 0x826   : > { %v2149_v7 = vpop.f32.mrf.mxu1 }
 0x827   : > { %v2174_v11 = vadd.f32 %v2169_v1, %v2147_v4  ;;  %v2150_v16 = vadd.f32 %v2149_v7, %v2110_v37 }
 0x829   : > { %v4411_v57 = vpop.eup %4410  ;;  %v2160_v5 = vmul.f32 %v2150_v16, %v2150_v16  ;;  %v2179_v53 = vmul.f32 0.7978846, %v2174_v11 }
 0x82a   : > { %v2188_v35 = vadd.f32 1.0, %v4411_v57 }
 0x82b   : > { %v2165_v61 = vmul.f32 %v2160_v5, %v2150_v16  ;;  %4412 = vtanh.f32 %v2179_v53 }
 0x82c   : > { %v2193_v60 = vmul.f32 0.5, %v2188_v35 }
 0x82d   : > { %v2170_v51 = vmul.f32 0.044715, %v2165_v61 }
 0x82e   : > { %v2198_v30 = vmul.f32 %v2193_v60, %v2144_v39 }
 0x82f   : > { %v2175_v8 = vadd.f32 %v2170_v51, %v2150_v16 }
 0x830   : > { %4153 = vmatmul.msk.f32.vlgmr.msra.gmra.mxu2 %vm2203_vm9, %v2198_v30 }
 0x831   : > { %v2152_v13 = vpop.f32.mrf.mxu1  ;;  %v4413_v20 = vpop.eup %4412  ;;  %v2180_v3 = vmul.f32 0.7978846, %v2175_v8 }
 0x832   : > { %v2153_v50 = vadd.f32 %v2152_v13, %v2110_v37  ;;  %v2189_v55 = vadd.f32 1.0, %v4413_v20 }
 0x833   : > { %4414 = vtanh.f32 %v2180_v3 }
 0x834   : > { %v2161_v56 = vmul.f32 %v2153_v50, %v2153_v50  ;;  %v2194_v52 = vmul.f32 0.5, %v2189_v55 }
 0x836   : > { %v2166_v36 = vmul.f32 %v2161_v56, %v2153_v50  ;;  %v2199_v45 = vmul.f32 %v2194_v52, %v2147_v4 }
 0x838   : > { %v2171_v15 = vmul.f32 0.044715, %v2166_v36  ;;  %4154 = vmatmul.msk.f32.gmra.mxu2 %vm2203_vm9, %v2199_v45 }
 0x839   : > { %v4415_v32 = vpop.eup %4414 }
 0x83a   : > { %v2176_v58 = vadd.f32 %v2171_v15, %v2153_v50  ;;  %v2190_v26 = vadd.f32 1.0, %v4415_v32 }
 0x83c   : > { %v2181_v33 = vmul.f32 0.7978846, %v2176_v58  ;;  %v2195_v25 = vmul.f32 0.5, %v2190_v26 }
 0x83e   : > { %4416 = vtanh.f32 %v2181_v33  ;;  %v2200_v2 = vmul.f32 %v2195_v25, %v2150_v16 }
 0x840   : > { %4155 = vmatmul.msk.f32.gmra.mxu2 %vm2203_vm9, %v2200_v2 }
 0x844   : > { %v4417_v9 = vpop.eup %4416 }
 0x845   : > { %v2191_v44 = vadd.f32 1.0, %v4417_v9 }
 0x847   : > { %v2196_v59 = vmul.f32 0.5, %v2191_v44 }
 0x849   : > { %v2201_v19 = vmul.f32 %v2196_v59, %v2153_v50  ;;  %v4178_v59 = vld [vmem:[%s6724_s4 + $0x58] sm:$0xff] }
 0x84a   : > { %2435 = vmatpush.msra.mxu3 %v4178_v59 }
 0x84b   : > { %4156 = vmatmul.msk.f32.gmra.mxu2 %vm2203_vm9, %v2201_v19  ;;  %v4177_v19 = vld [vmem:[%s6724_s4 + $0x50] sm:$0xff] }
 0x84c   : > { %2436 = vmatpush.msra.mxu3 %v4177_v19 }
 0x874   : > { %v2155_v22 = vpop.f32.mrf.mxu1 }
 0x875   : > { %v2156_v0 = vadd.f32 %v2155_v22, %v2110_v37  ;;  %v4176_v22 = vld [vmem:[%s6724_s4 + $0x48] sm:$0xff] }
 0x876   : > { %2437 = vmatpush.msra.mxu3 %v4176_v22 }
 0x877   : > { %v2162_v23 = vmul.f32 %v2156_v0, %v2156_v0 }
 0x879   : > { %v2167_v49 = vmul.f32 %v2162_v23, %v2156_v0 }
 0x87b   : > { %v2172_v21 = vmul.f32 0.044715, %v2167_v49 }
 0x87d   : > { %v2177_v27 = vadd.f32 %v2172_v21, %v2156_v0 }
 0x87f   : > { %v2182_v17 = vmul.f32 0.7978846, %v2177_v27 }
 0x881   : > { %4418 = vtanh.f32 %v2182_v17 }
 0x887   : > { %v4419_v18 = vpop.eup %4418 }
 0x888   : > { %v2192_v24 = vadd.f32 1.0, %v4419_v18 }
 0x88a   : > { %v2197_v39 = vmul.f32 0.5, %v2192_v24 }
 0x88c   : > { %v2202_v34 = vmul.f32 %v2197_v39, %v2156_v0  ;;  %v4175_v0 = vld [vmem:[%s6724_s4 + $0x40] sm:$0xff] }
 0x88d   : > { %2438 = vmatpush.msra.mxu3 %v4175_v0 }
 0x88e   : > { %4157 = vmatmul.msk.f32.gmra.mxu2 %vm2203_vm9, %v2202_v34 }
 0x8b3   : > { %v2236_v40 = vpop.f32.mrf.mxu2 }
 0x8b4   : > { %v2251_v31 = vadd.f32 %v2236_v40, %v5684_v38 }
 0x8b6   : > { %v5825_v6 = vadd.f32 %v2256_v48, %v2251_v31 }
 0x8b8   : > { %v2281_v37 = vsel %vm782_vm0, %v5825_v6, 0.0 }
 0x8b9   : > { %2282 = vadd.xlane.f32.xlu0 %v2281_v37  ;;  %v4158_v37 = vld [vmem:[%s6726_s6 + $0x8] sm:$0xff] }
 0x8bb   : > { %v2239_v4 = vpop.f32.mrf.mxu2 }
 0x8bc   : > { %v2252_v10 = vadd.f32 %v2239_v4, %v5689_v47 }
 0x8be   : > { %v5830_v29 = vadd.f32 %v2256_v48, %v2252_v10 }
 0x8c0   : > { %v2284_v46 = vsel %vm782_vm0, %v5830_v29, 0.0 }
 0x8c1   : > { %2285 = vadd.xlane.f32.xlu1 %v2284_v46 }
 0x8c3   : > { %v2242_v1 = vpop.f32.mrf.mxu2 }
 0x8c4   : > { %v2253_v28 = vadd.f32 %v2242_v1, %v5694_v12 }
 0x8c6   : > { %v5835_v7 = vadd.f32 %v2256_v48, %v2253_v28 }
 0x8c8   : > { %v2287_v38 = vsel %vm782_vm0, %v5835_v7, 0.0 }
 0x8c9   : > { %2288 = vadd.xlane.f32.xlu2 %v2287_v38  ;;  %v5902_v38 = vperm.slane %v4158_v37, 0 }
 0x8ce   : > { %v2245_v11 = vpop.f32.mrf.mxu2 }
 0x8cf   : > { %v2254_v16 = vadd.f32 %v2245_v11, %v5699_v54 }
 0x8d1   : > { %v5840_v57 = vadd.f32 %v2256_v48, %v2254_v16 }
 0x8d3   : > { %v2290_v47 = vsel %vm782_vm0, %v5840_v57, 0.0 }
 0x8d4   : > { %2291 = vadd.xlane.f32.xlu0 %v2290_v47 }
 0x911   : > { %v2248_v5 = vpop.f32.mrf.mxu2 }
 0x912   : > { %v2255_v53 = vadd.f32 %v2248_v5, %v5704_v14  ;;  %v5905_v5 = vperm.slane %v4158_v37, 1 }
 0x914   : > { %v5845_v35 = vadd.f32 %v2256_v48, %v2255_v53 }
 0x916   : > { %v2293_v12 = vsel %vm782_vm0, %v5845_v35, 0.0 }
 0x917   : > { %2294 = vadd.xlane.f32.xlu1 %v2293_v12 }
 0x92c   : > { %v2283_v61 = vpop.xlane.xlu0 %2282 }
 0x92d   : > { %v2296_v60 = vmul.f32 %v2283_v61, %v5039_v43 }
 0x92f   : > { %v5851_v54 = vsub.f32 %v5825_v6, %v2296_v60 }
 0x931   : > { %v2306_v51 = vmul.f32 %v5851_v54, %v5851_v54 }
 0x933   : > { %v2311_v30 = vsel %vm782_vm0, %v2306_v51, 0.0 }
 0x934   : > { %v2286_v8 = vpop.xlane.xlu1 %2285  ;;  %2312 = vadd.xlane.f32.xlu2 %v2311_v30 }
 0x935   : > { %v2297_v14 = vmul.f32 %v2286_v8, %v5039_v43 }
 0x937   : > { %v5858_v13 = vsub.f32 %v5830_v29, %v2297_v14 }
 0x939   : > { %v2307_v20 = vmul.f32 %v5858_v13, %v5858_v13 }
 0x93b   : > { %v2314_v50 = vsel %vm782_vm0, %v2307_v20, 0.0 }
 0x93c   : > { %v2289_v3 = vpop.xlane.xlu2 %2288  ;;  %2315 = vadd.xlane.f32.xlu0 %v2314_v50 }
 0x93d   : > { %v2298_v55 = vmul.f32 %v2289_v3, %v5039_v43 }
 0x93f   : > { %v5865_v56 = vsub.f32 %v5835_v7, %v2298_v55 }
 0x941   : > { %v2308_v52 = vmul.f32 %v5865_v56, %v5865_v56 }
 0x943   : > { %v2317_v36 = vsel %vm782_vm0, %v2308_v52, 0.0 }
 0x944   : > { %2318 = vadd.xlane.f32.xlu1 %v2317_v36 }
 0x947   : > { %v2292_v45 = vpop.xlane.xlu0 %2291 }
 0x948   : > { %v2299_v15 = vmul.f32 %v2292_v45, %v5039_v43 }
 0x94a   : > { %v5872_v32 = vsub.f32 %v5840_v57, %v2299_v15 }
 0x94c   : > { %v2309_v58 = vmul.f32 %v5872_v32, %v5872_v32 }
 0x94e   : > { %v2320_v26 = vsel %vm782_vm0, %v2309_v58, 0.0 }
 0x94f   : > { %2321 = vadd.xlane.f32.xlu2 %v2320_v26 }
 0x98a   : > { %v2295_v33 = vpop.xlane.xlu1 %2294 }
 0x98b   : > { %v2300_v25 = vmul.f32 %v2295_v33, %v5039_v43 }
 0x98d   : > { %v5879_v2 = vsub.f32 %v5845_v35, %v2300_v25 }
 0x98f   : > { %v2310_v9 = vmul.f32 %v5879_v2, %v5879_v2 }
 0x991   : > { %v2323_v44 = vsel %vm782_vm0, %v2310_v9, 0.0 }
 0x992   : > { %2324 = vadd.xlane.f32.xlu0 %v2323_v44 }
 0x9a7   : > { %v2313_v23 = vpop.xlane.xlu2 %2312 }
 0x9a8   : > { %v2326_v49 = vmul.f32 %v2313_v23, %v5039_v43 }
 0x9aa   : > { %v2331_v21 = vadd.f32 1e-05, %v2326_v49 }
 0x9ac   : > { %4420 = vrsqrt.f32 %v2331_v21  ;;  %vm2342_vm11 = vweird.f32 %v2331_v21 }
 0x9af   : > { %v2316_v27 = vpop.xlane.xlu0 %2315 }
 0x9b0   : > { %v2327_v17 = vmul.f32 %v2316_v27, %v5039_v43 }
 0x9b2   : > { %v4421_v18 = vpop.eup %4420  ;;  %v2332_v24 = vadd.f32 1e-05, %v2327_v17 }
 0x9b3   : > { %v2337_v39 = vmul.f32 %v4421_v18, %v2331_v21  ;;  %vm2343_vm10 = vweird.f32 %v4421_v18 }
 0x9b4   : > { %4422 = vrsqrt.f32 %v2332_v24  ;;  %vm2344_vm13 = vmor %vm2342_vm11, %vm2343_vm10  ;;  %vm2352_vm15 = vweird.f32 %v2332_v24 }
 0x9b5   : > { %v2338_v34 = vmul.f32 %v4421_v18, %v2337_v39 }
 0x9b7   : > { %v2339_v48 = vmul.f32 0.5, %v2338_v34  ;;  %v2319_v40 = vpop.xlane.xlu1 %2318 }
 0x9b8   : > { %v2328_v31 = vmul.f32 %v2319_v40, %v5039_v43 }
 0x9b9   : > { %v2340_v4 = vsub.f32 1.5, %v2339_v48 }
 0x9ba   : > { %v4423_v10 = vpop.eup %4422  ;;  %v2333_v46 = vadd.f32 1e-05, %v2328_v31 }
 0x9bb   : > { %v2341_v1 = vmul.f32 %v4421_v18, %v2340_v4  ;;  %v2347_v28 = vmul.f32 %v4423_v10, %v2332_v24  ;;  %vm2353_vm14 = vweird.f32 %v4423_v10 }
 0x9bc   : > { %4424 = vrsqrt.f32 %v2333_v46  ;;  %vm2354_vm1 = vmor %vm2352_vm15, %vm2353_vm14  ;;  %vm2362_vm3 = vweird.f32 %v2333_v46 }
 0x9bd   : > { %v2345_v11 = vsel %vm2344_vm13, %v4421_v18, %v2341_v1  ;;  %v2348_v16 = vmul.f32 %v4423_v10, %v2347_v28 }
 0x9be   : > { %v2386_v47 = vmul.f32 %v2345_v11, %v5851_v54 }
 0x9bf   : > { %v2349_v53 = vmul.f32 0.5, %v2348_v16 }
 0x9c0   : > { %v2392_v12 = vmul.f32 %v5902_v38, %v2386_v47 }
 0x9c1   : > { %v2350_v61 = vsub.f32 1.5, %v2349_v53 }
 0x9c2   : > { %v2322_v60 = vpop.xlane.xlu2 %2321  ;;  %v4425_v51 = vpop.eup %4424  ;;  %v2398_v8 = vadd.f32 %v5905_v5, %v2392_v12 }
 0x9c3   : > { %v2329_v30 = vmul.f32 %v2322_v60, %v5039_v43  ;;  %v2351_v14 = vmul.f32 %v4423_v10, %v2350_v61  ;;  %v2357_v20 = vmul.f32 %v4425_v51, %v2333_v46  ;;  %vm2363_vm2 = vweird.f32 %v4425_v51 }
 0x9c4   : > { %4179 = vmatmul.msk.f32.vlgmr.msra.gmra.mxu3 %vm782_vm0, %v2398_v8  ;;  %vm2364_vm4 = vmor %vm2362_vm3, %vm2363_vm2 }
 0x9c5   : > { %v2334_v50 = vadd.f32 1e-05, %v2329_v30  ;;  %v2355_v54 = vsel %vm2354_vm1, %v4423_v10, %v2351_v14  ;;  %v2358_v3 = vmul.f32 %v4425_v51, %v2357_v20 }
 0x9c6   : > { %v2387_v55 = vmul.f32 %v2355_v54, %v5858_v13 }
 0x9c7   : > { %4426 = vrsqrt.f32 %v2334_v50  ;;  %v2359_v52 = vmul.f32 0.5, %v2358_v3  ;;  %vm2372_vm6 = vweird.f32 %v2334_v50 }
 0x9c8   : > { %v2393_v36 = vmul.f32 %v5902_v38, %v2387_v55 }
 0x9c9   : > { %v2360_v45 = vsub.f32 1.5, %v2359_v52 }
 0x9ca   : > { %v2399_v15 = vadd.f32 %v5905_v5, %v2393_v36 }
 0x9cb   : > { %v2361_v58 = vmul.f32 %v4425_v51, %v2360_v45 }
 0x9cc   : > { %4180 = vmatmul.msk.f32.gmra.mxu3 %vm782_vm0, %v2399_v15 }
 0x9cd   : > { %v4427_v26 = vpop.eup %4426  ;;  %v2365_v33 = vsel %vm2364_vm4, %v4425_v51, %v2361_v58 }
 0x9ce   : > { %v2367_v25 = vmul.f32 %v4427_v26, %v2334_v50  ;;  %v2388_v9 = vmul.f32 %v2365_v33, %v5865_v56  ;;  %vm2373_vm5 = vweird.f32 %v4427_v26 }
 0x9cf   : > { %vm2374_vm7 = vmor %vm2372_vm6, %vm2373_vm5 }
 0x9d0   : > { %v2368_v44 = vmul.f32 %v4427_v26, %v2367_v25  ;;  %v2394_v13 = vmul.f32 %v5902_v38, %v2388_v9 }
 0x9d2   : > { %v2369_v59 = vmul.f32 0.5, %v2368_v44  ;;  %v2400_v19 = vadd.f32 %v5905_v5, %v2394_v13 }
 0x9d4   : > { %v2370_v22 = vsub.f32 1.5, %v2369_v59  ;;  %4181 = vmatmul.msk.f32.gmra.mxu3 %vm782_vm0, %v2400_v19 }
 0x9d6   : > { %v2371_v0 = vmul.f32 %v4427_v26, %v2370_v22 }
 0x9d8   : > { %v2375_v23 = vsel %vm2374_vm7, %v4427_v26, %v2371_v0 }
 0x9d9   : > { %v2389_v49 = vmul.f32 %v2375_v23, %v5872_v32 }
 0x9db   : > { %v2395_v21 = vmul.f32 %v5902_v38, %v2389_v49 }
 0x9dd   : > { %v2401_v56 = vadd.f32 %v5905_v5, %v2395_v21 }
 0x9df   : > { %4182 = vmatmul.msk.f32.gmra.mxu3 %vm782_vm0, %v2401_v56 }
 0xa05   : > { %v2325_v27 = vpop.xlane.xlu0 %2324 }
 0xa06   : > { %v2330_v17 = vmul.f32 %v2325_v27, %v5039_v43 }
 0xa08   : > { %v2335_v18 = vadd.f32 1e-05, %v2330_v17 }
 0xa0a   : > { %4428 = vrsqrt.f32 %v2335_v18  ;;  %vm2382_vm10 = vweird.f32 %v2335_v18 }
 0xa10   : > { %v4429_v24 = vpop.eup %4428 }
 0xa11   : > { %v2377_v39 = vmul.f32 %v4429_v24, %v2335_v18  ;;  %vm2383_vm8 = vweird.f32 %v4429_v24 }
 0xa12   : > { %vm2384_vm11 = vmor %vm2382_vm10, %vm2383_vm8 }
 0xa13   : > { %v2378_v34 = vmul.f32 %v4429_v24, %v2377_v39 }
 0xa15   : > { %v2379_v48 = vmul.f32 0.5, %v2378_v34 }
 0xa17   : > { %v2380_v40 = vsub.f32 1.5, %v2379_v48 }
 0xa19   : > { %v2381_v31 = vmul.f32 %v4429_v24, %v2380_v40 }
 0xa1b   : > { %v2385_v32 = vsel %vm2384_vm11, %v4429_v24, %v2381_v31 }
 0xa1c   : > { %v2390_v37 = vmul.f32 %v2385_v32, %v5879_v2 }
 0xa1e   : > { %v2396_v4 = vmul.f32 %v5902_v38, %v2390_v37 }
 0xa20   : > { %v2402_v10 = vadd.f32 %v5905_v5, %v2396_v4 }
 0xa22   : > { %4183 = vmatmul.msk.f32.gmra.mxu3 %vm782_vm0, %v2402_v10 }
 0xa47   : > { %v5928_v46 = vpop.f32.mrf.mxu3 }
 0xa48   : > { %v2455_v30 = vmul.f32 0.35355338, %v5928_v46 }
 0xa4a   : > { %v2460_v8 = vmul.f32 %v5160_v41, %v2455_v30  ;;  %v2729_v14 = vmul.f32 %v5162_v42, %v2455_v30  ;;  %v2958_v25 = vmul.f32 %v5200_v62, %v2455_v30  ;;  %v3187_v9 = vmul.f32 %v5202_v63, %v2455_v30 }
 0xa4f   : > { %v5930_v1 = vpop.f32.mrf.mxu3 }
 0xa50   : > { %v2456_v20 = vmul.f32 0.35355338, %v5930_v1 }
 0xa52   : > { %v2461_v50 = vmul.f32 %v5160_v41, %v2456_v20  ;;  %v2730_v54 = vmul.f32 %v5162_v42, %v2456_v20  ;;  %v2959_v44 = vmul.f32 %v5200_v62, %v2456_v20  ;;  %v3188_v13 = vmul.f32 %v5202_v63, %v2456_v20 }
 0xa57   : > { %v5932_v28 = vpop.f32.mrf.mxu3 }
 0xa58   : > { %2474 = vrot.lane.b32.xlu0 %v5932_v28, %s4547_s21  ;;  %v2457_v3 = vmul.f32 0.35355338, %v5932_v28 }
 0xa5a   : > { %v2462_v55 = vmul.f32 %v5160_v41, %v2457_v3  ;;  %v2731_v52 = vmul.f32 %v5162_v42, %v2457_v3  ;;  %v2960_v59 = vmul.f32 %v5200_v62, %v2457_v3  ;;  %v3189_v19 = vmul.f32 %v5202_v63, %v2457_v3 }
 0xa60   : > { %2470 = vrot.lane.b32.xlu0 %v5928_v46, %s4547_s21 }
 0xa62   : > { %v2449_v11 = vpop.f32.mrf.mxu3 }
 0xa63   : > { %2476 = vrot.lane.b32.xlu2 %v2449_v11, %s4547_s21  ;;  %v2458_v36 = vmul.f32 0.35355338, %v2449_v11 }
 0xa65   : > { %v2463_v45 = vmul.f32 %v5160_v41, %v2458_v36  ;;  %v2732_v15 = vmul.f32 %v5162_v42, %v2458_v36  ;;  %v2961_v22 = vmul.f32 %v5200_v62, %v2458_v36  ;;  %v3190_v0 = vmul.f32 %v5202_v63, %v2458_v36 }
 0xaa5   : > { %v2452_v2 = vpop.f32.mrf.mxu3 }
 0xaa6   : > { %v4298_v38 = vpack.i.bf16 %v2449_v11, %v2452_v2  ;;  %2478 = vrot.lane.b32.xlu1 %v2452_v2, %s4547_s21  ;;  %v2459_v58 = vmul.f32 0.35355338, %v2452_v2 }
 0xaa8   : > { %4299 = vrot.lane.b32.xlu0 %v4298_v38, %s4548_s22  ;;  %v2464_v26 = vmul.f32 %v5160_v41, %v2459_v58  ;;  %v2733_v33 = vmul.f32 %v5162_v42, %v2459_v58  ;;  %v2962_v23 = vmul.f32 %v5200_v62, %v2459_v58  ;;  %v3191_v49 = vmul.f32 %v5202_v63, %v2459_v58 }
 0xaae   : > { %2472 = vrot.lane.b32.xlu1 %v5930_v1, %s4547_s21 }
 0xabd   : > { %v2477_v61 = vpop.permute.xlu2 %2476 }
 0xaca   : > { %v2475_v16 = vpop.permute.xlu0 %2474 }
 0xad2   : > { %v2471_v47 = vpop.permute.xlu0 %2470 }
 0xb18   : > { %v2479_v5 = vpop.permute.xlu1 %2478 }
 0xb19   : > { %4184 = vmatpush.xpose.msk.msrb.mxu0 %vm782_vm0, %v2479_v5  ;;  %4199 = vmatpush.xpose.msk.msrb.mxu2 %vm782_vm0, %v2479_v5 }
 0xb1a   : > { %v4300_v53 = vpop.permute.xlu0 %4299 }
 0xb1b   : > { %v5945_v12 = vunpack.i.l.bf16 %v4300_v53  ;;  %v5947_v60 = vunpack.i.h.bf16 %v4300_v53 }
 0xb1d   : > { %4185 = vmatpush.xpose.msk.msrb.mxu0 %vm782_vm0, %v2477_v61  ;;  %2698 = vmatpush.msrb.mxu1 %v5945_v12 }
 0xb1e   : > { %4200 = vmatpush.xpose.msk.msrb.mxu2 %vm782_vm0, %v2477_v61  ;;  %2927 = vmatpush.msrb.mxu3 %v5945_v12 }
 0xb1f   : > { %2699 = vmatpush.msrb.mxu1 %v5947_v60 }
 0xb20   : > { %2928 = vmatpush.msrb.mxu3 %v5947_v60  ;;  %v2473_v51 = vpop.permute.xlu1 %2472 }
 0xb21   : > { %4186 = vmatpush.xpose.msk.msrb.mxu0 %vm782_vm0, %v2475_v16 }
 0xb22   : > { %4201 = vmatpush.xpose.msk.msrb.mxu2 %vm782_vm0, %v2475_v16 }
 0xb25   : > { %4187 = vmatpush.xpose.msk.msrb.mxu0 %vm782_vm0, %v2473_v51 }
 0xb26   : > { %4202 = vmatpush.xpose.msk.msrb.mxu2 %vm782_vm0, %v2473_v51 }
 0xb29   : > { %4188 = vmatpush.xpose.msk.msrb.mxu0 %vm782_vm0, %v2471_v47 }
 0xb2a   : > { %4203 = vmatpush.xpose.msk.msrb.mxu2 %vm782_vm0, %v2471_v47 }
 0xb2c   : > { %4189 = vmatmul.msk.f32.vlgmr.msrb.gmra.mxu0 %vm782_vm0, %v2460_v8 }
 0xb2d   : > { %4214 = vmatpush.xpose.msk.msra.mxu0 %vm782_vm0, %v2479_v5  ;;  %4204 = vmatmul.msk.f32.vlgmr.msrb.gmra.mxu2 %vm782_vm0, %v2729_v14 }
 0xb2e   : > { %4229 = vmatpush.xpose.msk.msra.mxu2 %vm782_vm0, %v2479_v5 }
 0xb31   : > { %4215 = vmatpush.xpose.msk.msra.mxu0 %vm782_vm0, %v2477_v61 }
 0xb32   : > { %4230 = vmatpush.xpose.msk.msra.mxu2 %vm782_vm0, %v2477_v61 }
 0xb34   : > { %4190 = vmatmul.msk.f32.gmra.mxu0 %vm782_vm0, %v2461_v50 }
 0xb35   : > { %4216 = vmatpush.xpose.msk.msra.mxu0 %vm782_vm0, %v2475_v16  ;;  %4205 = vmatmul.msk.f32.gmra.mxu2 %vm782_vm0, %v2730_v54 }
 0xb36   : > { %4231 = vmatpush.xpose.msk.msra.mxu2 %vm782_vm0, %v2475_v16 }
 0xb39   : > { %4217 = vmatpush.xpose.msk.msra.mxu0 %vm782_vm0, %v2473_v51 }
 0xb3a   : > { %4232 = vmatpush.xpose.msk.msra.mxu2 %vm782_vm0, %v2473_v51 }
 0xb3c   : > { %4191 = vmatmul.msk.f32.gmra.mxu0 %vm782_vm0, %v2462_v55 }
 0xb3d   : > { %4218 = vmatpush.xpose.msk.msra.mxu0 %vm782_vm0, %v2471_v47  ;;  %4206 = vmatmul.msk.f32.gmra.mxu2 %vm782_vm0, %v2731_v52 }
 0xb3e   : > { %4233 = vmatpush.xpose.msk.msra.mxu2 %vm782_vm0, %v2471_v47 }
 0xb44   : > { %4192 = vmatmul.msk.f32.gmra.mxu0 %vm782_vm0, %v2463_v45 }
 0xb45   : > { %4207 = vmatmul.msk.f32.gmra.mxu2 %vm782_vm0, %v2732_v15 }
 0xb4c   : > { %4193 = vmatmul.msk.f32.gmra.mxu0 %vm782_vm0, %v2464_v26 }
 0xb4d   : > { %4208 = vmatmul.msk.f32.gmra.mxu2 %vm782_vm0, %v2733_v33 }
 0xb54   : > { %4219 = vmatmul.msk.f32.vlgmr.msra.gmra.mxu0 %vm782_vm0, %v2958_v25 }
 0xb55   : > { %4234 = vmatmul.msk.f32.vlgmr.msra.gmra.mxu2 %vm782_vm0, %v3187_v9 }
 0xb5c   : > { %4220 = vmatmul.msk.f32.gmra.mxu0 %vm782_vm0, %v2959_v44 }
 0xb5d   : > { %4235 = vmatmul.msk.f32.gmra.mxu2 %vm782_vm0, %v3188_v13 }
 0xb64   : > { %4221 = vmatmul.msk.f32.gmra.mxu0 %vm782_vm0, %v2960_v59 }
 0xb65   : > { %4236 = vmatmul.msk.f32.gmra.mxu2 %vm782_vm0, %v3189_v19 }
 0xb6c   : > { %4222 = vmatmul.msk.f32.gmra.mxu0 %vm782_vm0, %v2961_v22 }
 0xb6d   : > { %4237 = vmatmul.msk.f32.gmra.mxu2 %vm782_vm0, %v3190_v0 }
 0xb74   : > { %4223 = vmatmul.msk.f32.gmra.mxu0 %vm782_vm0, %v2962_v23 }
 0xb75   : > { %4238 = vmatmul.msk.f32.gmra.mxu2 %vm782_vm0, %v3191_v49 }
 0xba9   : > { %v2522_v21 = vpop.f32.mrf.mxu0 }
 0xbaa   : > { %v2537_v56 = vsel %vm1045_vm12, %v2522_v21, -inf }
 0xbab   : > { %2538 = vmax.xlane.f32.xlu1 %v2537_v56 }
 0xbb0   : > { %v2766_v27 = vpop.f32.mrf.mxu2 }
 0xbb1   : > { %v2781_v17 = vsel %vm1045_vm12, %v2766_v27, -inf  ;;  %v2525_v18 = vpop.f32.mrf.mxu0 }
 0xbb2   : > { %2782 = vmax.xlane.f32.xlu2 %v2781_v17  ;;  %v2540_v34 = vsel %vm1045_vm12, %v2525_v18, -inf }
 0xbb8   : > { %v2769_v24 = vpop.f32.mrf.mxu2 }
 0xbb9   : > { %v2784_v39 = vsel %vm1045_vm12, %v2769_v24, -inf  ;;  %v2528_v48 = vpop.f32.mrf.mxu0 }
 0xbba   : > { %2785 = vmax.xlane.f32.xlu0 %v2784_v39  ;;  %2541 = vmax.xlane.f32.xlu2 %v2540_v34  ;;  %v2543_v32 = vsel %vm1045_vm12, %v2528_v48, -inf }
 0xbc0   : > { %v2772_v40 = vpop.f32.mrf.mxu2 }
 0xbc1   : > { %v2787_v31 = vsel %vm1045_vm12, %v2772_v40, -inf  ;;  %v2531_v37 = vpop.f32.mrf.mxu0 }
 0xbc2   : > { %2788 = vmax.xlane.f32.xlu1 %v2787_v31  ;;  %2544 = vmax.xlane.f32.xlu2 %v2543_v32  ;;  %v2546_v11 = vsel %vm1045_vm12, %v2531_v37, -inf }
 0xbc8   : > { %v6020_v4 = vpop.f32.mrf.mxu2 }
 0xbc9   : > { %v2790_v10 = vsel %vm1045_vm12, %v6020_v4, -inf  ;;  %v6025_v2 = vpop.f32.mrf.mxu0 }
 0xbca   : > { %2791 = vmax.xlane.f32.xlu0 %v2790_v10  ;;  %2547 = vmax.xlane.f32.xlu1 %v2546_v11  ;;  %v2549_v47 = vsel %vm1045_vm12, %v6025_v2, -inf }
 0xbd0   : > { %v6027_v38 = vpop.f32.mrf.mxu2 }
 0xbd1   : > { %v2793_v16 = vsel %vm1045_vm12, %v6027_v38, -inf  ;;  %v6033_v5 = vpop.f32.mrf.mxu0 }
 0xbd2   : > { %2794 = vmax.xlane.f32.xlu2 %v2793_v16  ;;  %2550 = vmax.xlane.f32.xlu0 %v2549_v47  ;;  %v3010_v51 = vsel %vm1045_vm12, %v6033_v5, -inf  ;;  %v4303_v16 = vpack.i.bf16 %v5930_v1, %v5932_v28 }
 0xbd8   : > { %v6035_v53 = vpop.f32.mrf.mxu2 }
 0xbd9   : > { %v3239_v61 = vsel %vm1045_vm12, %v6035_v53, -inf }
 0xbda   : > { %3240 = vmax.xlane.f32.xlu1 %v3239_v61  ;;  %3011 = vmax.xlane.f32.xlu2 %v3010_v51 }
 0xc1e   : > { %v2539_v30 = vpop.xlane.xlu1 %2538 }
 0xc1f   : > { %v2552_v8 = vsub.f32 %v2522_v21, %v2539_v30 }
 0xc21   : > { %v2557_v14 = vmul.f32 1.442695, %v2552_v8 }
 0xc23   : > { %4430 = vpow2.f32 %v2557_v14  ;;  %v6084_v14 = vpop.f32.mrf.mxu0 }
 0xc25   : > { %v2783_v20 = vpop.xlane.xlu2 %2782 }
 0xc26   : > { %v2796_v50 = vsub.f32 %v2766_v27, %v2783_v20 }
 0xc28   : > { %v2801_v54 = vmul.f32 1.442695, %v2796_v50 }
 0xc29   : > { %v6041_v3 = vpop.eup %4430 }
 0xc2a   : > { %4432 = vpow2.f32 %v2801_v54  ;;  %v2567_v55 = vsel %vm1045_vm12, %v6041_v3, 0.0 }
 0xc2b   : > { %2568 = vadd.xlane.f32.xlu1 %v2567_v55 }
 0xc2d   : > { %v2542_v52 = vpop.xlane.xlu2 %2541  ;;  %v2786_v36 = vpop.xlane.xlu0 %2785 }
 0xc2e   : > { %v2553_v45 = vsub.f32 %v2525_v18, %v2542_v52  ;;  %v2797_v15 = vsub.f32 %v2769_v24, %v2786_v36 }
 0xc30   : > { %v6045_v58 = vpop.eup %4432  ;;  %v2559_v26 = vmul.f32 1.442695, %v2553_v45  ;;  %v2803_v33 = vmul.f32 1.442695, %v2797_v15  ;;  %v3013_v15 = vsel %vm1045_vm12, %v6084_v14, -inf }
 0xc31   : > { %v2811_v25 = vsel %vm1045_vm12, %v6045_v58, 0.0 }
 0xc32   : > { %4434 = vpow2.f32 %v2559_v26  ;;  %2812 = vadd.xlane.f32.xlu0 %v2811_v25 }
 0xc33   : > { %4436 = vpow2.f32 %v2803_v33 }
 0xc35   : > { %v2789_v9 = vpop.xlane.xlu1 %2788  ;;  %v2545_v44 = vpop.xlane.xlu2 %2544 }
 0xc36   : > { %v2554_v13 = vsub.f32 %v2528_v48, %v2545_v44  ;;  %v2798_v0 = vsub.f32 %v2772_v40, %v2789_v9 }
 0xc38   : > { %v6049_v59 = vpop.eup %4434  ;;  %v2561_v19 = vmul.f32 1.442695, %v2554_v13  ;;  %v2805_v21 = vmul.f32 1.442695, %v2798_v0 }
 0xc39   : > { %v6051_v22 = vpop.eup %4436  ;;  %v2570_v23 = vsel %vm1045_vm12, %v6049_v59, 0.0 }
 0xc3a   : > { %2571 = vadd.xlane.f32.xlu1 %v2570_v23  ;;  %v2814_v49 = vsel %vm1045_vm12, %v6051_v22, 0.0  ;;  %4438 = vpow2.f32 %v2561_v19 }
 0xc3b   : > { %2815 = vadd.xlane.f32.xlu2 %v2814_v49  ;;  %4440 = vpow2.f32 %v2805_v21 }
 0xc3d   : > { %v2792_v56 = vpop.xlane.xlu0 %2791  ;;  %v2548_v27 = vpop.xlane.xlu1 %2547 }
 0xc3e   : > { %v2555_v18 = vsub.f32 %v2531_v37, %v2548_v27  ;;  %v2799_v28 = vsub.f32 %v6020_v4, %v2792_v56 }
 0xc40   : > { %v6057_v17 = vpop.eup %4438  ;;  %v2563_v39 = vmul.f32 1.442695, %v2555_v18  ;;  %v2807_v20 = vmul.f32 1.442695, %v2799_v28 }
 0xc41   : > { %v2573_v24 = vsel %vm1045_vm12, %v6057_v17, 0.0  ;;  %v6063_v48 = vpop.eup %4440 }
 0xc42   : > { %2574 = vadd.xlane.f32.xlu1 %v2573_v24  ;;  %4442 = vpow2.f32 %v2563_v39  ;;  %v2817_v31 = vsel %vm1045_vm12, %v6063_v48, 0.0 }
 0xc45   : > { %v2551_v34 = vpop.xlane.xlu0 %2550  ;;  %v2795_v32 = vpop.xlane.xlu2 %2794 }
 0xc46   : > { %2657 = vrot.lane.b32.xlu0 %v5928_v46, %s4548_s22  ;;  %v2556_v40 = vsub.f32 %v6025_v2, %v2551_v34  ;;  %v2800_v55 = vsub.f32 %v6027_v38, %v2795_v32 }
 0xc48   : > { %v2565_v37 = vmul.f32 1.442695, %v2556_v40  ;;  %v6068_v11 = vpop.eup %4442  ;;  %v2809_v36 = vmul.f32 1.442695, %v2800_v55 }
 0xc49   : > { %v2576_v47 = vsel %vm1045_vm12, %v6068_v11, 0.0 }
 0xc4a   : > { %2818 = vadd.xlane.f32.xlu1 %v2817_v31  ;;  %4444 = vpow2.f32 %v2565_v37 }
 0xc4d   : > { %v3241_v10 = vpop.xlane.xlu1 %3240  ;;  %v3012_v61 = vpop.xlane.xlu2 %3011 }
 0xc4e   : > { %v3254_v46 = vsub.f32 %v6035_v53, %v3241_v10  ;;  %v3025_v30 = vsub.f32 %v6033_v5, %v3012_v61  ;;  %v6090_v5 = vpop.f32.mrf.mxu0 }
 0xc4f   : > { %v3016_v25 = vsel %vm1045_vm12, %v6090_v5, -inf }
 0xc50   : > { %v3259_v2 = vmul.f32 1.442695, %v3254_v46  ;;  %v6076_v51 = vpop.eup %4444  ;;  %v3030_v1 = vmul.f32 1.442695, %v3025_v30 }
 0xc51   : > { %v2579_v8 = vsel %vm1045_vm12, %v6076_v51, 0.0 }
 0xc52   : > { %2577 = vadd.xlane.f32.xlu1 %v2576_v47  ;;  %4446 = vpow2.f32 %v3259_v2 }
 0xc53   : > { %4304 = vrot.lane.b32.xlu2 %v4303_v16, %s4548_s22  ;;  %4448 = vpow2.f32 %v3030_v1 }
 0xc54   : > { %4450 = vpow2.f32 %v2807_v20 }
 0xc55   : > { %4452 = vpow2.f32 %v2809_v36 }
 0xc56   : > { %v6101_v26 = vpop.f32.mrf.mxu0 }
 0xc57   : > { %v3019_v38 = vsel %vm1045_vm12, %v6101_v26, -inf }
 0xc58   : > { %v6082_v53 = vpop.eup %4446 }
 0xc59   : > { %v3269_v50 = vsel %vm1045_vm12, %v6082_v53, 0.0  ;;  %v6088_v54 = vpop.eup %4448 }
 0xc5a   : > { %2580 = vadd.xlane.f32.xlu1 %v2579_v8  ;;  %v3040_v4 = vsel %vm1045_vm12, %v6088_v54, 0.0  ;;  %v6095_v52 = vpop.eup %4450 }
 0xc5b   : > { %v2820_v45 = vsel %vm1045_vm12, %v6095_v52, 0.0  ;;  %v6105_v33 = vpop.eup %4452 }
 0xc5c   : > { %v2823_v9 = vsel %vm1045_vm12, %v6105_v33, 0.0 }
 0xc5e   : > { %v6111_v44 = vpop.f32.mrf.mxu0 }
 0xc5f   : > { %v3022_v13 = vsel %vm1045_vm12, %v6111_v44, -inf }
 0xc62   : > { %3270 = vadd.xlane.f32.xlu1 %v3269_v50 }
 0xc6a   : > { %3041 = vadd.xlane.f32.xlu1 %v3040_v4 }
 0xc70   : > { %2821 = vadd.xlane.f32.xlu0 %v2820_v45 }
 0xc72   : > { %3014 = vmax.xlane.f32.xlu1 %v3013_v15 }
 0xc78   : > { %3020 = vmax.xlane.f32.xlu0 %v3019_v38 }
 0xc7a   : > { %3017 = vmax.xlane.f32.xlu1 %v3016_v25 }
 0xc7c   : > { %2824 = vadd.xlane.f32.xlu2 %v2823_v9 }
 0xc84   : > { %3023 = vmax.xlane.f32.xlu2 %v3022_v13 }
 0xc9e   : > { %v2569_v19 = vpop.xlane.xlu1 %2568 }
 0xc9f   : > { %4454 = vrcp.f32 %v2569_v19  ;;  %v2593_v37 = vand.u32 2147483648, %v2569_v19  ;;  %vm2587_vm15 = vweird.f32 %v2569_v19  ;;  %v2591_v46 = vand.u32 2147483647, %v2569_v19 }
 0xca1   : > { %v2594_v55 = vor.u32 1.1754944e-38, %v2593_v37  ;;  %vm2592_vm4 = vcmp.eq.f32.partialorder %v2591_v46, 8.507059e+37 }
 0xca5   : > { %v4455_v0 = vpop.eup %4454  ;;  %v2813_v23 = vpop.xlane.xlu0 %2812 }
 0xca6   : > { %4456 = vrcp.f32 %v2813_v23  ;;  %v2583_v49 = vmul.f32 %v4455_v0, %v2569_v19  ;;  %vm2588_vm13 = vweird.f32 %v4455_v0  ;;  %v2837_v47 = vand.u32 2147483648, %v2813_v23 }
 0xca7   : > { %vm6127_vm1 = vmor %vm2587_vm15, %vm2588_vm13  ;;  %vm2831_vm2 = vweird.f32 %v2813_v23  ;;  %v2835_v30 = vand.u32 2147483647, %v2813_v23 }
 0xca8   : > { %v2584_v21 = vsub.f32 1.0, %v2583_v49  ;;  %v2838_v45 = vor.u32 1.1754944e-38, %v2837_v47 }
 0xca9   : > { %vm2836_vm5 = vcmp.eq.f32.partialorder %v2835_v30, 8.507059e+37 }
 0xcaa   : > { %v2585_v39 = vmul.f32 %v4455_v0, %v2584_v21 }
 0xcac   : > { %v4457_v56 = vpop.eup %4456  ;;  %v2586_v31 = vadd.f32 %v4455_v0, %v2585_v39 }
 0xcad   : > { %v2827_v27 = vmul.f32 %v4457_v56, %v2813_v23  ;;  %v6115_v18 = vpop.xlane.xlu1 %2571  ;;  %vm2832_vm14 = vweird.f32 %v4457_v56 }
 0xcae   : > { %4458 = vrcp.f32 %v6115_v18  ;;  %v6118_v24 = vpop.xlane.xlu2 %2815  ;;  %v2590_v20 = vsel %vm6127_vm1, %v4455_v0, %v2586_v31  ;;  %vm2833_vm3 = vmor %vm2831_vm2, %vm2832_vm14  ;;  %vm2602_vm7 = vweird.f32 %v6115_v18 }
 0xcaf   : > { %v2828_v34 = vsub.f32 1.0, %v2827_v27  ;;  %4460 = vrcp.f32 %v6118_v24  ;;  %v2595_v25 = vsel %vm2592_vm4, %v2594_v55, %v2590_v20  ;;  %v2608_v27 = vand.u32 2147483648, %v6115_v18 }
 0xcb0   : > { %v2596_v21 = vmul.f32 %v6041_v3, %v2595_v25  ;;  %v2852_v39 = vand.u32 2147483648, %v6118_v24  ;;  %vm2846_vm11 = vweird.f32 %v6118_v24  ;;  %v2850_v3 = vand.u32 2147483647, %v6118_v24 }
 0xcb1   : > { %v2829_v40 = vmul.f32 %v4457_v56, %v2828_v34  ;;  %v2609_v47 = vor.u32 1.1754944e-38, %v2608_v27 }
 0xcb2   : > { %vm2851_vm15 = vcmp.eq.f32.partialorder %v2850_v3, 8.507059e+37 }
 0xcb3   : > { %v2830_v10 = vadd.f32 %v4457_v56, %v2829_v40 }
 0xcb4   : > { %v6121_v32 = vpop.eup %4458 }
 0xcb5   : > { %v6123_v16 = vpop.eup %4460  ;;  %v2598_v2 = vmul.f32 %v6121_v32, %v6115_v18  ;;  %v6133_v1 = vpop.xlane.xlu1 %2574  ;;  %v2834_v4 = vsel %vm2833_vm3, %v4457_v56, %v2830_v10  ;;  %vm2603_vm6 = vweird.f32 %v6121_v32  ;;  %v2606_v56 = vand.u32 2147483647, %v6115_v18 }
 0xcb6   : > { %v2842_v8 = vmul.f32 %v6123_v16, %v6118_v24  ;;  %v4305_v28 = vpop.permute.xlu2 %4304  ;;  %4462 = vrcp.f32 %v6133_v1  ;;  %v2839_v13 = vsel %vm2836_vm5, %v2838_v45, %v2834_v4  ;;  %vm2847_vm8 = vweird.f32 %v6123_v16  ;;  %vm6154_vm10 = vmor %vm2602_vm7, %vm2603_vm6 }
 0xcb7   : > { %v2599_v50 = vsub.f32 1.0, %v2598_v2  ;;  %v4306_v38 = vunpack.i.l.bf16 %v4305_v28  ;;  %v4307_v19 = vunpack.i.h.bf16 %v4305_v28  ;;  %v2840_v34 = vmul.f32 %v6045_v58, %v2839_v13  ;;  %vm6164_vm13 = vmor %vm2846_vm11, %vm2847_vm8 }
 0xcb8   : > { %v2843_v36 = vsub.f32 1.0, %v2842_v8  ;;  %v2658_v18 = vpop.permute.xlu0 %2657  ;;  %v2853_v2 = vor.u32 1.1754944e-38, %v2852_v39  ;;  %vm2607_vm14 = vcmp.eq.f32.partialorder %v2606_v56, 8.507059e+37  ;;  %vm2617_vm2 = vweird.f32 %v6133_v1 }
 0xcb9   : > { %v2600_v15 = vmul.f32 %v6121_v32, %v2599_v50  ;;  %2700 = vmatpush.msrb.mxu1 %v4306_v38  ;;  %2929 = vmatpush.msrb.mxu3 %v4306_v38  ;;  %v2623_v28 = vand.u32 2147483648, %v6133_v1 }
 0xcba   : > { %v2844_v9 = vmul.f32 %v6123_v16, %v2843_v36 }
 0xcbb   : > { %v2601_v0 = vadd.f32 %v6121_v32, %v2600_v15  ;;  %2701 = vmatpush.msrb.mxu1 %v4307_v19  ;;  %2930 = vmatpush.msrb.mxu3 %v4307_v19  ;;  %v2624_v45 = vor.u32 1.1754944e-38, %v2623_v28 }
 0xcbc   : > { %v2845_v23 = vadd.f32 %v6123_v16, %v2844_v9  ;;  %v6145_v49 = vpop.eup %4462 }
 0xcbd   : > { %v2613_v31 = vmul.f32 %v6145_v49, %v6133_v1  ;;  %v2819_v37 = vpop.xlane.xlu1 %2818  ;;  %2702 = vmatpush.msrb.mxu1 %v2658_v18  ;;  %2931 = vmatpush.msrb.mxu3 %v2658_v18  ;;  %v2605_v24 = vsel %vm6154_vm10, %v6121_v32, %v2601_v0  ;;  %vm2618_vm1 = vweird.f32 %v6145_v49 }
 0xcbe   : > { %4464 = vrcp.f32 %v2819_v37  ;;  %4194 = vmatmul.msk.f32.vlgmr.msrb.gmra.mxu1 %vm1045_vm12, %v2596_v21  ;;  %4209 = vmatmul.msk.f32.vlgmr.msrb.gmra.mxu3 %vm1045_vm12, %v2840_v34  ;;  %v2849_v46 = vsel %vm6164_vm13, %v6123_v16, %v2845_v23  ;;  %v2610_v30 = vsel %vm2607_vm14, %v2609_v47, %v2605_v24  ;;  %vm6188_vm3 = vmor %vm2617_vm2, %vm2618_vm1  ;;  %v2865_v15 = vand.u32 2147483647, %v2819_v37 }
 0xcbf   : > { %v2614_v58 = vsub.f32 1.0, %v2613_v31  ;;  %3156 = vmatpush.msra.mxu1 %v5945_v12  ;;  %3385 = vmatpush.msra.mxu3 %v5945_v12  ;;  %v2854_v32 = vsel %vm2851_vm15, %v2853_v2, %v2849_v46  ;;  %v2621_v12 = vand.u32 2147483647, %v6133_v1  ;;  %v2611_v55 = vmul.f32 %v6049_v59, %v2610_v30 }
 0xcc0   : > { %vm2861_vm6 = vweird.f32 %v2819_v37  ;;  %vm2866_vm8 = vcmp.eq.f32.partialorder %v2865_v15, 8.507059e+37 }
 0xcc1   : > { %v2615_v61 = vmul.f32 %v6145_v49, %v2614_v58  ;;  %3157 = vmatpush.msra.mxu1 %v5947_v60  ;;  %3386 = vmatpush.msra.mxu3 %v5947_v60  ;;  %v2855_v60 = vmul.f32 %v6051_v22, %v2854_v32  ;;  %vm2622_vm4 = vcmp.eq.f32.partialorder %v2621_v12, 8.507059e+37  ;;  %v2867_v22 = vand.u32 2147483648, %v2819_v37 }
 0xcc3   : > { %v2616_v8 = vadd.f32 %v6145_v49, %v2615_v61  ;;  %3158 = vmatpush.msra.mxu1 %v4306_v38  ;;  %3387 = vmatpush.msra.mxu3 %v4306_v38  ;;  %v2868_v13 = vor.u32 1.1754944e-38, %v2867_v22 }
 0xcc4   : > { %v4465_v16 = vpop.eup %4464 }
 0xcc5   : > { %v2857_v20 = vmul.f32 %v4465_v16, %v2819_v37  ;;  %v2578_v50 = vpop.xlane.xlu1 %2577  ;;  %3159 = vmatpush.msra.mxu1 %v4307_v19  ;;  %3388 = vmatpush.msra.mxu3 %v4307_v19  ;;  %v2620_v1 = vsel %vm6188_vm3, %v6145_v49, %v2616_v8  ;;  %vm2862_vm5 = vweird.f32 %v4465_v16 }
 0xcc6   : > { %4466 = vrcp.f32 %v2578_v50  ;;  %4195 = vmatmul.msk.f32.gmra.mxu1 %vm1045_vm12, %v2611_v55  ;;  %4210 = vmatmul.msk.f32.gmra.mxu3 %vm1045_vm12, %v2855_v60  ;;  %v2625_v38 = vsel %vm2622_vm4, %v2624_v45, %v2620_v1  ;;  %vm2863_vm7 = vmor %vm2861_vm6, %vm2862_vm5  ;;  %v2638_v34 = vand.u32 2147483648, %v2578_v50  ;;  %v2636_v40 = vand.u32 2147483647, %v2578_v50 }
 0xcc7   : > { %v2858_v36 = vsub.f32 1.0, %v2857_v20  ;;  %3160 = vmatpush.msra.mxu1 %v2658_v18  ;;  %3389 = vmatpush.msra.mxu3 %v2658_v18  ;;  %v2626_v23 = vmul.f32 %v6057_v17, %v2625_v38  ;;  %vm2632_vm11 = vweird.f32 %v2578_v50 }
 0xcc8   : > { %v2639_v17 = vor.u32 1.1754944e-38, %v2638_v34  ;;  %vm2637_vm14 = vcmp.eq.f32.partialorder %v2636_v40, 8.507059e+37 }
 0xcc9   : > { %v2859_v59 = vmul.f32 %v4465_v16, %v2858_v36 }
 0xccb   : > { %v2860_v25 = vadd.f32 %v4465_v16, %v2859_v59 }
 0xccc   : > { %v4467_v9 = vpop.eup %4466 }
 0xccd   : > { %v2628_v19 = vmul.f32 %v4467_v9, %v2578_v50  ;;  %v2581_v0 = vpop.xlane.xlu1 %2580  ;;  %v2864_v21 = vsel %vm2863_vm7, %v4465_v16, %v2860_v25  ;;  %vm2633_vm10 = vweird.f32 %v4467_v9 }
 0xcce   : > { %4468 = vrcp.f32 %v2581_v0  ;;  %4196 = vmatmul.msk.f32.gmra.mxu1 %vm1045_vm12, %v2626_v23  ;;  %v2869_v56 = vsel %vm2866_vm8, %v2868_v13, %v2864_v21  ;;  %vm2634_vm13 = vmor %vm2632_vm11, %vm2633_vm10  ;;  %v2653_v47 = vand.u32 2147483648, %v2581_v0  ;;  %v2651_v2 = vand.u32 2147483647, %v2581_v0 }
 0xccf   : > { %v2629_v49 = vsub.f32 1.0, %v2628_v19  ;;  %v2870_v27 = vmul.f32 %v6063_v48, %v2869_v56  ;;  %vm2647_vm1 = vweird.f32 %v2581_v0 }
 0xcd0   : > { %v2654_v30 = vor.u32 1.1754944e-38, %v2653_v47  ;;  %vm2652_vm3 = vcmp.eq.f32.partialorder %v2651_v2, 8.507059e+37 }
 0xcd1   : > { %v2630_v39 = vmul.f32 %v4467_v9, %v2629_v49  ;;  %4211 = vmatmul.msk.f32.gmra.mxu3 %vm1045_vm12, %v2870_v27 }
 0xcd3   : > { %v2631_v3 = vadd.f32 %v4467_v9, %v2630_v39 }
 0xcd4   : > { %v4469_v31 = vpop.eup %4468 }
 0xcd5   : > { %v2643_v18 = vmul.f32 %v4469_v31, %v2581_v0  ;;  %v6201_v37 = vpop.xlane.xlu1 %3270  ;;  %v2635_v10 = vsel %vm2634_vm13, %v4467_v9, %v2631_v3  ;;  %vm2648_vm15 = vweird.f32 %v4469_v31 }
 0xcd6   : > { %v2640_v24 = vsel %vm2637_vm14, %v2639_v17, %v2635_v10  ;;  %vm2649_vm2 = vmor %vm2647_vm1, %vm2648_vm15 }
 0xcd7   : > { %v2644_v58 = vsub.f32 1.0, %v2643_v18  ;;  %v2641_v48 = vmul.f32 %v6068_v11, %v2640_v24 }
 0xcd9   : > { %v2645_v46 = vmul.f32 %v4469_v31, %v2644_v58  ;;  %4197 = vmatmul.msk.f32.gmra.mxu1 %vm1045_vm12, %v2641_v48 }
 0xcdb   : > { %v2646_v61 = vadd.f32 %v4469_v31, %v2645_v46 }
 0xcdd   : > { %v3042_v32 = vpop.xlane.xlu1 %3041  ;;  %v2650_v8 = vsel %vm2649_vm2, %v4469_v31, %v2646_v61 }
 0xcde   : > { %4470 = vrcp.f32 %v3042_v32  ;;  %v2655_v16 = vsel %vm2652_vm3, %v2654_v30, %v2650_v8  ;;  %v3066_v4 = vand.u32 2147483648, %v3042_v32  ;;  %v3064_v59 = vand.u32 2147483647, %v3042_v32 }
 0xcdf   : > { %v2656_v28 = vmul.f32 %v6076_v51, %v2655_v16  ;;  %vm3060_vm5 = vweird.f32 %v3042_v32 }
 0xce0   : > { %v3067_v15 = vor.u32 1.1754944e-38, %v3066_v4  ;;  %vm3065_vm7 = vcmp.eq.f32.partialorder %v3064_v59, 8.507059e+37  ;;  %v3293_v4 = vand.u32 2147483647, %v6201_v37 }
 0xce1   : > { %4198 = vmatmul.msk.f32.gmra.mxu1 %vm1045_vm12, %v2656_v28 }
 0xce3   : > { %v2822_v11 = vpop.xlane.xlu0 %2821 }
 0xce4   : > { %4472 = vrcp.f32 %v2822_v11  ;;  %v4471_v12 = vpop.eup %4470  ;;  %v2880_v9 = vand.u32 2147483647, %v2822_v11  ;;  %vm2876_vm10 = vweird.f32 %v2822_v11 }
 0xce5   : > { %v3056_v20 = vmul.f32 %v4471_v12, %v3042_v32  ;;  %v3015_v50 = vpop.xlane.xlu1 %3014  ;;  %4474 = vrcp.f32 %v6201_v37  ;;  %vm3061_vm4 = vweird.f32 %v4471_v12 }
 0xce6   : > { %v3026_v55 = vsub.f32 %v6084_v14, %v3015_v50  ;;  %vm3062_vm6 = vmor %vm3060_vm5, %vm3061_vm4  ;;  %v2882_v14 = vand.u32 2147483648, %v2822_v11  ;;  %vm2881_vm13 = vcmp.eq.f32.partialorder %v2880_v9, 8.507059e+37  ;;  %v3295_v50 = vand.u32 2147483648, %v6201_v37 }
 0xce7   : > { %v3057_v60 = vsub.f32 1.0, %v3056_v20  ;;  %vm3289_vm4 = vweird.f32 %v6201_v37 }
 0xce8   : > { %v3032_v36 = vmul.f32 1.442695, %v3026_v55  ;;  %v2883_v40 = vor.u32 1.1754944e-38, %v2882_v14  ;;  %v3296_v59 = vor.u32 1.1754944e-38, %v3295_v50 }
 0xce9   : > { %v3058_v45 = vmul.f32 %v4471_v12, %v3057_v60 }
 0xcea   : > { %v4473_v1 = vpop.eup %4472  ;;  %4476 = vpow2.f32 %v3032_v36 }
 0xceb   : > { %v2872_v22 = vmul.f32 %v4473_v1, %v2822_v11  ;;  %v3059_v51 = vadd.f32 %v4471_v12, %v3058_v45  ;;  %vm2877_vm8 = vweird.f32 %v4473_v1  ;;  %v4475_v49 = vpop.eup %4474 }
 0xcec   : > { %vm2878_vm11 = vmor %vm2876_vm10, %vm2877_vm8  ;;  %v3285_v31 = vmul.f32 %v4475_v49, %v6201_v37  ;;  %vm3290_vm2 = vweird.f32 %v4475_v49 }
 0xced   : > { %v2873_v38 = vsub.f32 1.0, %v2872_v22  ;;  %v3063_v25 = vsel %vm3062_vm6, %v4471_v12, %v3059_v51  ;;  %v3018_v13 = vpop.xlane.xlu1 %3017  ;;  %vm3291_vm5 = vmor %vm3289_vm4, %vm3290_vm2  ;;  %vm3294_vm6 = vcmp.eq.f32.partialorder %v3293_v4, 8.507059e+37 }
 0xcee   : > { %v3068_v19 = vsel %vm3065_vm7, %v3067_v15, %v3063_v25  ;;  %v3027_v23 = vsub.f32 %v6090_v5, %v3018_v13  ;;  %v3286_v58 = vsub.f32 1.0, %v3285_v31 }
 0xcef   : > { %v2874_v0 = vmul.f32 %v4473_v1, %v2873_v38  ;;  %v2825_v21 = vpop.xlane.xlu2 %2824  ;;  %v3069_v56 = vmul.f32 %v6088_v54, %v3068_v19  ;;  %v6217_v54 = vpop.f32.mrf.mxu2 }
 0xcf0   : > { %v6211_v27 = vpop.eup %4476  ;;  %v3034_v34 = vmul.f32 1.442695, %v3027_v23  ;;  %4478 = vrcp.f32 %v2825_v21  ;;  %v3287_v32 = vmul.f32 %v4475_v49, %v3286_v58  ;;  %v2897_v8 = vand.u32 2147483648, %v2825_v21 }
 0xcf1   : > { %v2875_v39 = vadd.f32 %v4473_v1, %v2874_v0  ;;  %4224 = vmatmul.msk.f32.vlgmr.msra.gmra.mxu1 %vm1045_vm12, %v3069_v56  ;;  %v3043_v3 = vsel %vm1045_vm12, %v6211_v27, 0.0  ;;  %vm2891_vm15 = vweird.f32 %v2825_v21  ;;  %v6255_v56 = vpop.xlane.xlu0 %3020 }
 0xcf2   : > { %4480 = vpow2.f32 %v3034_v34  ;;  %3044 = vadd.xlane.f32.xlu0 %v3043_v3  ;;  %v3288_v12 = vadd.f32 %v4475_v49, %v3287_v32 }
 0xcf3   : > { %v2879_v5 = vsel %vm2878_vm11, %v4473_v1, %v2875_v39  ;;  %v4162_v39 = vld [vmem:[%s6725_s5 + $0x98] sm:$0xff] }
 0xcf4   : > { %v2884_v17 = vsel %vm2881_vm13, %v2883_v40, %v2879_v5  ;;  %v3292_v45 = vsel %vm3291_vm5, %v4475_v49, %v3288_v12  ;;  %3443 = vmatpush.msrb.mxu0 %v4162_v39  ;;  %v4161_v40 = vld [vmem:[%s6725_s5 + $0x90] sm:$0xff] }
 0xcf5   : > { %v2885_v18 = vmul.f32 %v6095_v52, %v2884_v17  ;;  %v2895_v52 = vand.u32 2147483647, %v2825_v21  ;;  %v3297_v22 = vsel %vm3294_vm6, %v3296_v59, %v3292_v45 }
 0xcf6   : > { %v4479_v10 = vpop.eup %4478  ;;  %v3298_v15 = vmul.f32 %v6082_v53, %v3297_v22  ;;  %3444 = vmatpush.msrb.mxu0 %v4161_v40 }
 0xcf7   : > { %v3024_v24 = vpop.xlane.xlu2 %3023  ;;  %4212 = vmatmul.msk.f32.gmra.mxu3 %vm1045_vm12, %v2885_v18  ;;  %v2887_v48 = vmul.f32 %v4479_v10, %v2825_v21  ;;  %vm2892_vm14 = vweird.f32 %v4479_v10  ;;  %v6226_v28 = vpop.f32.mrf.mxu2  ;;  %vm2896_vm3 = vcmp.eq.f32.partialorder %v2895_v52, 8.507059e+37 }
 0xcf8   : > { %v3029_v46 = vsub.f32 %v6111_v44, %v3024_v24  ;;  %v6222_v47 = vpop.eup %4480  ;;  %vm2893_vm1 = vmor %vm2891_vm15, %vm2892_vm14  ;;  %v2898_v44 = vor.u32 1.1754944e-38, %v2897_v8  ;;  %v4160_v24 = vld [vmem:[%s6725_s5 + $0x88] sm:$0xff] }
 0xcf9   : > { %v2888_v2 = vsub.f32 1.0, %v2887_v48  ;;  %v3046_v30 = vsel %vm1045_vm12, %v6222_v47, 0.0  ;;  %v4159_v48 = vld [vmem:[%s6725_s5 + $0x80] sm:$0xff]  ;;  %3445 = vmatpush.msrb.mxu0 %v4160_v24 }
 0xcfa   : > { %v3038_v61 = vmul.f32 1.442695, %v3029_v46  ;;  %3047 = vadd.xlane.f32.xlu2 %v3046_v30 }
 0xcfb   : > { %v2889_v16 = vmul.f32 %v4479_v10, %v2888_v2  ;;  %3446 = vmatpush.msrb.mxu0 %v4159_v48 }
 0xcfc   : > { %4482 = vpow2.f32 %v3038_v61 }
 0xcfd   : > { %v2890_v11 = vadd.f32 %v4479_v10, %v2889_v16 }
 0xcff   : > { %v2894_v20 = vsel %vm2893_vm1, %v4479_v10, %v2890_v11  ;;  %v6237_v51 = vpop.f32.mrf.mxu2 }
 0xd00   : > { %v2899_v55 = vsel %vm2896_vm3, %v2898_v44, %v2894_v20  ;;  %v3248_v37 = vsel %vm1045_vm12, %v6237_v51, -inf }
 0xd01   : > { %v2900_v36 = vmul.f32 %v6105_v33, %v2899_v55 }
 0xd02   : > { %v6229_v60 = vpop.eup %4482 }
 0xd03   : > { %v3052_v1 = vsel %vm1045_vm12, %v6229_v60, 0.0  ;;  %4213 = vmatmul.msk.f32.gmra.mxu3 %vm1045_vm12, %v2900_v36 }
 0xd04   : > { %3053 = vadd.xlane.f32.xlu2 %v3052_v1 }
 0xd07   : > { %v3236_v48 = vpop.f32.mrf.mxu2 }
 0xd0b   : > { %4239 = vmatmul.msk.f32.vlgmr.msra.gmra.mxu3 %vm1045_vm12, %v3298_v15 }
 0xd0c   : > { %3249 = vmax.xlane.f32.xlu2 %v3248_v37 }
 0xd3b   : > { %v6243_v33 = vpop.f32.mrf.mxu1 }
 0xd41   : > { %v6245_v38 = vpop.f32.mrf.mxu3 }
 0xd43   : > { %v2707_v25 = vpop.f32.mrf.mxu1 }
 0xd44   : > { %v2720_v14 = vmul.f32 %v5160_v41, %v2707_v25 }
 0xd49   : > { %v2936_v9 = vpop.f32.mrf.mxu3 }
 0xd4a   : > { %v2949_v13 = vmul.f32 %v5162_v42, %v2936_v9 }
 0xd4b   : > { %v2710_v0 = vpop.f32.mrf.mxu1 }
 0xd4c   : > { %v6249_v19 = vadd.f32 %v2949_v13, %v2720_v14  ;;  %v2721_v23 = vmul.f32 %v5160_v41, %v2710_v0  ;;  %v2948_v13 = vmul.f32 %v5162_v42, %v6245_v38 }
 0xd54   : > { %v2939_v53 = vpop.f32.mrf.mxu3 }
 0xd55   : > { %v2950_v21 = vmul.f32 %v5162_v42, %v2939_v53  ;;  %v2719_v53 = vmul.f32 %v5160_v41, %v6243_v33 }
 0xd56   : > { %v2713_v8 = vpop.f32.mrf.mxu1 }
 0xd57   : > { %v6253_v49 = vadd.f32 %v2950_v21, %v2721_v23  ;;  %v2722_v55 = vmul.f32 %v5160_v41, %v2713_v8 }
 0xd5e   : > { %v2716_v15 = vpop.f32.mrf.mxu1 }
 0xd5f   : > { %v2723_v25 = vmul.f32 %v5160_v41, %v2716_v15 }
 0xd65   : > { %v3045_v34 = vpop.xlane.xlu0 %3044 }
 0xd66   : > { %4484 = vrcp.f32 %v3045_v34  ;;  %v3081_v18 = vand.u32 2147483648, %v3045_v34  ;;  %v3079_v58 = vand.u32 2147483647, %v3045_v34  ;;  %vm3075_vm8 = vweird.f32 %v3045_v34 }
 0xd68   : > { %v3082_v61 = vor.u32 1.1754944e-38, %v3081_v18  ;;  %vm3080_vm11 = vcmp.eq.f32.partialorder %v3079_v58, 8.507059e+37 }
 0xd6c   : > { %v4485_v3 = vpop.eup %4484 }
 0xd6d   : > { %v3071_v31 = vmul.f32 %v4485_v3, %v3045_v34  ;;  %v3048_v5 = vpop.xlane.xlu2 %3047  ;;  %vm3076_vm7 = vweird.f32 %v4485_v3 }
 0xd6e   : > { %4486 = vrcp.f32 %v3048_v5  ;;  %vm3077_vm10 = vmor %vm3075_vm8, %vm3076_vm7  ;;  %v3096_v11 = vand.u32 2147483648, %v3048_v5  ;;  %v3094_v20 = vand.u32 2147483647, %v3048_v5  ;;  %vm3090_vm14 = vweird.f32 %v3048_v5  ;;  %v3162_v14 = vpop.f32.mrf.mxu1 }
 0xd6f   : > { %v3072_v17 = vsub.f32 1.0, %v3071_v31  ;;  %v3177_v23 = vmul.f32 %v5200_v62, %v3162_v14 }
 0xd70   : > { %v3097_v1 = vor.u32 1.1754944e-38, %v3096_v11  ;;  %vm3095_vm1 = vcmp.eq.f32.partialorder %v3094_v20, 8.507059e+37  ;;  %v3245_v20 = vsel %vm1045_vm12, %v6226_v28, -inf }
 0xd71   : > { %v3073_v10 = vmul.f32 %v4485_v3, %v3072_v17 }
 0xd73   : > { %v3074_v46 = vadd.f32 %v4485_v3, %v3073_v10 }
 0xd74   : > { %v4487_v2 = vpop.eup %4486 }
 0xd75   : > { %v3086_v30 = vmul.f32 %v4487_v2, %v3048_v5  ;;  %v3078_v32 = vsel %vm3077_vm10, %v4485_v3, %v3074_v46  ;;  %vm3091_vm13 = vweird.f32 %v4487_v2  ;;  %v3028_v3 = vsub.f32 %v6101_v26, %v6255_v56 }
 0xd76   : > { %v3083_v16 = vsel %vm3080_vm11, %v3082_v61, %v3078_v32  ;;  %vm3092_vm15 = vmor %vm3090_vm14, %vm3091_vm13  ;;  %v3251_v46 = vsel %vm1045_vm12, %v3236_v48, -inf }
 0xd77   : > { %v3087_v52 = vsub.f32 1.0, %v3086_v30  ;;  %v3084_v44 = vmul.f32 %v6211_v27, %v3083_v16  ;;  %v3036_v33 = vmul.f32 1.442695, %v3028_v3  ;;  %v6304_v26 = vpop.xlane.xlu2 %3053 }
 0xd78   : > { %vm3120_vm7 = vweird.f32 %v6304_v26 }
 0xd79   : > { %v3088_v12 = vmul.f32 %v4487_v2, %v3087_v52  ;;  %4225 = vmatmul.msk.f32.gmra.mxu1 %vm1045_vm12, %v3084_v44  ;;  %4488 = vpow2.f32 %v3036_v33 }
 0xd7a   : > { %v2942_v50 = vpop.f32.mrf.mxu3 }
 0xd7b   : > { %v2951_v4 = vmul.f32 %v5162_v42, %v2942_v50  ;;  %v3089_v36 = vadd.f32 %v4487_v2, %v3088_v12 }
 0xd7d   : > { %v6273_v45 = vadd.f32 %v2951_v4, %v2722_v55  ;;  %v3093_v59 = vsel %vm3092_vm15, %v4487_v2, %v3089_v36 }
 0xd7e   : > { %v3098_v22 = vsel %vm3095_vm1, %v3097_v1, %v3093_v59 }
 0xd7f   : > { %v3099_v27 = vmul.f32 %v6222_v47, %v3098_v22  ;;  %v2953_v47 = vadd.f32 %v2948_v13, %v2719_v53  ;;  %v4489_v56 = vpop.eup %4488  ;;  %v3250_v10 = vpop.xlane.xlu2 %3249 }
 0xd80   : > { %v3049_v18 = vsel %vm1045_vm12, %v4489_v56, 0.0  ;;  %v3257_v58 = vsub.f32 %v6237_v51, %v3250_v10  ;;  %v4251_v10 = vld [vmem:[%s6724_s4 + $0x70] sm:$0xff] }
 0xd81   : > { %4226 = vmatmul.msk.f32.gmra.mxu1 %vm1045_vm12, %v3099_v27  ;;  %v3182_v39 = vadd.f32 %v3177_v23, %v2953_v47  ;;  %v3126_v23 = vand.u32 2147483648, %v6304_v26 }
 0xd82   : > { %v3265_v24 = vmul.f32 1.442695, %v3257_v58  ;;  %v4249_v58 = vld [vmem:[%s6724_s4 + $0x60] sm:$0xff] }
 0xd84   : > { %4490 = vpow2.f32 %v3265_v24 }
 0xd85   : > { %4492 = vrcp.f32 %v6304_v26 }
 0xd86   : > { %v2945_v37 = vpop.f32.mrf.mxu3 }
 0xd87   : > { %v2952_v9 = vmul.f32 %v5162_v42, %v2945_v37  ;;  %v6293_v42 = vld [vmem:[%s6726_s6 + $0x8] sm:$0xff] }
 0xd88   : > { %v6296_v41 = vperm.slane %v6293_v42, 4 }
 0xd89   : > { %v6281_v0 = vadd.f32 %v2952_v9, %v2723_v25 }
 0xd8a   : > { %v6311_v2 = vpop.eup %4490 }
 0xd8b   : > { %v3278_v61 = vsel %vm1045_vm12, %v6311_v2, 0.0  ;;  %v4493_v11 = vpop.eup %4492 }
 0xd8c   : > { %v3116_v44 = vmul.f32 %v4493_v11, %v6304_v26  ;;  %vm3121_vm5 = vweird.f32 %v4493_v11 }
 0xd8d   : > { %vm3122_vm8 = vmor %vm3120_vm7, %vm3121_vm5 }
 0xd8e   : > { %v3391_v21 = vpop.f32.mrf.mxu3  ;;  %v3117_v50 = vsub.f32 1.0, %v3116_v44 }
 0xd8f   : > { %v3406_v34 = vmul.f32 %v5202_v63, %v3391_v21  ;;  %v3124_v21 = vand.u32 2147483647, %v6304_v26 }
 0xd90   : > { %v3118_v27 = vmul.f32 %v4493_v11, %v3117_v50 }
 0xd91   : > { %v3411_v40 = vadd.f32 %v3406_v34, %v3182_v39  ;;  %vm3125_vm10 = vcmp.eq.f32.partialorder %v3124_v21, 8.507059e+37 }
 0xd92   : > { %v3119_v14 = vadd.f32 %v4493_v11, %v3118_v27 }
 0xd93   : > { %4244 = vmatmul.msk.f32.vlgmr.msrb.gmra.mxu0 %vm782_vm0, %v3411_v40 }
 0xd94   : > { %v3123_v33 = vsel %vm3122_vm8, %v4493_v11, %v3119_v14 }
 0xe10   : > { %v3448_v38 = vpop.f32.mrf.mxu0 }
 0xe11   : > { %v3463_v31 = vadd.f32 %v3448_v38, %v5825_v6  ;;  %v3242_v6 = vsel %vm1045_vm12, %v6217_v54, -inf  ;;  %v3127_v38 = vor.u32 1.1754944e-38, %v3126_v23 }
 0xe13   : > { %v6300_v5 = vadd.f32 %v6296_v41, %v3463_v31  ;;  %v3128_v31 = vsel %vm3125_vm10, %v3127_v38, %v3123_v33  ;;  %v4171_v38 = vld [vmem:[%s6725_s5 + $0xe0] sm:$0xff] }
 0xe15   : > { %v3474_v17 = vsel %vm782_vm0, %v6300_v5, 0.0 }
 0xe16   : > { %3475 = vadd.xlane.f32.xlu1 %v3474_v17  ;;  %v3129_v17 = vmul.f32 %v6229_v60, %v3128_v31  ;;  %v4250_v60 = vld [vmem:[%s6724_s4 + $0x68] sm:$0xff]  ;;  %v4170_v31 = vld [vmem:[%s6725_s5 + $0xd8] sm:$0xff] }
 0xe1e   : > { %3050 = vadd.xlane.f32.xlu1 %v3049_v18 }
 0xe26   : > { %3243 = vmax.xlane.f32.xlu1 %v3242_v6 }
 0xe2e   : > { %3252 = vmax.xlane.f32.xlu1 %v3251_v46 }
 0xe36   : > { %3279 = vadd.xlane.f32.xlu1 %v3278_v61 }
 0xe89   : > { %v3476_v30 = vpop.xlane.xlu1 %3475 }
 0xe8a   : > { %v3489_v32 = vmul.f32 %v3476_v30, %v5039_v43 }
 0xe8c   : > { %v6318_v51 = vsub.f32 %v6300_v5, %v3489_v32 }
 0xe8e   : > { %v3499_v8 = vmul.f32 %v6318_v51, %v6318_v51 }
 0xe90   : > { %v3504_v16 = vsel %vm782_vm0, %v3499_v8, 0.0  ;;  %v6355_v8 = vpop.f32.mrf.mxu1 }
 0xe91   : > { %3505 = vadd.xlane.f32.xlu0 %v3504_v16  ;;  %v3051_v52 = vpop.xlane.xlu1 %3050 }
 0xe92   : > { %4494 = vrcp.f32 %v3051_v52  ;;  %v3111_v59 = vand.u32 2147483648, %v3051_v52  ;;  %v3109_v37 = vand.u32 2147483647, %v3051_v52  ;;  %vm3105_vm3 = vweird.f32 %v3051_v52 }
 0xe94   : > { %v3112_v9 = vor.u32 1.1754944e-38, %v3111_v59  ;;  %vm3110_vm6 = vcmp.eq.f32.partialorder %v3109_v37, 8.507059e+37 }
 0xe98   : > { %v4495_v12 = vpop.eup %4494 }
 0xe99   : > { %v3101_v55 = vmul.f32 %v4495_v12, %v3051_v52  ;;  %3246 = vmax.xlane.f32.xlu0 %v3245_v20  ;;  %v3244_v4 = vpop.xlane.xlu1 %3243  ;;  %vm3106_vm2 = vweird.f32 %v4495_v12 }
 0xe9a   : > { %v3255_v36 = vsub.f32 %v6217_v54, %v3244_v4  ;;  %vm3107_vm4 = vmor %vm3105_vm3, %vm3106_vm2  ;;  %v6364_v4 = vpop.f32.mrf.mxu1 }
 0xe9b   : > { %v3102_v1 = vsub.f32 1.0, %v3101_v55  ;;  %v6362_v55 = vperm.slane %v6293_v42, 2 }
 0xe9c   : > { %v3261_v22 = vmul.f32 1.442695, %v3255_v36 }
 0xe9d   : > { %v3103_v15 = vmul.f32 %v4495_v12, %v3102_v1  ;;  %v6367_v1 = vperm.slane %v6293_v42, 3 }
 0xe9e   : > { %4496 = vpow2.f32 %v3261_v22 }
 0xe9f   : > { %v3104_v25 = vadd.f32 %v4495_v12, %v3103_v15 }
 0xea1   : > { %v3253_v13 = vpop.xlane.xlu1 %3252  ;;  %v3108_v53 = vsel %vm3107_vm4, %v4495_v12, %v3104_v25 }
 0xea2   : > { %v3258_v54 = vsub.f32 %v3236_v48, %v3253_v13  ;;  %v3113_v47 = vsel %vm3110_vm6, %v3112_v9, %v3108_v53 }
 0xea3   : > { %v3114_v39 = vmul.f32 %v4489_v56, %v3113_v47  ;;  %v4252_v56 = vld [vmem:[%s6724_s4 + $0x78] sm:$0xff] }
 0xea4   : > { %v6330_v34 = vpop.eup %4496  ;;  %v3267_v40 = vmul.f32 1.442695, %v3258_v54  ;;  %3629 = vmatpush.msrb.mxu1 %v4252_v56 }
 0xea5   : > { %4227 = vmatmul.msk.f32.gmra.mxu1 %vm1045_vm12, %v3114_v39  ;;  %v3272_v3 = vsel %vm1045_vm12, %v6330_v34, 0.0 }
 0xea6   : > { %4498 = vpow2.f32 %v3267_v40  ;;  %3273 = vadd.xlane.f32.xlu0 %v3272_v3  ;;  %3630 = vmatpush.msrb.mxu1 %v4251_v10  ;;  %v4174_v3 = vld [vmem:[%s6725_s5 + $0xf8] sm:$0xff]  ;;  %v4169_v10 = vld [vmem:[%s6725_s5 + $0xd0] sm:$0xff] }
 0xea7   : > { %3713 = vmatpush.msrb.mxu2 %v4174_v3 }
 0xea8   : > { %3631 = vmatpush.msrb.mxu1 %v4250_v60  ;;  %v4168_v60 = vld [vmem:[%s6725_s5 + $0xc8] sm:$0xff] }
 0xea9   : > { %v6382_v33 = vpop.xlane.xlu1 %3279 }
 0xeaa   : > { %3632 = vmatpush.msrb.mxu1 %v4249_v58  ;;  %vm3334_vm10 = vweird.f32 %v6382_v33 }
 0xeac   : > { %v6336_v18 = vpop.eup %4498 }
 0xead   : > { %4228 = vmatmul.msk.f32.gmra.mxu1 %vm1045_vm12, %v3129_v17  ;;  %v3281_v26 = vsel %vm1045_vm12, %v6336_v18, 0.0 }
 0xeae   : > { %3282 = vadd.xlane.f32.xlu0 %v3281_v26 }
 0xf04   : > { %v3506_v6 = vpop.xlane.xlu0 %3505 }
 0xf05   : > { %v3519_v24 = vmul.f32 %v3506_v6, %v5039_v43  ;;  %v4167_v6 = vld [vmem:[%s6725_s5 + $0xc0] sm:$0xff] }
 0xf07   : > { %v3524_v48 = vadd.f32 1e-05, %v3519_v24  ;;  %v4166_v24 = vld [vmem:[%s6725_s5 + $0xb8] sm:$0xff] }
 0xf09   : > { %4500 = vrsqrt.f32 %v3524_v48  ;;  %vm3535_vm13 = vweird.f32 %v3524_v48 }
 0xf0c   : > { %v3247_v46 = vpop.xlane.xlu0 %3246 }
 0xf0d   : > { %v3256_v61 = vsub.f32 %v6226_v28, %v3247_v46 }
 0xf0f   : > { %v4501_v30 = vpop.eup %4500  ;;  %v3263_v32 = vmul.f32 1.442695, %v3256_v61 }
 0xf10   : > { %v3530_v16 = vmul.f32 %v4501_v30, %v3524_v48  ;;  %vm3536_vm11 = vweird.f32 %v4501_v30 }
 0xf11   : > { %4502 = vpow2.f32 %v3263_v32  ;;  %vm3537_vm14 = vmor %vm3535_vm13, %vm3536_vm11 }
 0xf12   : > { %v3531_v52 = vmul.f32 %v4501_v30, %v3530_v16 }
 0xf14   : > { %v3532_v11 = vmul.f32 0.5, %v3531_v52 }
 0xf16   : > { %v3533_v44 = vsub.f32 1.5, %v3532_v11  ;;  %v4164_v11 = vld [vmem:[%s6725_s5 + $0xa8] sm:$0xff] }
 0xf17   : > { %v6357_v12 = vpop.eup %4502 }
 0xf18   : > { %v3534_v20 = vmul.f32 %v4501_v30, %v3533_v44  ;;  %v3275_v50 = vsel %vm1045_vm12, %v6357_v12, 0.0  ;;  %v4163_v44 = vld [vmem:[%s6725_s5 + $0xa0] sm:$0xff] }
 0xf19   : > { %3276 = vadd.xlane.f32.xlu2 %v3275_v50  ;;  %v3274_v28 = vpop.xlane.xlu0 %3273 }
 0xf1a   : > { %v3538_v36 = vsel %vm3537_vm14, %v4501_v30, %v3534_v20  ;;  %4504 = vrcp.f32 %v3274_v28  ;;  %v3310_v13 = vand.u32 2147483648, %v3274_v28  ;;  %v3308_v23 = vand.u32 2147483647, %v3274_v28  ;;  %v4165_v30 = vld [vmem:[%s6725_s5 + $0xb0] sm:$0xff] }
 0xf1b   : > { %v3579_v59 = vmul.f32 %v3538_v36, %v6318_v51  ;;  %vm3304_vm1 = vweird.f32 %v3274_v28  ;;  %4506 = vrcp.f32 %v6382_v33 }
 0xf1c   : > { %v3311_v47 = vor.u32 1.1754944e-38, %v3310_v13  ;;  %vm3309_vm3 = vcmp.eq.f32.partialorder %v3308_v23, 8.507059e+37 }
 0xf1d   : > { %v3585_v22 = vmul.f32 %v6362_v55, %v3579_v59 }
 0xf1f   : > { %v3591_v27 = vadd.f32 %v6367_v1, %v3585_v22 }
 0xf20   : > { %v4505_v15 = vpop.eup %4504 }
 0xf21   : > { %v3300_v37 = vmul.f32 %v4505_v15, %v3274_v28  ;;  %4253 = vmatmul.msk.f32.vlgmr.msrb.gmra.mxu1 %vm782_vm0, %v3591_v27  ;;  %vm3305_vm15 = vweird.f32 %v4505_v15  ;;  %v4507_v17 = vpop.eup %4506  ;;  %v6397_v26 = vpop.xlane.xlu0 %3282 }
 0xf22   : > { %v3171_v25 = vpop.f32.mrf.mxu1  ;;  %vm3306_vm2 = vmor %vm3304_vm1, %vm3305_vm15  ;;  %v3330_v58 = vmul.f32 %v4507_v17, %v6382_v33  ;;  %vm3335_vm6 = vweird.f32 %v4507_v17  ;;  %vm3349_vm15 = vweird.f32 %v6397_v26 }
 0xf23   : > { %v3301_v9 = vsub.f32 1.0, %v3300_v37  ;;  %v3180_v14 = vmul.f32 %v5200_v62, %v3171_v25  ;;  %vm3336_vm11 = vmor %vm3334_vm10, %vm3335_vm6 }
 0xf24   : > { %v3331_v46 = vsub.f32 1.0, %v3330_v58 }
 0xf25   : > { %v3302_v53 = vmul.f32 %v4505_v15, %v3301_v9  ;;  %v6375_v54 = vadd.f32 %v3180_v14, %v6273_v45  ;;  %v4173_v45 = vld [vmem:[%s6725_s5 + $0xf0] sm:$0xff]  ;;  %v3340_v14 = vand.u32 2147483648, %v6382_v33 }
 0xf26   : > { %3714 = vmatpush.msrb.mxu2 %v4173_v45  ;;  %v3332_v20 = vmul.f32 %v4507_v17, %v3331_v46 }
 0xf27   : > { %v3303_v51 = vadd.f32 %v4505_v15, %v3302_v53  ;;  %v3338_v53 = vand.u32 2147483647, %v6382_v33 }
 0xf28   : > { %v3333_v37 = vadd.f32 %v4507_v17, %v3332_v20 }
 0xf29   : > { %v3307_v21 = vsel %vm3306_vm2, %v4505_v15, %v3303_v51  ;;  %v6426_v15 = vperm.slane %v6293_v42, 6  ;;  %vm3339_vm13 = vcmp.eq.f32.partialorder %v3338_v53, 8.507059e+37 }
 0xf2a   : > { %v3312_v39 = vsel %vm3309_vm3, %v3311_v47, %v3307_v21  ;;  %v6416_v16 = vpop.f32.mrf.mxu1 }
 0xf2b   : > { %v3313_v40 = vmul.f32 %v6330_v34, %v3312_v39  ;;  %v4172_v34 = vld [vmem:[%s6725_s5 + $0xe8] sm:$0xff]  ;;  %v3337_v39 = vsel %vm3336_vm11, %v4507_v17, %v3333_v37 }
 0xf2c   : > { %3715 = vmatpush.msrb.mxu2 %v4172_v34 }
 0xf2d   : > { %4240 = vmatmul.msk.f32.gmra.mxu3 %vm1045_vm12, %v3313_v40  ;;  %v3341_v40 = vor.u32 1.1754944e-38, %v3340_v14 }
 0xf2e   : > { %3716 = vmatpush.msrb.mxu2 %v4171_v38 }
 0xf2f   : > { %v3342_v34 = vsel %vm3339_vm13, %v3341_v40, %v3337_v39 }
 0xf30   : > { %3717 = vmatpush.msrb.mxu2 %v4170_v31  ;;  %v3355_v31 = vand.u32 2147483648, %v6397_v26 }
 0xf32   : > { %3718 = vmatpush.msrb.mxu2 %v4169_v10 }
 0xf34   : > { %3719 = vmatpush.msrb.mxu2 %v4168_v60  ;;  %v3356_v60 = vor.u32 1.1754944e-38, %v3355_v31 }
 0xf36   : > { %3720 = vmatpush.msrb.mxu2 %v4167_v6 }
 0xf38   : > { %3721 = vmatpush.msrb.mxu2 %v4166_v24  ;;  %v3178_v24 = vmul.f32 %v5200_v62, %v6355_v8  ;;  %v3179_v8 = vmul.f32 %v5200_v62, %v6364_v4 }
 0xf3a   : > { %3722 = vmatpush.msrb.mxu2 %v4165_v30 }
 0xf3c   : > { %3723 = vmatpush.msrb.mxu2 %v4164_v11 }
 0xf3e   : > { %3724 = vmatpush.msrb.mxu2 %v4163_v44  ;;  %v3184_v44 = vadd.f32 %v3179_v8, %v6253_v49 }
 0xf8c   : > { %v3277_v56 = vpop.xlane.xlu2 %3276 }
 0xf8d   : > { %4508 = vrcp.f32 %v3277_v56  ;;  %v3325_v50 = vand.u32 2147483648, %v3277_v56  ;;  %v3323_v59 = vand.u32 2147483647, %v3277_v56  ;;  %vm3319_vm5 = vweird.f32 %v3277_v56 }
 0xf8e   : > { %4510 = vrcp.f32 %v6397_v26 }
 0xf8f   : > { %v3326_v27 = vor.u32 1.1754944e-38, %v3325_v50  ;;  %vm3324_vm8 = vcmp.eq.f32.partialorder %v3323_v59, 8.507059e+37  ;;  %v3181_v59 = vmul.f32 %v5200_v62, %v6416_v16  ;;  %v3738_v62 = vperm.slane %v6293_v42, 5 }
 0xf91   : > { %v3186_v49 = vadd.f32 %v3181_v59, %v6281_v0 }
 0xf93   : > { %v4509_v48 = vpop.eup %4508 }
 0xf94   : > { %v3315_v61 = vmul.f32 %v4509_v48, %v3277_v56  ;;  %v4511_v32 = vpop.eup %4510  ;;  %vm3320_vm4 = vweird.f32 %v4509_v48  ;;  %v3343_v56 = vmul.f32 %v6311_v2, %v3342_v34  ;;  %v3183_v2 = vadd.f32 %v3178_v24, %v6249_v19 }
 0xf95   : > { %v3345_v28 = vmul.f32 %v4511_v32, %v6397_v26  ;;  %vm3321_vm7 = vmor %vm3319_vm5, %vm3320_vm4  ;;  %vm3350_vm14 = vweird.f32 %v4511_v32 }
 0xf96   : > { %v3316_v52 = vsub.f32 1.0, %v3315_v61  ;;  %vm3351_vm1 = vmor %vm3349_vm15, %vm3350_vm14 }
 0xf97   : > { %v3346_v25 = vsub.f32 1.0, %v3345_v28 }
 0xf98   : > { %v3317_v36 = vmul.f32 %v4509_v48, %v3316_v52 }
 0xf99   : > { %v3347_v21 = vmul.f32 %v4511_v32, %v3346_v25 }
 0xf9a   : > { %v3318_v22 = vadd.f32 %v4509_v48, %v3317_v36 }
 0xf9b   : > { %v3348_v38 = vadd.f32 %v4511_v32, %v3347_v21 }
 0xf9c   : > { %v3322_v9 = vsel %vm3321_vm7, %v4509_v48, %v3318_v22 }
 0xf9d   : > { %v3327_v13 = vsel %vm3324_vm8, %v3326_v27, %v3322_v9  ;;  %v3352_v17 = vsel %vm3351_vm1, %v4511_v32, %v3348_v38 }
 0xf9e   : > { %v3634_v23 = vpop.f32.mrf.mxu1  ;;  %v3328_v51 = vmul.f32 %v6357_v12, %v3327_v13  ;;  %v3353_v12 = vand.u32 2147483647, %v6397_v26 }
 0xf9f   : > { %v3635_v47 = vadd.f32 %v3634_v23, %v6426_v15 }
 0xfa0   : > { %4241 = vmatmul.msk.f32.gmra.mxu3 %vm1045_vm12, %v3328_v51  ;;  %vm3354_vm2 = vcmp.eq.f32.partialorder %v3353_v12, 8.507059e+37 }
 0xfa1   : > { %v3649_v3 = vmul.f32 %v3635_v47, %v3635_v47  ;;  %v3357_v6 = vsel %vm3354_vm2, %v3356_v60, %v3352_v17 }
 0xfa2   : > { %v3358_v48 = vmul.f32 %v6336_v18, %v3357_v6 }
 0xfa3   : > { %v3654_v45 = vmul.f32 %v3649_v3, %v3635_v47 }
 0xfa5   : > { %v3659_v33 = vmul.f32 0.044715, %v3654_v45 }
 0xfa7   : > { %v3664_v10 = vadd.f32 %v3659_v33, %v3635_v47 }
 0xfa8   : > { %4242 = vmatmul.msk.f32.gmra.mxu3 %vm1045_vm12, %v3343_v56 }
 0xfa9   : > { %v3669_v58 = vmul.f32 0.7978846, %v3664_v10 }
 0xfab   : > { %4512 = vtanh.f32 %v3669_v58 }
 0xfb0   : > { %v3394_v46 = vpop.f32.mrf.mxu3  ;;  %4243 = vmatmul.msk.f32.gmra.mxu3 %vm1045_vm12, %v3358_v48  ;;  %vm3741_vm12 = vcmask 257024   ;;  %v3771_v48 = vld [vmem:[%s6727_s7 + $0x18] sm:$0xff] }
 0xfb1   : > { %v4513_v26 = vpop.eup %4512  ;;  %v3407_v61 = vmul.f32 %v5202_v63, %v3394_v46  ;;  %3788 = vmatpush.msrb.mxu3 %v3771_v48  ;;  %v3770_v46 = vld [vmem:[%s6727_s7 + $0x10] sm:$0xff] }
 0xfb2   : > { %v3679_v30 = vadd.f32 1.0, %v4513_v26 }
 0xfb3   : > { %v3412_v32 = vadd.f32 %v3407_v61, %v3183_v2  ;;  %3789 = vmatpush.msrb.mxu3 %v3770_v46  ;;  %v3769_v2 = vld [vmem:[%s6727_s7 + $0x8] sm:$0xff]  ;;  %v3768_v61 = vld [vmem:[%s6727_s7] sm:$0xff] }
 0xfb4   : > { %v3684_v52 = vmul.f32 0.5, %v3679_v30 }
 0xfb5   : > { %4245 = vmatmul.msk.f32.gmra.mxu0 %vm782_vm0, %v3412_v32  ;;  %3790 = vmatpush.msrb.mxu3 %v3769_v2 }
 0xfb6   : > { %v3689_v11 = vmul.f32 %v3684_v52, %v3635_v47 }
 0xfb7   : > { %3791 = vmatpush.msrb.mxu3 %v3768_v61 }
 0xfb8   : > { %4258 = vmatmul.msk.f32.vlgmr.msrb.gmra.mxu2 %vm2203_vm9, %v3689_v11 }
0x1023   : > { %v3397_v18 = vpop.f32.mrf.mxu3 }
0x1024   : > { %v3408_v20 = vmul.f32 %v5202_v63, %v3397_v18 }
0x1026   : > { %v3413_v50 = vadd.f32 %v3408_v20, %v3184_v44 }
0x1028   : > { %4246 = vmatmul.msk.f32.gmra.mxu0 %vm782_vm0, %v3413_v50 }
0x102b   : > { %v3400_v19 = vpop.f32.mrf.mxu3 }
0x102c   : > { %v3409_v28 = vmul.f32 %v5202_v63, %v3400_v19 }
0x102e   : > { %v3414_v36 = vadd.f32 %v3409_v28, %v6375_v54 }
0x1030   : > { %4247 = vmatmul.msk.f32.gmra.mxu0 %vm782_vm0, %v3414_v36 }
0x1032   : > { %v3451_v22 = vpop.f32.mrf.mxu0 }
0x1033   : > { %v3464_v4 = vadd.f32 %v3451_v22, %v5830_v29  ;;  %v3403_v27 = vpop.f32.mrf.mxu3 }
0x1034   : > { %v3410_v37 = vmul.f32 %v5202_v63, %v3403_v27 }
0x1035   : > { %v3470_v25 = vadd.f32 %v6296_v41, %v3464_v4 }
0x1036   : > { %v3415_v9 = vadd.f32 %v3410_v37, %v3186_v49 }
0x1037   : > { %v3477_v14 = vsel %vm782_vm0, %v3470_v25, 0.0 }
0x1038   : > { %3478 = vadd.xlane.f32.xlu0 %v3477_v14  ;;  %4248 = vmatmul.msk.f32.gmra.mxu0 %vm782_vm0, %v3415_v9 }
0x103b   : > { %v3726_v54 = vpop.f32.mrf.mxu2 }
0x103c   : > { %v3737_v16 = vadd.f32 %v3726_v54, %v6300_v5 }
0x103e   : > { %v3739_v29 = vadd.f32 %v3738_v62, %v3737_v16 }
0x1040   : > { %v3742_v13 = vsel %vm3741_vm12, %v3739_v29, 0.0 }
0x1041   : > { %3743 = vadd.xlane.f32.xlu2 %v3742_v13 }
0x10a5   : > { %v3454_v0 = vpop.f32.mrf.mxu0 }
0x10a6   : > { %v3465_v63 = vadd.f32 %v3454_v0, %v5835_v7  ;;  %v6524_v0 = vld [vmem:[%s6728_s8] sm:$0xff] }
0x10a8   : > { %v3471_v53 = vadd.f32 %v6296_v41, %v3465_v63 }
0x10aa   : > { %v3480_v23 = vsel %vm782_vm0, %v3471_v53, 0.0 }
0x10ab   : > { %v3479_v51 = vpop.xlane.xlu0 %3478  ;;  %3481 = vadd.xlane.f32.xlu2 %v3480_v23 }
0x10ac   : > { %v3490_v47 = vmul.f32 %v3479_v51, %v5039_v43  ;;  %v3764_v51 = vperm.slane %v6524_v0, 0 }
0x10ad   : > { %v3457_v42 = vpop.f32.mrf.mxu0 }
0x10ae   : > { %v6470_v21 = vsub.f32 %v3470_v25, %v3490_v47  ;;  %v3466_v12 = vadd.f32 %v3457_v42, %v5840_v57  ;;  %v3766_v42 = vperm.slane %v6524_v0, 1 }
0x10b0   : > { %v3500_v5 = vmul.f32 %v6470_v21, %v6470_v21  ;;  %v3472_v10 = vadd.f32 %v6296_v41, %v3466_v12 }
0x10b2   : > { %v3507_v39 = vsel %vm782_vm0, %v3500_v5, 0.0  ;;  %v3483_v17 = vsel %vm782_vm0, %v3472_v10, 0.0 }
0x10b3   : > { %3508 = vadd.xlane.f32.xlu2 %v3507_v39 }
0x10b4   : > { %v3744_v40 = vpop.xlane.xlu2 %3743 }
0x10b5   : > { %v3745_v7 = vmul.f32 %v3744_v40, %v5039_v43  ;;  %v3460_v3 = vpop.f32.mrf.mxu0 }
0x10b6   : > { %v3467_v45 = vadd.f32 %v3460_v3, %v5845_v35 }
0x10b7   : > { %v6477_v34 = vsub.f32 %v3739_v29, %v3745_v7 }
0x10b8   : > { %v3473_v38 = vadd.f32 %v6296_v41, %v3467_v45 }
0x10b9   : > { %v3747_v31 = vmul.f32 %v6477_v34, %v6477_v34 }
0x10ba   : > { %v3486_v33 = vsel %vm782_vm0, %v3473_v38, 0.0 }
0x10bb   : > { %3487 = vadd.xlane.f32.xlu0 %v3486_v33  ;;  %v3748_v56 = vsel %vm3741_vm12, %v3747_v31, 0.0 }
0x10bc   : > { %3749 = vadd.xlane.f32.xlu1 %v3748_v56 }
0x10c4   : > { %3484 = vadd.xlane.f32.xlu1 %v3483_v17 }
0x111e   : > { %v3482_v35 = vpop.xlane.xlu2 %3481 }
0x111f   : > { %v3491_v60 = vmul.f32 %v3482_v35, %v5039_v43 }
0x1121   : > { %v6488_v58 = vsub.f32 %v3471_v53, %v3491_v60 }
0x1123   : > { %v3501_v6 = vmul.f32 %v6488_v58, %v6488_v58 }
0x1125   : > { %v3510_v24 = vsel %vm782_vm0, %v3501_v6, 0.0 }
0x1126   : > { %3511 = vadd.xlane.f32.xlu1 %v3510_v24  ;;  %v3509_v57 = vpop.xlane.xlu2 %3508 }
0x1127   : > { %v3520_v41 = vmul.f32 %v3509_v57, %v5039_v43 }
0x1129   : > { %v3525_v26 = vadd.f32 1e-05, %v3520_v41 }
0x112b   : > { %4514 = vrsqrt.f32 %v3525_v26  ;;  %vm3545_vm4 = vweird.f32 %v3525_v26 }
0x112e   : > { %v3488_v30 = vpop.xlane.xlu0 %3487 }
0x112f   : > { %v3493_v32 = vmul.f32 %v3488_v30, %v5039_v43  ;;  %v3750_v52 = vpop.xlane.xlu1 %3749 }
0x1130   : > { %v3751_v11 = vmul.f32 %v3750_v52, %v5039_v43 }
0x1131   : > { %v4515_v8 = vpop.eup %4514  ;;  %v6508_v18 = vsub.f32 %v3473_v38, %v3493_v32 }
0x1132   : > { %v3540_v44 = vmul.f32 %v4515_v8, %v3525_v26  ;;  %v3752_v20 = vadd.f32 1e-05, %v3751_v11  ;;  %vm3546_vm3 = vweird.f32 %v4515_v8 }
0x1133   : > { %v3503_v50 = vmul.f32 %v6508_v18, %v6508_v18  ;;  %vm3547_vm5 = vmor %vm3545_vm4, %vm3546_vm3  ;;  %vm3796_vm4 = vcmask 584704  }
0x1134   : > { %v3541_v19 = vmul.f32 %v4515_v8, %v3540_v44  ;;  %4516 = vrsqrt.f32 %v3752_v20  ;;  %vm3759_vm7 = vweird.f32 %v3752_v20 }
0x1135   : > { %v3516_v28 = vsel %vm782_vm0, %v3503_v50, 0.0 }
0x1136   : > { %v3542_v36 = vmul.f32 0.5, %v3541_v19  ;;  %3517 = vadd.xlane.f32.xlu2 %v3516_v28 }
0x1137   : > { %v3485_v59 = vpop.xlane.xlu1 %3484 }
0x1138   : > { %v3543_v22 = vsub.f32 1.5, %v3542_v36  ;;  %v3492_v4 = vmul.f32 %v3485_v59, %v5039_v43 }
0x113a   : > { %v4517_v27 = vpop.eup %4516  ;;  %v3544_v49 = vmul.f32 %v4515_v8, %v3543_v22  ;;  %v6514_v37 = vsub.f32 %v3472_v10, %v3492_v4 }
0x113b   : > { %v3754_v25 = vmul.f32 %v4517_v27, %v3752_v20  ;;  %vm3760_vm6 = vweird.f32 %v4517_v27 }
0x113c   : > { %v3548_v9 = vsel %vm3547_vm5, %v4515_v8, %v3544_v49  ;;  %v3502_v14 = vmul.f32 %v6514_v37, %v6514_v37  ;;  %vm3761_vm8 = vmor %vm3759_vm7, %vm3760_vm6  ;;  %vm3890_vm7 = vcmask 588800  }
0x113d   : > { %v3580_v62 = vmul.f32 %v3548_v9, %v6470_v21  ;;  %v3755_v54 = vmul.f32 %v4517_v27, %v3754_v25  ;;  %v3772_v9 = vperm.slane %v6524_v0, 2 }
0x113e   : > { %v3513_v16 = vsel %vm782_vm0, %v3502_v14, 0.0 }
0x113f   : > { %v3756_v29 = vmul.f32 0.5, %v3755_v54  ;;  %3514 = vadd.xlane.f32.xlu0 %v3513_v16  ;;  %v3586_v13 = vmul.f32 %v6362_v55, %v3580_v62 }
0x1141   : > { %v3757_v63 = vsub.f32 1.5, %v3756_v29  ;;  %v3592_v53 = vadd.f32 %v6367_v1, %v3586_v13 }
0x1143   : > { %v3758_v23 = vmul.f32 %v4517_v27, %v3757_v63  ;;  %4254 = vmatmul.msk.f32.gmra.mxu1 %vm782_vm0, %v3592_v53 }
0x1145   : > { %v3762_v47 = vsel %vm3761_vm8, %v4517_v27, %v3758_v23  ;;  %vm4000_vm8 = vcmask 1043456  }
0x1146   : > { %v3763_v21 = vmul.f32 %v3762_v47, %v6477_v34 }
0x1148   : > { %v3765_v5 = vmul.f32 %v3764_v51, %v3763_v21  ;;  %v4550_v51 = vmov 72.0  }
0x114a   : > { %v3767_v39 = vadd.f32 %v3766_v42, %v3765_v5 }
0x114c   : > { %4263 = vmatmul.msk.f32.vlgmr.msrb.gmra.mxu3 %vm782_vm0, %v3767_v39 }
0x1199   : > { %v3512_v40 = vpop.xlane.xlu1 %3511 }
0x119a   : > { %v3521_v7 = vmul.f32 %v3512_v40, %v5039_v43 }
0x119c   : > { %v3526_v3 = vadd.f32 1e-05, %v3521_v7 }
0x119e   : > { %4518 = vrsqrt.f32 %v3526_v3  ;;  %vm3555_vm11 = vweird.f32 %v3526_v3 }
0x11a4   : > { %v4519_v45 = vpop.eup %4518 }
0x11a5   : > { %v3550_v38 = vmul.f32 %v4519_v45, %v3526_v3  ;;  %vm3556_vm10 = vweird.f32 %v4519_v45 }
0x11a6   : > { %vm3557_vm13 = vmor %vm3555_vm11, %vm3556_vm10 }
0x11a7   : > { %v3551_v31 = vmul.f32 %v4519_v45, %v3550_v38 }
0x11a9   : > { %v3552_v33 = vmul.f32 0.5, %v3551_v31  ;;  %v3518_v12 = vpop.xlane.xlu2 %3517 }
0x11aa   : > { %v3523_v56 = vmul.f32 %v3518_v12, %v5039_v43 }
0x11ab   : > { %v3553_v10 = vsub.f32 1.5, %v3552_v33 }
0x11ac   : > { %v3528_v17 = vadd.f32 1e-05, %v3523_v56 }
0x11ad   : > { %v3554_v34 = vmul.f32 %v4519_v45, %v3553_v10 }
0x11ae   : > { %4520 = vrsqrt.f32 %v3528_v17  ;;  %vm3575_vm12 = vweird.f32 %v3528_v17 }
0x11af   : > { %v3558_v35 = vsel %vm3557_vm13, %v4519_v45, %v3554_v34 }
0x11b0   : > { %v3581_v60 = vmul.f32 %v3558_v35, %v6488_v58 }
0x11b2   : > { %v3515_v6 = vpop.xlane.xlu0 %3514  ;;  %v3587_v24 = vmul.f32 %v6362_v55, %v3581_v60 }
0x11b3   : > { %v3522_v57 = vmul.f32 %v3515_v6, %v5039_v43 }
0x11b4   : > { %v4521_v48 = vpop.eup %4520  ;;  %v3593_v41 = vadd.f32 %v6367_v1, %v3587_v24 }
0x11b5   : > { %v3527_v46 = vadd.f32 1e-05, %v3522_v57  ;;  %v3570_v26 = vmul.f32 %v4521_v48, %v3528_v17  ;;  %vm3576_vm15 = vweird.f32 %v4521_v48 }
0x11b6   : > { %4255 = vmatmul.msk.f32.gmra.mxu1 %vm782_vm0, %v3593_v41  ;;  %vm3577_vm3 = vmor %vm3575_vm12, %vm3576_vm15 }
0x11b7   : > { %4522 = vrsqrt.f32 %v3527_v46  ;;  %v3571_v2 = vmul.f32 %v4521_v48, %v3570_v26  ;;  %vm3565_vm1 = vweird.f32 %v3527_v46 }
0x11b9   : > { %v3572_v30 = vmul.f32 0.5, %v3571_v2 }
0x11bb   : > { %v3573_v8 = vsub.f32 1.5, %v3572_v30 }
0x11bd   : > { %v4523_v61 = vpop.eup %4522  ;;  %v3574_v19 = vmul.f32 %v4521_v48, %v3573_v8 }
0x11be   : > { %v3560_v32 = vmul.f32 %v4523_v61, %v3527_v46  ;;  %vm3566_vm14 = vweird.f32 %v4523_v61 }
0x11bf   : > { %vm3567_vm2 = vmor %vm3565_vm1, %vm3566_vm14  ;;  %v3578_v27 = vsel %vm3577_vm3, %v4521_v48, %v3574_v19 }
0x11c0   : > { %v3561_v52 = vmul.f32 %v4523_v61, %v3560_v32  ;;  %v3637_v11 = vpop.f32.mrf.mxu1  ;;  %v3583_v14 = vmul.f32 %v3578_v27, %v6508_v18  ;;  %v3860_v27 = vld [vmem:[%s6729_s9 + $0xf0] sm:$0xff] }
0x11c1   : > { %v3638_v58 = vadd.f32 %v3637_v11, %v6426_v15 }
0x11c2   : > { %v3562_v44 = vmul.f32 0.5, %v3561_v52  ;;  %v3589_v29 = vmul.f32 %v6362_v55, %v3583_v14  ;;  %v3873_v14 = vld [vmem:[%s6729_s9 + $0x158] sm:$0xff] }
0x11c3   : > { %v3650_v20 = vmul.f32 %v3638_v58, %v3638_v58  ;;  %3961 = vmatpush.msra.mxu1 %v3873_v14 }
0x11c4   : > { %v3563_v43 = vsub.f32 1.5, %v3562_v44  ;;  %v3595_v53 = vadd.f32 %v6367_v1, %v3589_v29  ;;  %v3868_v29 = vld [vmem:[%s6729_s9 + $0x130] sm:$0xff] }
0x11c5   : > { %v3655_v50 = vmul.f32 %v3650_v20, %v3638_v58  ;;  %3962 = vmatpush.msra.mxu1 %v3868_v29 }
0x11c6   : > { %v3564_v28 = vmul.f32 %v4523_v61, %v3563_v43 }
0x11c7   : > { %v3660_v36 = vmul.f32 0.044715, %v3655_v50 }
0x11c8   : > { %v3568_v59 = vsel %vm3567_vm2, %v4523_v61, %v3564_v28 }
0x11c9   : > { %v3582_v22 = vmul.f32 %v3568_v59, %v6514_v37  ;;  %v3665_v4 = vadd.f32 %v3660_v36, %v3638_v58 }
0x11cb   : > { %v3670_v49 = vmul.f32 0.7978846, %v3665_v4  ;;  %v3588_v25 = vmul.f32 %v6362_v55, %v3582_v22  ;;  %v3865_v4 = vld [vmem:[%s6729_s9 + $0x118] sm:$0xff] }
0x11cd   : > { %4524 = vtanh.f32 %v3670_v49  ;;  %v3594_v62 = vadd.f32 %v6367_v1, %v3588_v25  ;;  %v3855_v49 = vld [vmem:[%s6729_s9 + $0xc8] sm:$0xff]  ;;  %v3850_v25 = vld [vmem:[%s6729_s9 + $0xa0] sm:$0xff] }
0x11ce   : > { %4526 = vrcp.f32 %v4550_v51  ;;  %v3857_v51 = vld [vmem:[%s6729_s9 + $0xd8] sm:$0xff] }
0x11cf   : > { %4256 = vmatmul.msk.f32.gmra.mxu1 %vm782_vm0, %v3594_v62  ;;  %v3793_v54 = vpop.f32.mrf.mxu3  ;;  %v3874_v62 = vld [vmem:[%s6729_s9 + $0x160] sm:$0xff] }
0x11d0   : > { %v3794_v16 = vadd.f32 %v3793_v54, %v3772_v9  ;;  %v3872_v9 = vld [vmem:[%s6729_s9 + $0x150] sm:$0xff]  ;;  %v3845_v54 = vld [vmem:[%s6729_s9 + $0x78] sm:$0xff]  ;;  %3981 = vmatpush.msra.mxu2 %v3874_v62 }
0x11d1   : > { %3941 = vmatpush.msra.mxu0 %v3872_v9 }
0x11d2   : > { %v3797_v37 = vsel %vm3796_vm4, %v3794_v16, 0.0 }
0x11d3   : > { %v4525_v13 = vpop.eup %4524  ;;  %3798 = vadd.xlane.f32.xlu1 %v3797_v37  ;;  %v3869_v37 = vld [vmem:[%s6729_s9 + $0x138] sm:$0xff] }
0x11d4   : > { %v3680_v63 = vadd.f32 1.0, %v4525_v13  ;;  %v4527_v47 = vpop.eup %4526  ;;  %v3840_v13 = vld [vmem:[%s6729_s9 + $0x50] sm:$0xff]  ;;  %3982 = vmatpush.msra.mxu2 %v3869_v37 }
0x11d5   : > { %v3801_v55 = vmul.f32 72.0, %v4527_v47 }
0x11d6   : > { %v3685_v23 = vmul.f32 0.5, %v3680_v63  ;;  %v3862_v63 = vld [vmem:[%s6729_s9 + $0x100] sm:$0xff] }
0x11d7   : > { %4257 = vmatmul.msk.f32.gmra.mxu1 %vm782_vm0, %v3595_v53  ;;  %v3802_v40 = vsub.f32 1.0, %v3801_v55  ;;  %vm3805_vm0 = vweird.f32 %v4527_v47  ;;  %v3863_v53 = vld [vmem:[%s6729_s9 + $0x108] sm:$0xff] }
0x11d8   : > { %v3690_v18 = vmul.f32 %v3685_v23, %v3638_v58  ;;  %v3864_v23 = vld [vmem:[%s6729_s9 + $0x110] sm:$0xff]  ;;  %3963 = vmatpush.msra.mxu1 %v3863_v53  ;;  %v3871_v55 = vld [vmem:[%s6729_s9 + $0x148] sm:$0xff] }
0x11d9   : > { %v3803_v45 = vmul.f32 %v4527_v47, %v3802_v40  ;;  %3983 = vmatpush.msra.mxu2 %v3864_v23  ;;  %v3854_v40 = vld [vmem:[%s6729_s9 + $0xc0] sm:$0xff] }
0x11da   : > { %4259 = vmatmul.msk.f32.gmra.mxu2 %vm2203_vm9, %v3690_v18  ;;  %v3835_v18 = vld [vmem:[%s6729_s9 + $0x28] sm:$0xff] }
0x11db   : > { %v3804_v38 = vadd.f32 %v4527_v47, %v3803_v45  ;;  %v3848_v45 = vld [vmem:[%s6729_s9 + $0x90] sm:$0xff] }
0x11dd   : > { %v6552_v31 = vsel %vm3805_vm0, %v4527_v47, %v3804_v38  ;;  %v3858_v47 = vld [vmem:[%s6729_s9 + $0xe0] sm:$0xff]  ;;  %v3861_v38 = vld [vmem:[%s6729_s9 + $0xf8] sm:$0xff] }
0x11de   : > { %3964 = vmatpush.msra.mxu1 %v3858_v47 }
0x1233   : > { %v3640_v42 = vpop.f32.mrf.mxu1 }
0x1234   : > { %v3641_v21 = vadd.f32 %v3640_v42, %v6426_v15  ;;  %v3859_v42 = vld [vmem:[%s6729_s9 + $0xe8] sm:$0xff] }
0x1235   : > { %3984 = vmatpush.msra.mxu2 %v3859_v42 }
0x1236   : > { %v3651_v5 = vmul.f32 %v3641_v21, %v3641_v21 }
0x1237   : > { %3985 = vmatpush.msra.mxu2 %v3854_v40 }
0x1238   : > { %v3656_v39 = vmul.f32 %v3651_v5, %v3641_v21  ;;  %v3852_v5 = vld [vmem:[%s6729_s9 + $0xb0] sm:$0xff] }
0x123a   : > { %v3661_v7 = vmul.f32 0.044715, %v3656_v39  ;;  %v3853_v39 = vld [vmem:[%s6729_s9 + $0xb8] sm:$0xff] }
0x123b   : > { %3965 = vmatpush.msra.mxu1 %v3853_v39 }
0x123c   : > { %v3666_v3 = vadd.f32 %v3661_v7, %v3641_v21  ;;  %v3866_v7 = vld [vmem:[%s6729_s9 + $0x120] sm:$0xff] }
0x123d   : > { %3966 = vmatpush.msra.mxu1 %v3848_v45 }
0x123e   : > { %v3671_v1 = vmul.f32 0.7978846, %v3666_v3  ;;  %v3847_v3 = vld [vmem:[%s6729_s9 + $0x88] sm:$0xff] }
0x1240   : > { %4528 = vtanh.f32 %v3671_v1  ;;  %v3849_v1 = vld [vmem:[%s6729_s9 + $0x98] sm:$0xff] }
0x1241   : > { %3986 = vmatpush.msra.mxu2 %v3849_v1 }
0x1246   : > { %v4529_v33 = vpop.eup %4528  ;;  %v3799_v12 = vpop.xlane.xlu1 %3798 }
0x1247   : > { %v3807_v56 = vmul.f32 %v6552_v31, %v3799_v12  ;;  %v3681_v10 = vadd.f32 1.0, %v4529_v33  ;;  %v3842_v33 = vld [vmem:[%s6729_s9 + $0x60] sm:$0xff]  ;;  %v3843_v12 = vld [vmem:[%s6729_s9 + $0x68] sm:$0xff] }
0x1248   : > { %3967 = vmatpush.msra.mxu1 %v3843_v12 }
0x1249   : > { %v6555_v17 = vsub.f32 %v3794_v16, %v3807_v56  ;;  %v3686_v34 = vmul.f32 0.5, %v3681_v10  ;;  %v3867_v16 = vld [vmem:[%s6729_s9 + $0x128] sm:$0xff]  ;;  %v3844_v56 = vld [vmem:[%s6729_s9 + $0x70] sm:$0xff] }
0x124a   : > { %3942 = vmatpush.msra.mxu0 %v3867_v16  ;;  %3987 = vmatpush.msra.mxu2 %v3844_v56  ;;  %v3856_v10 = vld [vmem:[%s6729_s9 + $0xd0] sm:$0xff] }
0x124b   : > { %v3691_v35 = vmul.f32 %v3686_v34, %v3641_v21  ;;  %v3809_v60 = vmul.f32 %v6555_v17, %v6555_v17  ;;  %v3830_v21 = vld [vmem:[%s6729_s9] sm:$0xff]  ;;  %v3837_v34 = vld [vmem:[%s6729_s9 + $0x38] sm:$0xff] }
0x124c   : > { %v3643_v6 = vpop.f32.mrf.mxu1  ;;  %3943 = vmatpush.msra.mxu0 %v3862_v63 }
0x124d   : > { %v3644_v24 = vadd.f32 %v3643_v6, %v6426_v15  ;;  %4260 = vmatmul.msk.f32.gmra.mxu2 %vm2203_vm9, %v3691_v35  ;;  %v3810_v57 = vsel %vm3796_vm4, %v3809_v60, 0.0  ;;  %v3838_v35 = vld [vmem:[%s6729_s9 + $0x40] sm:$0xff]  ;;  %v3839_v60 = vld [vmem:[%s6729_s9 + $0x48] sm:$0xff] }
0x124e   : > { %3811 = vadd.xlane.f32.xlu0 %v3810_v57  ;;  %3944 = vmatpush.msra.mxu0 %v3857_v51  ;;  %v3851_v6 = vld [vmem:[%s6729_s9 + $0xa8] sm:$0xff]  ;;  %v3833_v57 = vld [vmem:[%s6729_s9 + $0x18] sm:$0xff] }
0x124f   : > { %v3652_v48 = vmul.f32 %v3644_v24, %v3644_v24  ;;  %3968 = vmatpush.msra.mxu1 %v3838_v35  ;;  %3988 = vmatpush.msra.mxu2 %v3839_v60 }
0x1250   : > { %3945 = vmatpush.msra.mxu0 %v3852_v5 }
0x1251   : > { %v3657_v41 = vmul.f32 %v3652_v48, %v3644_v24  ;;  %v3834_v48 = vld [vmem:[%s6729_s9 + $0x20] sm:$0xff]  ;;  %3969 = vmatpush.msra.mxu1 %v3833_v57 }
0x1252   : > { %3946 = vmatpush.msra.mxu0 %v3847_v3  ;;  %3989 = vmatpush.msra.mxu2 %v3834_v48 }
0x1253   : > { %v3662_v46 = vmul.f32 0.044715, %v3657_v41  ;;  %v3846_v41 = vld [vmem:[%s6729_s9 + $0x80] sm:$0xff] }
0x1254   : > { %v3646_v26 = vpop.f32.mrf.mxu1  ;;  %3947 = vmatpush.msra.mxu0 %v3842_v33 }
0x1255   : > { %v3667_v2 = vadd.f32 %v3662_v46, %v3644_v24  ;;  %v3647_v61 = vadd.f32 %v3646_v26, %v6426_v15  ;;  %v3870_v15 = vld [vmem:[%s6729_s9 + $0x140] sm:$0xff]  ;;  %v3841_v46 = vld [vmem:[%s6729_s9 + $0x58] sm:$0xff] }
0x1256   : > { %3901 = vmatpush.msra.mxu3 %v3870_v15  ;;  %3948 = vmatpush.msra.mxu0 %v3837_v34 }
0x1257   : > { %v3672_v30 = vmul.f32 0.7978846, %v3667_v2  ;;  %v3653_v32 = vmul.f32 %v3647_v61, %v3647_v61 }
0x1258   : > { %3902 = vmatpush.msra.mxu3 %v3865_v4  ;;  %v4264_v4 = vld [vmem:[%s6729_s9 + $0x168] ss:$8 sm:$0xf] }
0x1259   : > { %4530 = vtanh.f32 %v3672_v30  ;;  %v3658_v52 = vmul.f32 %v3653_v32, %v3647_v61  ;;  %v3831_v32 = vld [vmem:[%s6729_s9 + $0x8] sm:$0xff] }
0x125a   : > { %3903 = vmatpush.msra.mxu3 %v3860_v27 }
0x125b   : > { %v3663_v11 = vmul.f32 0.044715, %v3658_v52 }
0x125c   : > { %3904 = vmatpush.msra.mxu3 %v3855_v49 }
0x125d   : > { %v3668_v58 = vadd.f32 %v3663_v11, %v3647_v61  ;;  %v3729_v8 = vpop.f32.mrf.mxu2 }
0x125e   : > { %3905 = vmatpush.msra.mxu3 %v3850_v25 }
0x125f   : > { %v4531_v44 = vpop.eup %4530  ;;  %v3673_v20 = vmul.f32 0.7978846, %v3668_v58 }
0x1260   : > { %v3682_v43 = vadd.f32 1.0, %v4531_v44  ;;  %3906 = vmatpush.msra.mxu3 %v3845_v54 }
0x1261   : > { %4532 = vtanh.f32 %v3673_v20 }
0x1262   : > { %v3687_v50 = vmul.f32 0.5, %v3682_v43  ;;  %3907 = vmatpush.msra.mxu3 %v3840_v13  ;;  %v3826_v43 = vperm.slane %v6524_v0, 3 }
0x1264   : > { %v3692_v19 = vmul.f32 %v3687_v50, %v3644_v24  ;;  %3908 = vmatpush.msra.mxu3 %v3835_v18  ;;  %v3832_v24 = vld [vmem:[%s6729_s9 + $0x10] sm:$0xff] }
0x1265   : > { %3949 = vmatpush.msra.mxu0 %v3832_v24 }
0x1266   : > { %4261 = vmatmul.msk.f32.gmra.mxu2 %vm2203_vm9, %v3692_v19  ;;  %3909 = vmatpush.msra.mxu3 %v3830_v21  ;;  %v3828_v19 = vperm.slane %v6524_v0, 4  ;;  %v4265_v0 = vld [vmem:[%s6729_s9 + $0x168] ss:$8 sm:$0x10] }
0x1267   : > { %v4533_v28 = vpop.eup %4532 }
0x1268   : > { %v3683_v36 = vadd.f32 1.0, %v4533_v28  ;;  %3921 = vmatpush.msrb.mxu3 %v3871_v55 }
0x126a   : > { %v3688_v59 = vmul.f32 0.5, %v3683_v36  ;;  %3922 = vmatpush.msrb.mxu3 %v3866_v7 }
0x126c   : > { %v3693_v22 = vmul.f32 %v3688_v59, %v3647_v61  ;;  %3923 = vmatpush.msrb.mxu3 %v3861_v38  ;;  %v3836_v61 = vld [vmem:[%s6729_s9 + $0x30] sm:$0xff] }
0x126e   : > { %4262 = vmatmul.msk.f32.gmra.mxu2 %vm2203_vm9, %v3693_v22  ;;  %3924 = vmatpush.msrb.mxu3 %v3856_v10 }
0x1270   : > { %3925 = vmatpush.msrb.mxu3 %v3851_v6 }
0x1272   : > { %3926 = vmatpush.msrb.mxu3 %v3846_v41 }
0x1274   : > { %3927 = vmatpush.msrb.mxu3 %v3841_v46 }
0x1276   : > { %3928 = vmatpush.msrb.mxu3 %v3836_v61 }
0x1278   : > { %3929 = vmatpush.msrb.mxu3 %v3831_v32 }
0x12c1   : > { %v3812_v26 = vpop.xlane.xlu0 %3811 }
0x12c2   : > { %v3813_v2 = vmul.f32 %v3812_v26, %v6552_v31 }
0x12c4   : > { %v3814_v30 = vadd.f32 1e-05, %v3813_v2 }
0x12c6   : > { %4534 = vrsqrt.f32 %v3814_v30  ;;  %vm3821_vm5 = vweird.f32 %v3814_v30 }
0x12cc   : > { %v4535_v52 = vpop.eup %4534 }
0x12cd   : > { %v3816_v11 = vmul.f32 %v4535_v52, %v3814_v30  ;;  %vm3822_vm9 = vweird.f32 %v4535_v52 }
0x12ce   : > { %vm3823_vm6 = vmor %vm3821_vm5, %vm3822_vm9 }
0x12cf   : > { %v3817_v58 = vmul.f32 %v4535_v52, %v3816_v11 }
0x12d0   : > { %v3731_v8 = vpop.f32.mrf.mxu2 }
0x12d1   : > { %v3818_v44 = vmul.f32 0.5, %v3817_v58 }
0x12d3   : > { %v3819_v20 = vsub.f32 1.5, %v3818_v44 }
0x12d5   : > { %v3820_v31 = vmul.f32 %v4535_v52, %v3819_v20 }
0x12d7   : > { %v3824_v50 = vsel %vm3823_vm6, %v4535_v52, %v3820_v31 }
0x12d8   : > { %v3825_v28 = vmul.f32 %v3824_v50, %v6555_v17  ;;  %v3878_v17 = vor.u32 %v4265_v0, %v4264_v4 }
0x12da   : > { %v3827_v36 = vmul.f32 %v3826_v43, %v3825_v28  ;;  %v3883_v27 = vperm.slane %v3878_v17, 3  ;;  %v3882_v49 = vperm.slane %v3878_v17, 2  ;;  %v3884_v16 = vperm.slane %v3878_v17, 4 }
0x12db   : > { %v3881_v53 = vperm.slane %v3878_v17, 1  ;;  %v3880_v23 = vperm.slane %v3878_v17, 0 }
0x12dc   : > { %v3829_v59 = vadd.f32 %v3828_v19, %v3827_v36 }
0x12de   : > { %4266 = vmatmul.msk.f32.vlgmr.msra.gmra.mxu3 %vm3890_vm7, %v3829_v59  ;;  %4268 = vmatmul.msk.f32.vlgmr.msra.gmra.mxu0 %vm3890_vm7, %v3829_v59 }
0x12df   : > { %4269 = vmatmul.msk.f32.vlgmr.msra.gmra.mxu1 %vm3890_vm7, %v3829_v59  ;;  %4270 = vmatmul.msk.f32.vlgmr.msra.gmra.mxu2 %vm3890_vm7, %v3829_v59 }
0x12e6   : > { %4267 = vmatmul.msk.f32.vlgmr.msrb.gmra.mxu3 %vm3890_vm7, %v3829_v59 }
0x12e9   : > { %v3733_v22 = vpop.f32.mrf.mxu2 }
0x12f1   : > { %v3735_v15 = vpop.f32.mrf.mxu2 }
0x135b   : > { %v3951_v25 = vpop.f32.mrf.mxu0 }
0x135c   : > { %v3971_v9 = vpop.f32.mrf.mxu1  ;;  %v3952_v62 = vadd.f32 %v3951_v25, %v3882_v49 }
0x135d   : > { %v3972_v14 = vadd.f32 %v3971_v9, %v3883_v27 }
0x135f   : > { %v3999_v54 = vrot.slane %v3972_v14, 4 }
0x1361   : > { %v4002_v29 = vsel %vm4000_vm8, %v3952_v62, %v3999_v54  ;;  %v3911_v37 = vpop.f32.mrf.mxu3 }
0x1362   : > { %v3991_v13 = vpop.f32.mrf.mxu2  ;;  %4006 = vst [vmem:[%s364_s12 + $0x8] sm:$0xff] %v4002_v29  ;;  %v3912_v47 = vadd.f32 %v3911_v37, %v3880_v23 }
0x1363   : > { %v3992_v63 = vadd.f32 %v3991_v13, %v3884_v16 }
0x1365   : > { %4007 = vst [vmem:[%s364_s12 + $0x10] sm:$0xf] %v3992_v63 }
0x1369   : > { %v3931_v18 = vpop.f32.mrf.mxu3 }
0x136a   : > { %v3932_v51 = vadd.f32 %v3931_v18, %v3881_v53 }
0x136c   : > { %v3998_v42 = vrot.slane %v3932_v51, 4 }
0x136e   : > { %v4001_v21 = vsel %vm4000_vm8, %v3912_v47, %v3998_v42 }
0x136f   : > { %4005 = vst [vmem:[%s364_s12] sm:$0xff] %v4001_v21 }
0x1370 PF: > { %s20_s13 = sadd.s32 1, %s4544_s13  }
0x1371   : > { %p17_p5 = scmp.ge.s32.totalorder %s20_s13, 4  }
0x1373   :  { %19 = sbr.rel (!%p17_p5) target bundleno = 1 (0x1), region = 96 }

</bundles_post_ra>
